<compile_context>
chip_gen: v7x
topology: tpu7x:2x2x1
jax: 0.10.0
libtpu: 0.0.40
codegen_flags: <defaults>
</compile_context>

<pallas_src>
import functools

import jax
import jax.numpy as jnp
import numpy as np
from jax.experimental import pallas as pl
from jax.experimental.pallas import tpu as pltpu

# f32 keeps bit-parity with the PyTorch reference.  Flip to jnp.bfloat16 on
# v6e/v7x for ~3x MXU throughput and half the banded-weight VMEM (per-matmul
# accumulation, bias and PReLU stay f32) -- validate numerics first, since the
# inter-layer activations would then round to bf16 eleven times.
COMPUTE_DTYPE = jnp.float32


# ----------------------------------------------------------------------------
# Pallas kernel: the entire IFBlock conv stack, VMEM-resident, one call.
# ----------------------------------------------------------------------------
def _fused_ifblock_kernel(img_lanes,
                          a_ref,
                          g1_ref, wb1_ref, b1_ref, p1_ref,
                          g2_ref, wb2_ref, b2_ref, p2_ref,
                          wimg_ref, bimg_ref, pimg_ref,
                          wbr_ref, bbr_ref, pbr_ref,
                          wmix_ref, bmix_ref, pmix_ref,
                          wd_ref, bd_ref,
                          mup_ref, mdn_ref,
                          o_ref, skip_ref):
    f32 = jnp.float32

    def prelu(acc, alpha):
        return jnp.where(acc >= 0.0, acc, acc * alpha)

    def stride2_layer(v, g_ref, wb_ref, b_row, a_row):
        # vertical tap / stride-2 / zero-pad via constant 0/1 row-gather matmuls
        # (block-diagonal over the folded batch); the 3 ky taps are then fused
        # along K into a single banded-weight MXU matmul.
        vc = v.astype(wb_ref.dtype)
        taps = [jnp.dot(g_ref[t], vc,
                        preferred_element_type=f32).astype(wb_ref.dtype)
                for t in range(3)]
        ycat = jnp.concatenate(taps, axis=-1)
        acc = jnp.dot(ycat, wb_ref[...], preferred_element_type=f32) + b_row
        return prelu(acc, a_row)

    x = a_ref[...]                                     # (B*h0, l0) f32
    x = stride2_layer(x, g1_ref, wb1_ref, b1_ref[...], p1_ref[...])
    x = stride2_layer(x, g2_ref, wb2_ref, b2_ref[...], p2_ref[...])

    rows = x.shape[0]                                  # B*h2 (static)
    m_up = mup_ref[...]                                # (rows, 1) boundary masks
    m_dn = mdn_ref[...]

    def taps_cat(v):
        # stride-1 vertical taps as XLU sublane rolls (no G matmul), zeroed at
        # image/batch boundaries, fused along K: [row i-1 | row i | row i+1].
        v_up = pltpu.roll(v, 1, axis=0) * m_up
        v_dn = pltpu.roll(v, rows - 1, axis=0) * m_dn
        return jnp.concatenate([v_up, v, v_dn], axis=-1)

    def conv3(v, wb, b_row, a_row):
        t = taps_cat(v).astype(wb.dtype)
        return prelu(jnp.dot(t, wb, preferred_element_type=f32) + b_row, a_row)

    # conv_img layers 3..5 on the image lanes only; the (already final)
    # non-image features are held aside instead of identity-band pass-through.
    xi = x[:, :img_lanes]
    x_non = x[:, img_lanes:]

    def img_body(l, v):
        return conv3(v, wimg_ref[l], bimg_ref[l], pimg_ref[l])
    xi = jax.lax.fori_loop(0, wimg_ref.shape[0], img_body, xi, unroll=True)

    # bridge conv over [img0 feat | img1 feat | nonimg feat]
    xb = conv3(jnp.concatenate([xi, x_non], axis=-1),
               wbr_ref[...], bbr_ref[...], pbr_ref[...])
    skip_ref[...] = xb                                 # residual in VMEM scratch

    # mixconv chain (stacked weights, visible loop)
    def mix_body(l, v):
        return conv3(v, wmix_ref[l], bmix_ref[l], pmix_ref[l])
    xm = jax.lax.fori_loop(0, wmix_ref.shape[0], mix_body, xb, unroll=True)

    x = xm + skip_ref[...]

    # lastconv ConvTranspose2d(k=4, s=2, p=1): ONE banded matmul emitting all
    # four sub-pixel parity planes concatenated along lanes (lane-dense store,
    # bias only -- no PReLU on this path).
    t = taps_cat(x).astype(wd_ref.dtype)
    out = jnp.dot(t, wd_ref[...], preferred_element_type=f32) + bd_ref[...]
    o_ref[...] = out.astype(o_ref.dtype)


def _const_index_map(nd, i):
    return (0,) * nd


def fused_ifblock_call(a0, plan):
    """a0: (B*h0, l0) rows = (batch, y), lanes = (image, x, channel)."""
    flat = plan["flat"]
    n_chunks = plan["n_chunks"]
    rows_in, rows_out = plan["rows0"], plan["rows2"]
    l0 = a0.shape[-1]
    lane_out = plan["lane_out"]

    in_specs = [pl.BlockSpec((rows_in, l0), lambda i: (i, 0))]
    for arr in flat:
        in_specs.append(
            pl.BlockSpec(arr.shape, functools.partial(_const_index_map, arr.ndim)))
    out_specs = pl.BlockSpec((rows_out, lane_out), lambda i: (i, 0))

    kernel = functools.partial(_fused_ifblock_kernel, plan["img_lanes"])
    return pl.pallas_call(
        kernel,
        out_shape=jax.ShapeDtypeStruct((n_chunks * rows_out, lane_out), jnp.float32),
        grid=(n_chunks,),
        in_specs=in_specs,
        out_specs=out_specs,
        scratch_shapes=[pltpu.VMEM((rows_out, plan["skip_lanes"]), jnp.float32)],
        compiler_params=pltpu.CompilerParams(
            dimension_semantics=("parallel",),
            vmem_limit_bytes=plan["vmem_limit_bytes"]),
        cost_estimate=plan["cost_estimate"],
    )(a0, *flat)


# ----------------------------------------------------------------------------
# Constant-matrix builders (numpy, run once outside jit)
# ----------------------------------------------------------------------------
def _make_stride2_gather(hin, hout, nb):
    """0/1 row-gather (vertical tap, stride 2, zero pad), block-diag over nb."""
    G = np.zeros((3, nb * hout, nb * hin), np.float32)
    for ky in range(3):
        for b in range(nb):
            for ho in range(hout):
                hi = 2 * ho + ky - 1
                if 0 <= hi < hin:
                    G[ky, b * hout + ho, b * hin + hi] = 1.0
    return G


def _make_banded_weight(entries, lin, lout):
    """Banded weight folding horizontal taps/stride/pad; ky folded into rows.
    Row index = ky*lin + in_base + wi*Cin + ci; col = out_base + wo*Cout + co."""
    Wb = np.zeros((3, lin, lout), np.float32)
    for e in entries:
        w = np.asarray(e["w"], np.float32)                 # (3, 3, Cin, Cout)
        cin, cout, s = e["Cin"], e["Cout"], e["stride"]
        for ky in range(3):
            for wo in range(e["Wout"]):
                for kx in range(3):
                    wi = s * wo + kx - 1
                    if 0 <= wi < e["Win"]:
                        r = e["in_base"] + wi * cin
                        c0 = e["out_base"] + wo * cout
                        Wb[ky, r:r + cin, c0:c0 + cout] += w[ky, kx]
    return Wb.reshape(3 * lin, lout)


def _make_epilogue_rows(lout, groups):
    brow = np.zeros((1, lout), np.float32)
    arow = np.ones((1, lout), np.float32)
    for (obase, wout, bvec, avec) in groups:
        bvec = np.asarray(bvec, np.float32)
        avec = np.asarray(avec, np.float32)
        cout = bvec.shape[0]
        brow[0, obase:obase + wout * cout] = np.tile(bvec, wout)
        arow[0, obase:obase + wout * cout] = np.tile(avec, wout)
    return brow, arow


def _make_deconv_weight(wl, bl, win, cin, cpad):
    """ConvTranspose2d(k=4, s=2, p=1) as ONE banded matmul.  Input rows are the
    [up | mid | down] vertical-tap blocks; output lanes are the 4 parity planes
    (py, px) back to back, each (win * cpad) lanes (cout padded to cpad)."""
    cout = wl.shape[-1]
    w = np.zeros((4, 4, cin, cpad), np.float32)
    w[..., :cout] = np.asarray(wl, np.float32)
    bpad = np.zeros((cpad,), np.float32)
    bpad[:cout] = np.asarray(bl, np.float32)

    lin = win * cin
    plane_lanes = win * cpad
    Wd = np.zeros((3, lin, 4 * plane_lanes), np.float32)   # tap blocks: up/mid/down
    # vertical: parity py -> [(ky, tap_block)] with tap_block 0=row i-1, 1=row i, 2=row i+1
    vert = {0: [(1, 1), (3, 0)], 1: [(0, 2), (2, 1)]}
    # horizontal: parity px -> [(kx, dx)] with input column wi = j + dx
    horiz = {0: [(1, 0), (3, -1)], 1: [(0, 1), (2, 0)]}
    for py in range(2):
        for px in range(2):
            pbase = (py * 2 + px) * plane_lanes
            for (ky, tb) in vert[py]:
                for j in range(win):
                    for (kx, dx) in horiz[px]:
                        wi = j + dx
                        if 0 <= wi < win:
                            Wd[tb, wi * cin:(wi + 1) * cin,
                               pbase + j * cpad:pbase + (j + 1) * cpad] += w[ky, kx]
    brow = np.zeros((1, 4 * plane_lanes), np.float32)
    for p in range(4):
        brow[0, p * plane_lanes:(p + 1) * plane_lanes] = np.tile(bpad, win)
    return Wd.reshape(3 * lin, 4 * plane_lanes), brow


def build_plan(params, batch, n_imgs, h0, w0, c, img_chans, nonimg_chans,
               out_chan_num, n_chunks=1):
    """Build all constant matrices for the fused kernel (call outside jit).
    n_chunks splits the folded batch across grid steps; pass n_chunks=2 on v7x
    (when B is even and (B//2)*h2 stays a multiple of 8) to feed both TCs."""
    assert batch % n_chunks == 0
    bchunk = batch // n_chunks
    half = c // 2
    conv_out = lambda s: (s - 1) // 2 + 1                 # k=3, stride=2, pad=1
    h1, w1 = conv_out(h0), conv_out(w0)
    h2, w2 = conv_out(h1), conv_out(w1)
    rows0, rows1, rows2 = bchunk * h0, bchunk * h1, bchunk * h2

    conv_img, conv_non = params["conv_img"], params["conv_nonimg"]

    l0 = n_imgs * w0 * img_chans + w0 * nonimg_chans
    L1 = (n_imgs + 1) * w1 * half
    L2 = (n_imgs + 1) * w2 * half
    Limg = n_imgs * w2 * half
    Lbr = (n_imgs + 1) * w2 * half
    Lc = w2 * c

    # stride-2 gathers (block-diagonal over the folded batch rows)
    g1 = _make_stride2_gather(h0, h1, bchunk)
    g2 = _make_stride2_gather(h1, h2, bchunk)

    # macro layer 1: conv_img[0] (x n_imgs images) || conv_nonimg[0], stride 2
    wi_, bi_, ai_, _ = conv_img[0]
    wn_, bn_, an_, _ = conv_non[0]
    entries = [dict(w=wi_, in_base=j * w0 * img_chans, out_base=j * w1 * half,
                    Win=w0, Wout=w1, Cin=img_chans, Cout=half, stride=2)
               for j in range(n_imgs)]
    entries.append(dict(w=wn_, in_base=n_imgs * w0 * img_chans,
                        out_base=n_imgs * w1 * half,
                        Win=w0, Wout=w1, Cin=nonimg_chans, Cout=half, stride=2))
    wb1 = _make_banded_weight(entries, l0, L1)
    groups = [(j * w1 * half, w1, bi_, ai_) for j in range(n_imgs)]
    groups.append((n_imgs * w1 * half, w1, bn_, an_))
    b1, p1 = _make_epilogue_rows(L1, groups)

    # macro layer 2: conv_img[1] || conv_nonimg[1], stride 2
    wi_, bi_, ai_, _ = conv_img[1]
    wn_, bn_, an_, _ = conv_non[1]
    entries = [dict(w=wi_, in_base=j * w1 * half, out_base=j * w2 * half,
                    Win=w1, Wout=w2, Cin=half, Cout=half, stride=2)
               for j in range(n_imgs)]
    entries.append(dict(w=wn_, in_base=n_imgs * w1 * half,
                        out_base=n_imgs * w2 * half,
                        Win=w1, Wout=w2, Cin=half, Cout=half, stride=2))
    wb2 = _make_banded_weight(entries, L1, L2)
    groups = [(j * w2 * half, w2, bi_, ai_) for j in range(n_imgs)]
    groups.append((n_imgs * w2 * half, w2, bn_, an_))
    b2, p2 = _make_epilogue_rows(L2, groups)

    # conv_img layers 3-5: image lanes only (no nonimg identity pass-through)
    wimg, bimg, pimg = [], [], []
    for li in range(2, 5):
        wi_, bi_, ai_, _ = conv_img[li]
        entries = [dict(w=wi_, in_base=j * w2 * half, out_base=j * w2 * half,
                        Win=w2, Wout=w2, Cin=half, Cout=half, stride=1)
                   for j in range(n_imgs)]
        wimg.append(_make_banded_weight(entries, Limg, Limg))
        br, ar = _make_epilogue_rows(
            Limg, [(j * w2 * half, w2, bi_, ai_) for j in range(n_imgs)])
        bimg.append(br)
        pimg.append(ar)
    wimg, bimg, pimg = np.stack(wimg), np.stack(bimg), np.stack(pimg)

    # bridge conv over [img0 feat | img1 feat | nonimg feat]
    wb_, bb_, ab_ = params["conv_bridge"]
    wb_np = np.asarray(wb_, np.float32)
    entries = [dict(w=wb_np[:, :, g * half:(g + 1) * half, :],
                    in_base=g * w2 * half, out_base=0,
                    Win=w2, Wout=w2, Cin=half, Cout=c, stride=1)
               for g in range(n_imgs + 1)]
    wbr = _make_banded_weight(entries, Lbr, Lc)
    bbr, pbr = _make_epilogue_rows(Lc, [(0, w2, bb_, ab_)])

    # mixconv x5
    wmix, bmix, pmix = [], [], []
    for (wm, bm, am) in params["mixconv"]:
        entries = [dict(w=wm, in_base=0, out_base=0, Win=w2, Wout=w2,
                        Cin=c, Cout=c, stride=1)]
        wmix.append(_make_banded_weight(entries, Lc, Lc))
        br, ar = _make_epilogue_rows(Lc, [(0, w2, bm, am)])
        bmix.append(br)
        pmix.append(ar)
    wmix, bmix, pmix = np.stack(wmix), np.stack(bmix), np.stack(pmix)

    # lastconv: ConvTranspose2d, cout padded (13 -> 16) for a clean lane layout
    wl, bl = params["lastconv"]
    cpad = int(np.ceil(out_chan_num / 8.0) * 8)
    wd, bd = _make_deconv_weight(np.asarray(wl, np.float32),
                                 np.asarray(bl, np.float32), w2, c, cpad)
    lane_out = 4 * w2 * cpad

    # batch/image boundary masks for the sublane rolls
    rr = np.arange(rows2)
    mup = (rr % h2 != 0).astype(np.float32)[:, None]
    mdn = (rr % h2 != h2 - 1).astype(np.float32)[:, None]

    wdt = COMPUTE_DTYPE
    flat = [
        jnp.asarray(g1, wdt), jnp.asarray(wb1, wdt),
        jnp.asarray(b1, jnp.float32), jnp.asarray(p1, jnp.float32),
        jnp.asarray(g2, wdt), jnp.asarray(wb2, wdt),
        jnp.asarray(b2, jnp.float32), jnp.asarray(p2, jnp.float32),
        jnp.asarray(wimg, wdt), jnp.asarray(bimg, jnp.float32), jnp.asarray(pimg, jnp.float32),
        jnp.asarray(wbr, wdt), jnp.asarray(bbr, jnp.float32), jnp.asarray(pbr, jnp.float32),
        jnp.asarray(wmix, wdt), jnp.asarray(bmix, jnp.float32), jnp.asarray(pmix, jnp.float32),
        jnp.asarray(wd, wdt), jnp.asarray(bd, jnp.float32),
        jnp.asarray(mup, jnp.float32), jnp.asarray(mdn, jnp.float32),
    ]

    # cost estimate + explicit VMEM budget (kept v7x-safe: <= 64 MiB)
    flops = n_chunks * (
        3 * 2 * rows1 * rows0 * l0 + 2 * rows1 * (3 * l0) * L1
        + 3 * 2 * rows2 * rows1 * L1 + 2 * rows2 * (3 * L1) * L2
        + 3 * (2 * rows2 * (3 * Limg) * Limg)
        + 2 * rows2 * (3 * Lbr) * Lc
        + 5 * (2 * rows2 * (3 * Lc) * Lc)
        + 2 * rows2 * (3 * Lc) * lane_out)
    const_bytes = sum(int(a.size) * a.dtype.itemsize for a in flat)
    io_bytes = batch * h0 * l0 * 4 + batch * h2 * lane_out * 4
    cost = pl.CostEstimate(flops=int(flops), transcendentals=0,
                           bytes_accessed=int(const_bytes + io_bytes))
    vmem_limit = int(min(64 * 1024 * 1024,
                         max(32 * 1024 * 1024,
                             2 * (const_bytes + io_bytes) + (8 << 20))))

    return dict(flat=flat, n_chunks=n_chunks, rows0=rows0, rows2=rows2,
                h2=h2, w2=w2, cpad=cpad, lane_out=lane_out,
                img_lanes=Limg, skip_lanes=Lc,
                cost_estimate=cost, vmem_limit_bytes=vmem_limit)


# ----------------------------------------------------------------------------
# Bilinear interpolation (PyTorch align_corners=False semantics) as constant
# matrix multiplications (no XLA gathers) -- plain-JAX glue around the kernel.
# ----------------------------------------------------------------------------
def _resize_matrix(in_size, out_size):
    scale = in_size / out_size
    s = (np.arange(out_size, dtype=np.float64) + 0.5) * scale - 0.5
    s = np.maximum(s, 0.0)
    i0 = np.minimum(np.floor(s).astype(np.int64), in_size - 1)
    frac = (s - i0).astype(np.float64)
    i1 = np.minimum(i0 + 1, in_size - 1)
    M = np.zeros((out_size, in_size), np.float64)
    M[np.arange(out_size), i0] += (1.0 - frac)
    M[np.arange(out_size), i1] += frac
    return M.astype(np.float32)


def bilinear_resize(x, out_h, out_w):
    N, H, W, C = x.shape
    if (out_h, out_w) == (H, W):
        return x
    ry = jnp.asarray(_resize_matrix(H, out_h))          # (out_h, H)
    rx = jnp.asarray(_resize_matrix(W, out_w))          # (out_w, W)
    y = jnp.einsum('oh,nhwc->nowc', ry, x)
    y = jnp.einsum('pw,nowc->nopc', rx, y)
    return y


# ----------------------------------------------------------------------------
# Parameter construction (deterministic, synthetic — no checkpoint loading)
# ----------------------------------------------------------------------------
# TODO(synk): real PyTorch ConvTranspose2d weights are (Cin, Cout, kH, kW);
# convert to (kH, kW, Cin, Cout) before calling build_plan on a checkpoint.
def init_conv(key, cin, cout, k=3):
    k1, k2 = jax.random.split(key)
    bound = 1.0 / float(cin * k * k) ** 0.5
    w = jax.random.uniform(k1, (k, k, cin, cout), jnp.float32, -bound, bound)
    b = jax.random.uniform(k2, (cout,), jnp.float32, -bound, bound)
    alpha = jnp.full((cout,), 0.25, jnp.float32)        # nn.PReLU default init
    return w, b, alpha


def make_params(key, c, img_chans, nonimg_chans, out_chan_num):
    keys = jax.random.split(key, 14)
    half = c // 2
    conv_img_cfg = [(img_chans, half, 2), (half, half, 2),
                    (half, half, 1), (half, half, 1), (half, half, 1)]
    conv_img = []
    for i, (ci, co, st) in enumerate(conv_img_cfg):
        w, b, a = init_conv(keys[i], ci, co)
        conv_img.append((w, b, a, st))

    conv_nonimg_cfg = [(nonimg_chans, half, 2), (half, half, 2)]
    conv_nonimg = []
    for j, (ci, co, st) in enumerate(conv_nonimg_cfg):
        w, b, a = init_conv(keys[5 + j], ci, co)
        conv_nonimg.append((w, b, a, st))

    conv_bridge = init_conv(keys[7], 3 * half, c)
    mixconv = [init_conv(keys[8 + i], c, c) for i in range(5)]

    kl1, kl2 = jax.random.split(keys[13])
    bound = 1.0 / float(c * 4 * 4) ** 0.5
    wl = jax.random.uniform(kl1, (4, 4, c, out_chan_num), jnp.float32, -bound, bound)
    bl = jax.random.uniform(kl2, (out_chan_num,), jnp.float32, -bound, bound)

    return {"conv_img": conv_img, "conv_nonimg": conv_nonimg,
            "conv_bridge": conv_bridge, "mixconv": mixconv,
            "lastconv": (wl, bl)}


# ----------------------------------------------------------------------------
# IFBlock.forward
# ----------------------------------------------------------------------------
def ifblock_forward(params, imgs, nonimg, flow, scale, img_chans, multi,
                    n_chunks=1):
    """imgs/nonimg/flow are NCHW float32 (matching the PyTorch interface)."""
    to_nhwc = lambda t: jnp.transpose(t, (0, 2, 3, 1))
    to_nchw = lambda t: jnp.transpose(t, (0, 3, 1, 2))

    B, CI, H, W = imgs.shape
    h, w = int(H / scale), int(W / scale)

    imgs_n = bilinear_resize(to_nhwc(imgs), h, w)
    non_n = bilinear_resize(to_nhwc(nonimg), h, w)
    if flow is not None:
        flow_n = bilinear_resize(to_nhwc(flow), h, w) * (1.0 / scale)
        non_n = jnp.concatenate([non_n, flow_n], axis=-1)

    n_imgs = CI // img_chans
    nonimg_chans = non_n.shape[-1]
    c = params["conv_bridge"][0].shape[-1]
    out_chan_num = params["lastconv"][0].shape[-1]

    # pack to the kernel layout: rows = (batch, y), lanes = (image, x, channel)
    a_img = imgs_n.reshape(B, h, w, n_imgs, img_chans)
    a_img = jnp.transpose(a_img, (0, 1, 3, 2, 4)).reshape(B, h, n_imgs * w * img_chans)
    a_non = non_n.reshape(B, h, w * nonimg_chans)
    a0 = jnp.concatenate([a_img, a_non], axis=-1).reshape(B * h, -1)

    plan = build_plan(params, B, n_imgs, h, w, c, img_chans, nonimg_chans,
                      out_chan_num, n_chunks=n_chunks)
    out2d = fused_ifblock_call(a0, plan)                # (B*h2, 4*w2*cpad)

    h2, w2, cpad = plan["h2"], plan["w2"], plan["cpad"]
    # lanes are (py, px, j, co); un-interleave the 4 parity planes
    pp = out2d.reshape(B, h2, 2, 2, w2, cpad)
    unscaled = jnp.transpose(pp, (0, 1, 2, 4, 3, 5)).reshape(B, 2 * h2, 2 * w2, cpad)
    unscaled = unscaled[..., :out_chan_num]

    out_h = int(unscaled.shape[1] * scale * 2)
    out_w = int(unscaled.shape[2] * scale * 2)
    scaled = bilinear_resize(unscaled, out_h, out_w)
    multiflow = scaled[..., :4 * multi] * (scale * 2.0)
    multimask_score = scaled[..., 4 * multi:]
    return to_nchw(multiflow), to_nchw(multimask_score)


# ----------------------------------------------------------------------------
if __name__ == "__main__":
    key = jax.random.PRNGKey(0)
    k_img, k_non, k_flow, k_par = jax.random.split(key, 4)

    # Module config: IFBlock("blk", c=16, img_chans=3, nonimg_chans=6, multi=2)
    c = 16
    img_chans = 3
    nonimg_chans = 6          # 2 raw non-image channels + 4 flow channels
    multi = 2
    global_mask_chans = 1
    out_chan_num = 6 * multi + global_mask_chans        # 13
    B, H, W = 2, 32, 32
    scale = 2.0

    imgs = jax.random.normal(k_img, (B, 2 * img_chans, H, W), jnp.float32)
    nonimg = jax.random.normal(k_non, (B, nonimg_chans - 4, H, W), jnp.float32)
    flow = jax.random.normal(k_flow, (B, 4, H, W), jnp.float32)

    params = make_params(k_par, c, img_chans, nonimg_chans, out_chan_num)

    multiflow, multimask = ifblock_forward(
        params, imgs, nonimg, flow, scale, img_chans, multi)
    jax.block_until_ready((multiflow, multimask))

    assert multiflow.shape == (B, 4 * multi, H, W), multiflow.shape
    assert multimask.shape == (B, out_chan_num - 4 * multi, H, W), multimask.shape
    assert bool(jnp.all(jnp.isfinite(multiflow))) and bool(jnp.all(jnp.isfinite(multimask)))
    print("KERNEL_OK")
</pallas_src>

<mosaic_0001>
module attributes {stable_mosaic.version = 11 : i64} {
  func.func @_fused_ifblock_kernel(%arg0: i32, %arg1: memref<32x192xf32, #tpu.memory_space<vmem>>, %arg2: memref<3x16x32xf32, #tpu.memory_space<vmem>>, %arg3: memref<576x192xf32, #tpu.memory_space<vmem>>, %arg4: memref<1x192xf32, #tpu.memory_space<vmem>>, %arg5: memref<1x192xf32, #tpu.memory_space<vmem>>, %arg6: memref<3x8x16xf32, #tpu.memory_space<vmem>>, %arg7: memref<576x96xf32, #tpu.memory_space<vmem>>, %arg8: memref<1x96xf32, #tpu.memory_space<vmem>>, %arg9: memref<1x96xf32, #tpu.memory_space<vmem>>, %arg10: memref<3x192x64xf32, #tpu.memory_space<vmem>>, %arg11: memref<3x1x64xf32, #tpu.memory_space<vmem>>, %arg12: memref<3x1x64xf32, #tpu.memory_space<vmem>>, %arg13: memref<288x64xf32, #tpu.memory_space<vmem>>, %arg14: memref<1x64xf32, #tpu.memory_space<vmem>>, %arg15: memref<1x64xf32, #tpu.memory_space<vmem>>, %arg16: memref<5x192x64xf32, #tpu.memory_space<vmem>>, %arg17: memref<5x1x64xf32, #tpu.memory_space<vmem>>, %arg18: memref<5x1x64xf32, #tpu.memory_space<vmem>>, %arg19: memref<192x256xf32, #tpu.memory_space<vmem>>, %arg20: memref<1x256xf32, #tpu.memory_space<vmem>>, %arg21: memref<8x1xf32, #tpu.memory_space<vmem>>, %arg22: memref<8x1xf32, #tpu.memory_space<vmem>>, %arg23: memref<8x256xf32, #tpu.memory_space<vmem>>, %arg24: memref<8x64xf32, #tpu.memory_space<vmem>>) attributes {dimension_semantics = [#tpu.dimension_semantics<parallel>], iteration_bounds = array<i64: 1>, scalar_prefetch = 0 : i64, scratch_operands = 1 : i64, tpu.core_type = #tpu.core_type<tc>, window_params = [{transform_indices = @transform_0, window_bounds = array<i64: 32, 192>}, {pipeline_mode = #tpu.pipeline_mode<synchronous>, transform_indices = @transform_1, window_bounds = array<i64: 3, 16, 32>}, {pipeline_mode = #tpu.pipeline_mode<synchronous>, transform_indices = @transform_2, window_bounds = array<i64: 576, 192>}, {pipeline_mode = #tpu.pipeline_mode<synchronous>, transform_indices = @transform_3, window_bounds = array<i64: 1, 192>}, {pipeline_mode = #tpu.pipeline_mode<synchronous>, transform_indices = @transform_4, window_bounds = array<i64: 1, 192>}, {pipeline_mode = #tpu.pipeline_mode<synchronous>, transform_indices = @transform_5, window_bounds = array<i64: 3, 8, 16>}, {pipeline_mode = #tpu.pipeline_mode<synchronous>, transform_indices = @transform_6, window_bounds = array<i64: 576, 96>}, {pipeline_mode = #tpu.pipeline_mode<synchronous>, transform_indices = @transform_7, window_bounds = array<i64: 1, 96>}, {pipeline_mode = #tpu.pipeline_mode<synchronous>, transform_indices = @transform_8, window_bounds = array<i64: 1, 96>}, {pipeline_mode = #tpu.pipeline_mode<synchronous>, transform_indices = @transform_9, window_bounds = array<i64: 3, 192, 64>}, {pipeline_mode = #tpu.pipeline_mode<synchronous>, transform_indices = @transform_10, window_bounds = array<i64: 3, 1, 64>}, {pipeline_mode = #tpu.pipeline_mode<synchronous>, transform_indices = @transform_11, window_bounds = array<i64: 3, 1, 64>}, {pipeline_mode = #tpu.pipeline_mode<synchronous>, transform_indices = @transform_12, window_bounds = array<i64: 288, 64>}, {pipeline_mode = #tpu.pipeline_mode<synchronous>, transform_indices = @transform_13, window_bounds = array<i64: 1, 64>}, {pipeline_mode = #tpu.pipeline_mode<synchronous>, transform_indices = @transform_14, window_bounds = array<i64: 1, 64>}, {pipeline_mode = #tpu.pipeline_mode<synchronous>, transform_indices = @transform_15, window_bounds = array<i64: 5, 192, 64>}, {pipeline_mode = #tpu.pipeline_mode<synchronous>, transform_indices = @transform_16, window_bounds = array<i64: 5, 1, 64>}, {pipeline_mode = #tpu.pipeline_mode<synchronous>, transform_indices = @transform_17, window_bounds = array<i64: 5, 1, 64>}, {pipeline_mode = #tpu.pipeline_mode<synchronous>, transform_indices = @transform_18, window_bounds = array<i64: 192, 256>}, {pipeline_mode = #tpu.pipeline_mode<synchronous>, transform_indices = @transform_19, window_bounds = array<i64: 1, 256>}, {pipeline_mode = #tpu.pipeline_mode<synchronous>, transform_indices = @transform_20, window_bounds = array<i64: 8, 1>}, {pipeline_mode = #tpu.pipeline_mode<synchronous>, transform_indices = @transform_21, window_bounds = array<i64: 8, 1>}, {transform_indices = @transform_22, window_bounds = array<i64: 8, 256>}]} {
    %c0 = arith.constant 0 : index
    %c0_0 = arith.constant 0 : index
    %0 = vector.load %arg1[%c0, %c0_0] : memref<32x192xf32, #tpu.memory_space<vmem>>, vector<32x192xf32>
    %c0_1 = arith.constant 0 : index
    %c0_2 = arith.constant 0 : index
    %1 = vector.load %arg4[%c0_1, %c0_2] : memref<1x192xf32, #tpu.memory_space<vmem>>, vector<1x192xf32>
    %c0_3 = arith.constant 0 : index
    %c0_4 = arith.constant 0 : index
    %2 = vector.load %arg5[%c0_3, %c0_4] : memref<1x192xf32, #tpu.memory_space<vmem>>, vector<1x192xf32>
    %c0_5 = arith.constant 0 : index
    %c0_6 = arith.constant 0 : index
    %c0_7 = arith.constant 0 : index
    %3 = vector.load %arg2[%c0_5, %c0_6, %c0_7] : memref<3x16x32xf32, #tpu.memory_space<vmem>>, vector<1x16x32xf32>
    %4 = vector.shape_cast %3 : vector<1x16x32xf32> to vector<16x32xf32>
    %cst = arith.constant dense<0.000000e+00> : vector<16x192xf32>
    %5 = tpu.matmul %4, %0, %cst {dimension_numbers = #tpu.dot_dimension_numbers<[1], [0], [0], [1], [0, 0, 1, 1], [], []>} : vector<16x32xf32>, vector<32x192xf32>, vector<16x192xf32> -> vector<16x192xf32>
    %c1 = arith.constant 1 : index
    %c0_8 = arith.constant 0 : index
    %c0_9 = arith.constant 0 : index
    %6 = vector.load %arg2[%c1, %c0_8, %c0_9] : memref<3x16x32xf32, #tpu.memory_space<vmem>>, vector<1x16x32xf32>
    %7 = vector.shape_cast %6 : vector<1x16x32xf32> to vector<16x32xf32>
    %cst_10 = arith.constant dense<0.000000e+00> : vector<16x192xf32>
    %8 = tpu.matmul %7, %0, %cst_10 {dimension_numbers = #tpu.dot_dimension_numbers<[1], [0], [0], [1], [0, 0, 1, 1], [], []>} : vector<16x32xf32>, vector<32x192xf32>, vector<16x192xf32> -> vector<16x192xf32>
    %c2 = arith.constant 2 : index
    %c0_11 = arith.constant 0 : index
    %c0_12 = arith.constant 0 : index
    %9 = vector.load %arg2[%c2, %c0_11, %c0_12] : memref<3x16x32xf32, #tpu.memory_space<vmem>>, vector<1x16x32xf32>
    %10 = vector.shape_cast %9 : vector<1x16x32xf32> to vector<16x32xf32>
    %cst_13 = arith.constant dense<0.000000e+00> : vector<16x192xf32>
    %11 = tpu.matmul %10, %0, %cst_13 {dimension_numbers = #tpu.dot_dimension_numbers<[1], [0], [0], [1], [0, 0, 1, 1], [], []>} : vector<16x32xf32>, vector<32x192xf32>, vector<16x192xf32> -> vector<16x192xf32>
    %12 = tpu.concatenate %5, %8, %11 in 1 : vector<16x192xf32>, vector<16x192xf32>, vector<16x192xf32> -> vector<16x576xf32>
    %c0_14 = arith.constant 0 : index
    %c0_15 = arith.constant 0 : index
    %13 = vector.load %arg3[%c0_14, %c0_15] : memref<576x192xf32, #tpu.memory_space<vmem>>, vector<576x192xf32>
    %cst_16 = arith.constant dense<0.000000e+00> : vector<16x192xf32>
    %14 = tpu.matmul %12, %13, %cst_16 {dimension_numbers = #tpu.dot_dimension_numbers<[1], [0], [0], [1], [0, 0, 1, 1], [], []>} : vector<16x576xf32>, vector<576x192xf32>, vector<16x192xf32> -> vector<16x192xf32>
    %15 = vector.broadcast %1 : vector<1x192xf32> to vector<16x192xf32>
    %16 = arith.addf %14, %15 : vector<16x192xf32>
    %cst_17 = arith.constant 0.000000e+00 : f32
    %17 = vector.broadcast %cst_17 : f32 to vector<16x192xf32>
    %18 = arith.cmpf oge, %16, %17 : vector<16x192xf32>
    %19 = vector.broadcast %2 : vector<1x192xf32> to vector<16x192xf32>
    %20 = arith.mulf %16, %19 : vector<16x192xf32>
    %21 = arith.select %18, %16, %20 : vector<16x192xi1>, vector<16x192xf32>
    %c0_18 = arith.constant 0 : index
    %c0_19 = arith.constant 0 : index
    %22 = vector.load %arg8[%c0_18, %c0_19] : memref<1x96xf32, #tpu.memory_space<vmem>>, vector<1x96xf32>
    %c0_20 = arith.constant 0 : index
    %c0_21 = arith.constant 0 : index
    %23 = vector.load %arg9[%c0_20, %c0_21] : memref<1x96xf32, #tpu.memory_space<vmem>>, vector<1x96xf32>
    %c0_22 = arith.constant 0 : index
    %c0_23 = arith.constant 0 : index
    %c0_24 = arith.constant 0 : index
    %24 = vector.load %arg6[%c0_22, %c0_23, %c0_24] : memref<3x8x16xf32, #tpu.memory_space<vmem>>, vector<1x8x16xf32>
    %25 = vector.shape_cast %24 : vector<1x8x16xf32> to vector<8x16xf32>
    %cst_25 = arith.constant dense<0.000000e+00> : vector<8x192xf32>
    %26 = tpu.matmul %25, %21, %cst_25 {dimension_numbers = #tpu.dot_dimension_numbers<[1], [0], [0], [1], [0, 0, 1, 1], [], []>} : vector<8x16xf32>, vector<16x192xf32>, vector<8x192xf32> -> vector<8x192xf32>
    %c1_26 = arith.constant 1 : index
    %c0_27 = arith.constant 0 : index
    %c0_28 = arith.constant 0 : index
    %27 = vector.load %arg6[%c1_26, %c0_27, %c0_28] : memref<3x8x16xf32, #tpu.memory_space<vmem>>, vector<1x8x16xf32>
    %28 = vector.shape_cast %27 : vector<1x8x16xf32> to vector<8x16xf32>
    %cst_29 = arith.constant dense<0.000000e+00> : vector<8x192xf32>
    %29 = tpu.matmul %28, %21, %cst_29 {dimension_numbers = #tpu.dot_dimension_numbers<[1], [0], [0], [1], [0, 0, 1, 1], [], []>} : vector<8x16xf32>, vector<16x192xf32>, vector<8x192xf32> -> vector<8x192xf32>
    %c2_30 = arith.constant 2 : index
    %c0_31 = arith.constant 0 : index
    %c0_32 = arith.constant 0 : index
    %30 = vector.load %arg6[%c2_30, %c0_31, %c0_32] : memref<3x8x16xf32, #tpu.memory_space<vmem>>, vector<1x8x16xf32>
    %31 = vector.shape_cast %30 : vector<1x8x16xf32> to vector<8x16xf32>
    %cst_33 = arith.constant dense<0.000000e+00> : vector<8x192xf32>
    %32 = tpu.matmul %31, %21, %cst_33 {dimension_numbers = #tpu.dot_dimension_numbers<[1], [0], [0], [1], [0, 0, 1, 1], [], []>} : vector<8x16xf32>, vector<16x192xf32>, vector<8x192xf32> -> vector<8x192xf32>
    %33 = tpu.concatenate %26, %29, %32 in 1 : vector<8x192xf32>, vector<8x192xf32>, vector<8x192xf32> -> vector<8x576xf32>
    %c0_34 = arith.constant 0 : index
    %c0_35 = arith.constant 0 : index
    %34 = vector.load %arg7[%c0_34, %c0_35] : memref<576x96xf32, #tpu.memory_space<vmem>>, vector<576x96xf32>
    %cst_36 = arith.constant dense<0.000000e+00> : vector<8x96xf32>
    %35 = tpu.matmul %33, %34, %cst_36 {dimension_numbers = #tpu.dot_dimension_numbers<[1], [0], [0], [1], [0, 0, 1, 1], [], []>} : vector<8x576xf32>, vector<576x96xf32>, vector<8x96xf32> -> vector<8x96xf32>
    %36 = vector.broadcast %22 : vector<1x96xf32> to vector<8x96xf32>
    %37 = arith.addf %35, %36 : vector<8x96xf32>
    %cst_37 = arith.constant 0.000000e+00 : f32
    %38 = vector.broadcast %cst_37 : f32 to vector<8x96xf32>
    %39 = arith.cmpf oge, %37, %38 : vector<8x96xf32>
    %40 = vector.broadcast %23 : vector<1x96xf32> to vector<8x96xf32>
    %41 = arith.mulf %37, %40 : vector<8x96xf32>
    %42 = arith.select %39, %37, %41 : vector<8x96xi1>, vector<8x96xf32>
    %c0_38 = arith.constant 0 : index
    %c0_39 = arith.constant 0 : index
    %43 = vector.load %arg21[%c0_38, %c0_39] : memref<8x1xf32, #tpu.memory_space<vmem>>, vector<8x1xf32>
    %c0_40 = arith.constant 0 : index
    %c0_41 = arith.constant 0 : index
    %44 = vector.load %arg22[%c0_40, %c0_41] : memref<8x1xf32, #tpu.memory_space<vmem>>, vector<8x1xf32>
    %45 = vector.extract_strided_slice %42 {offsets = [0, 0], sizes = [8, 64], strides = [1, 1]} : vector<8x96xf32> to vector<8x64xf32>
    %46 = vector.extract_strided_slice %42 {offsets = [0, 64], sizes = [8, 32], strides = [1, 1]} : vector<8x96xf32> to vector<8x32xf32>
    %c0_i32 = arith.constant 0 : i32
    %47 = arith.index_cast %c0_i32 : i32 to index
    %c0_42 = arith.constant 0 : index
    %c0_43 = arith.constant 0 : index
    %48 = vector.load %arg10[%47, %c0_42, %c0_43] : memref<3x192x64xf32, #tpu.memory_space<vmem>>, vector<1x192x64xf32>
    %49 = vector.shape_cast %48 : vector<1x192x64xf32> to vector<192x64xf32>
    %50 = arith.index_cast %c0_i32 : i32 to index
    %c0_44 = arith.constant 0 : index
    %c0_45 = arith.constant 0 : index
    %51 = vector.load %arg11[%50, %c0_44, %c0_45] : memref<3x1x64xf32, #tpu.memory_space<vmem>>, vector<1x1x64xf32>
    %52 = vector.shape_cast %51 : vector<1x1x64xf32> to vector<1x64xf32>
    %53 = arith.index_cast %c0_i32 : i32 to index
    %c0_46 = arith.constant 0 : index
    %c0_47 = arith.constant 0 : index
    %54 = vector.load %arg12[%53, %c0_46, %c0_47] : memref<3x1x64xf32, #tpu.memory_space<vmem>>, vector<1x1x64xf32>
    %55 = vector.shape_cast %54 : vector<1x1x64xf32> to vector<1x64xf32>
    %c1_i32 = arith.constant 1 : i32
    %56 = tpu.dynamic_rotate %45 by %c1_i32 dim 0 : vector<8x64xf32>, i32 -> vector<8x64xf32>
    %57 = vector.broadcast %43 : vector<8x1xf32> to vector<8x64xf32>
    %58 = arith.mulf %56, %57 : vector<8x64xf32>
    %c7_i32 = arith.constant 7 : i32
    %59 = tpu.dynamic_rotate %45 by %c7_i32 dim 0 : vector<8x64xf32>, i32 -> vector<8x64xf32>
    %60 = vector.broadcast %44 : vector<8x1xf32> to vector<8x64xf32>
    %61 = arith.mulf %59, %60 : vector<8x64xf32>
    %62 = tpu.concatenate %58, %45, %61 in 1 : vector<8x64xf32>, vector<8x64xf32>, vector<8x64xf32> -> vector<8x192xf32>
    %cst_48 = arith.constant dense<0.000000e+00> : vector<8x64xf32>
    %63 = tpu.matmul %62, %49, %cst_48 {dimension_numbers = #tpu.dot_dimension_numbers<[1], [0], [0], [1], [0, 0, 1, 1], [], []>} : vector<8x192xf32>, vector<192x64xf32>, vector<8x64xf32> -> vector<8x64xf32>
    %64 = vector.broadcast %52 : vector<1x64xf32> to vector<8x64xf32>
    %65 = arith.addf %63, %64 : vector<8x64xf32>
    %cst_49 = arith.constant 0.000000e+00 : f32
    %66 = vector.broadcast %cst_49 : f32 to vector<8x64xf32>
    %67 = arith.cmpf oge, %65, %66 : vector<8x64xf32>
    %68 = vector.broadcast %55 : vector<1x64xf32> to vector<8x64xf32>
    %69 = arith.mulf %65, %68 : vector<8x64xf32>
    %70 = arith.select %67, %65, %69 : vector<8x64xi1>, vector<8x64xf32>
    %c1_i32_50 = arith.constant 1 : i32
    %71 = arith.index_cast %c1_i32_50 : i32 to index
    %c0_51 = arith.constant 0 : index
    %c0_52 = arith.constant 0 : index
    %72 = vector.load %arg10[%71, %c0_51, %c0_52] : memref<3x192x64xf32, #tpu.memory_space<vmem>>, vector<1x192x64xf32>
    %73 = vector.shape_cast %72 : vector<1x192x64xf32> to vector<192x64xf32>
    %74 = arith.index_cast %c1_i32_50 : i32 to index
    %c0_53 = arith.constant 0 : index
    %c0_54 = arith.constant 0 : index
    %75 = vector.load %arg11[%74, %c0_53, %c0_54] : memref<3x1x64xf32, #tpu.memory_space<vmem>>, vector<1x1x64xf32>
    %76 = vector.shape_cast %75 : vector<1x1x64xf32> to vector<1x64xf32>
    %77 = arith.index_cast %c1_i32_50 : i32 to index
    %c0_55 = arith.constant 0 : index
    %c0_56 = arith.constant 0 : index
    %78 = vector.load %arg12[%77, %c0_55, %c0_56] : memref<3x1x64xf32, #tpu.memory_space<vmem>>, vector<1x1x64xf32>
    %79 = vector.shape_cast %78 : vector<1x1x64xf32> to vector<1x64xf32>
    %c1_i32_57 = arith.constant 1 : i32
    %80 = tpu.dynamic_rotate %70 by %c1_i32_57 dim 0 : vector<8x64xf32>, i32 -> vector<8x64xf32>
    %81 = vector.broadcast %43 : vector<8x1xf32> to vector<8x64xf32>
    %82 = arith.mulf %80, %81 : vector<8x64xf32>
    %c7_i32_58 = arith.constant 7 : i32
    %83 = tpu.dynamic_rotate %70 by %c7_i32_58 dim 0 : vector<8x64xf32>, i32 -> vector<8x64xf32>
    %84 = vector.broadcast %44 : vector<8x1xf32> to vector<8x64xf32>
    %85 = arith.mulf %83, %84 : vector<8x64xf32>
    %86 = tpu.concatenate %82, %70, %85 in 1 : vector<8x64xf32>, vector<8x64xf32>, vector<8x64xf32> -> vector<8x192xf32>
    %cst_59 = arith.constant dense<0.000000e+00> : vector<8x64xf32>
    %87 = tpu.matmul %86, %73, %cst_59 {dimension_numbers = #tpu.dot_dimension_numbers<[1], [0], [0], [1], [0, 0, 1, 1], [], []>} : vector<8x192xf32>, vector<192x64xf32>, vector<8x64xf32> -> vector<8x64xf32>
    %88 = vector.broadcast %76 : vector<1x64xf32> to vector<8x64xf32>
    %89 = arith.addf %87, %88 : vector<8x64xf32>
    %cst_60 = arith.constant 0.000000e+00 : f32
    %90 = vector.broadcast %cst_60 : f32 to vector<8x64xf32>
    %91 = arith.cmpf oge, %89, %90 : vector<8x64xf32>
    %92 = vector.broadcast %79 : vector<1x64xf32> to vector<8x64xf32>
    %93 = arith.mulf %89, %92 : vector<8x64xf32>
    %94 = arith.select %91, %89, %93 : vector<8x64xi1>, vector<8x64xf32>
    %c2_i32 = arith.constant 2 : i32
    %95 = arith.index_cast %c2_i32 : i32 to index
    %c0_61 = arith.constant 0 : index
    %c0_62 = arith.constant 0 : index
    %96 = vector.load %arg10[%95, %c0_61, %c0_62] : memref<3x192x64xf32, #tpu.memory_space<vmem>>, vector<1x192x64xf32>
    %97 = vector.shape_cast %96 : vector<1x192x64xf32> to vector<192x64xf32>
    %98 = arith.index_cast %c2_i32 : i32 to index
    %c0_63 = arith.constant 0 : index
    %c0_64 = arith.constant 0 : index
    %99 = vector.load %arg11[%98, %c0_63, %c0_64] : memref<3x1x64xf32, #tpu.memory_space<vmem>>, vector<1x1x64xf32>
    %100 = vector.shape_cast %99 : vector<1x1x64xf32> to vector<1x64xf32>
    %101 = arith.index_cast %c2_i32 : i32 to index
    %c0_65 = arith.constant 0 : index
    %c0_66 = arith.constant 0 : index
    %102 = vector.load %arg12[%101, %c0_65, %c0_66] : memref<3x1x64xf32, #tpu.memory_space<vmem>>, vector<1x1x64xf32>
    %103 = vector.shape_cast %102 : vector<1x1x64xf32> to vector<1x64xf32>
    %c1_i32_67 = arith.constant 1 : i32
    %104 = tpu.dynamic_rotate %94 by %c1_i32_67 dim 0 : vector<8x64xf32>, i32 -> vector<8x64xf32>
    %105 = vector.broadcast %43 : vector<8x1xf32> to vector<8x64xf32>
    %106 = arith.mulf %104, %105 : vector<8x64xf32>
    %c7_i32_68 = arith.constant 7 : i32
    %107 = tpu.dynamic_rotate %94 by %c7_i32_68 dim 0 : vector<8x64xf32>, i32 -> vector<8x64xf32>
    %108 = vector.broadcast %44 : vector<8x1xf32> to vector<8x64xf32>
    %109 = arith.mulf %107, %108 : vector<8x64xf32>
    %110 = tpu.concatenate %106, %94, %109 in 1 : vector<8x64xf32>, vector<8x64xf32>, vector<8x64xf32> -> vector<8x192xf32>
    %cst_69 = arith.constant dense<0.000000e+00> : vector<8x64xf32>
    %111 = tpu.matmul %110, %97, %cst_69 {dimension_numbers = #tpu.dot_dimension_numbers<[1], [0], [0], [1], [0, 0, 1, 1], [], []>} : vector<8x192xf32>, vector<192x64xf32>, vector<8x64xf32> -> vector<8x64xf32>
    %112 = vector.broadcast %100 : vector<1x64xf32> to vector<8x64xf32>
    %113 = arith.addf %111, %112 : vector<8x64xf32>
    %cst_70 = arith.constant 0.000000e+00 : f32
    %114 = vector.broadcast %cst_70 : f32 to vector<8x64xf32>
    %115 = arith.cmpf oge, %113, %114 : vector<8x64xf32>
    %116 = vector.broadcast %103 : vector<1x64xf32> to vector<8x64xf32>
    %117 = arith.mulf %113, %116 : vector<8x64xf32>
    %118 = arith.select %115, %113, %117 : vector<8x64xi1>, vector<8x64xf32>
    %c3_i32 = arith.constant 3 : i32
    %119 = tpu.concatenate %118, %46 in 1 : vector<8x64xf32>, vector<8x32xf32> -> vector<8x96xf32>
    %c0_71 = arith.constant 0 : index
    %c0_72 = arith.constant 0 : index
    %120 = vector.load %arg13[%c0_71, %c0_72] : memref<288x64xf32, #tpu.memory_space<vmem>>, vector<288x64xf32>
    %c0_73 = arith.constant 0 : index
    %c0_74 = arith.constant 0 : index
    %121 = vector.load %arg14[%c0_73, %c0_74] : memref<1x64xf32, #tpu.memory_space<vmem>>, vector<1x64xf32>
    %c0_75 = arith.constant 0 : index
    %c0_76 = arith.constant 0 : index
    %122 = vector.load %arg15[%c0_75, %c0_76] : memref<1x64xf32, #tpu.memory_space<vmem>>, vector<1x64xf32>
    %c1_i32_77 = arith.constant 1 : i32
    %123 = tpu.dynamic_rotate %119 by %c1_i32_77 dim 0 : vector<8x96xf32>, i32 -> vector<8x96xf32>
    %124 = vector.broadcast %43 : vector<8x1xf32> to vector<8x96xf32>
    %125 = arith.mulf %123, %124 : vector<8x96xf32>
    %c7_i32_78 = arith.constant 7 : i32
    %126 = tpu.dynamic_rotate %119 by %c7_i32_78 dim 0 : vector<8x96xf32>, i32 -> vector<8x96xf32>
    %127 = vector.broadcast %44 : vector<8x1xf32> to vector<8x96xf32>
    %128 = arith.mulf %126, %127 : vector<8x96xf32>
    %129 = tpu.concatenate %125, %119, %128 in 1 : vector<8x96xf32>, vector<8x96xf32>, vector<8x96xf32> -> vector<8x288xf32>
    %cst_79 = arith.constant dense<0.000000e+00> : vector<8x64xf32>
    %130 = tpu.matmul %129, %120, %cst_79 {dimension_numbers = #tpu.dot_dimension_numbers<[1], [0], [0], [1], [0, 0, 1, 1], [], []>} : vector<8x288xf32>, vector<288x64xf32>, vector<8x64xf32> -> vector<8x64xf32>
    %131 = vector.broadcast %121 : vector<1x64xf32> to vector<8x64xf32>
    %132 = arith.addf %130, %131 : vector<8x64xf32>
    %cst_80 = arith.constant 0.000000e+00 : f32
    %133 = vector.broadcast %cst_80 : f32 to vector<8x64xf32>
    %134 = arith.cmpf oge, %132, %133 : vector<8x64xf32>
    %135 = vector.broadcast %122 : vector<1x64xf32> to vector<8x64xf32>
    %136 = arith.mulf %132, %135 : vector<8x64xf32>
    %137 = arith.select %134, %132, %136 : vector<8x64xi1>, vector<8x64xf32>
    %c0_81 = arith.constant 0 : index
    %c0_82 = arith.constant 0 : index
    %138 = vector.load %arg24[%c0_81, %c0_82] : memref<8x64xf32, #tpu.memory_space<vmem>>, vector<8x64xf32>
    tpu.vector_store %arg24[%c0_81, %c0_82], %137 {strides = array<i32>} : memref<8x64xf32, #tpu.memory_space<vmem>>, vector<8x64xf32>,
    %c0_i32_83 = arith.constant 0 : i32
    %139 = arith.index_cast %c0_i32_83 : i32 to index
    %c0_84 = arith.constant 0 : index
    %c0_85 = arith.constant 0 : index
    %140 = vector.load %arg16[%139, %c0_84, %c0_85] : memref<5x192x64xf32, #tpu.memory_space<vmem>>, vector<1x192x64xf32>
    %141 = vector.shape_cast %140 : vector<1x192x64xf32> to vector<192x64xf32>
    %142 = arith.index_cast %c0_i32_83 : i32 to index
    %c0_86 = arith.constant 0 : index
    %c0_87 = arith.constant 0 : index
    %143 = vector.load %arg17[%142, %c0_86, %c0_87] : memref<5x1x64xf32, #tpu.memory_space<vmem>>, vector<1x1x64xf32>
    %144 = vector.shape_cast %143 : vector<1x1x64xf32> to vector<1x64xf32>
    %145 = arith.index_cast %c0_i32_83 : i32 to index
    %c0_88 = arith.constant 0 : index
    %c0_89 = arith.constant 0 : index
    %146 = vector.load %arg18[%145, %c0_88, %c0_89] : memref<5x1x64xf32, #tpu.memory_space<vmem>>, vector<1x1x64xf32>
    %147 = vector.shape_cast %146 : vector<1x1x64xf32> to vector<1x64xf32>
    %c1_i32_90 = arith.constant 1 : i32
    %148 = tpu.dynamic_rotate %137 by %c1_i32_90 dim 0 : vector<8x64xf32>, i32 -> vector<8x64xf32>
    %149 = vector.broadcast %43 : vector<8x1xf32> to vector<8x64xf32>
    %150 = arith.mulf %148, %149 : vector<8x64xf32>
    %c7_i32_91 = arith.constant 7 : i32
    %151 = tpu.dynamic_rotate %137 by %c7_i32_91 dim 0 : vector<8x64xf32>, i32 -> vector<8x64xf32>
    %152 = vector.broadcast %44 : vector<8x1xf32> to vector<8x64xf32>
    %153 = arith.mulf %151, %152 : vector<8x64xf32>
    %154 = tpu.concatenate %150, %137, %153 in 1 : vector<8x64xf32>, vector<8x64xf32>, vector<8x64xf32> -> vector<8x192xf32>
    %cst_92 = arith.constant dense<0.000000e+00> : vector<8x64xf32>
    %155 = tpu.matmul %154, %141, %cst_92 {dimension_numbers = #tpu.dot_dimension_numbers<[1], [0], [0], [1], [0, 0, 1, 1], [], []>} : vector<8x192xf32>, vector<192x64xf32>, vector<8x64xf32> -> vector<8x64xf32>
    %156 = vector.broadcast %144 : vector<1x64xf32> to vector<8x64xf32>
    %157 = arith.addf %155, %156 : vector<8x64xf32>
    %cst_93 = arith.constant 0.000000e+00 : f32
    %158 = vector.broadcast %cst_93 : f32 to vector<8x64xf32>
    %159 = arith.cmpf oge, %157, %158 : vector<8x64xf32>
    %160 = vector.broadcast %147 : vector<1x64xf32> to vector<8x64xf32>
    %161 = arith.mulf %157, %160 : vector<8x64xf32>
    %162 = arith.select %159, %157, %161 : vector<8x64xi1>, vector<8x64xf32>
    %c1_i32_94 = arith.constant 1 : i32
    %163 = arith.index_cast %c1_i32_94 : i32 to index
    %c0_95 = arith.constant 0 : index
    %c0_96 = arith.constant 0 : index
    %164 = vector.load %arg16[%163, %c0_95, %c0_96] : memref<5x192x64xf32, #tpu.memory_space<vmem>>, vector<1x192x64xf32>
    %165 = vector.shape_cast %164 : vector<1x192x64xf32> to vector<192x64xf32>
    %166 = arith.index_cast %c1_i32_94 : i32 to index
    %c0_97 = arith.constant 0 : index
    %c0_98 = arith.constant 0 : index
    %167 = vector.load %arg17[%166, %c0_97, %c0_98] : memref<5x1x64xf32, #tpu.memory_space<vmem>>, vector<1x1x64xf32>
    %168 = vector.shape_cast %167 : vector<1x1x64xf32> to vector<1x64xf32>
    %169 = arith.index_cast %c1_i32_94 : i32 to index
    %c0_99 = arith.constant 0 : index
    %c0_100 = arith.constant 0 : index
    %170 = vector.load %arg18[%169, %c0_99, %c0_100] : memref<5x1x64xf32, #tpu.memory_space<vmem>>, vector<1x1x64xf32>
    %171 = vector.shape_cast %170 : vector<1x1x64xf32> to vector<1x64xf32>
    %c1_i32_101 = arith.constant 1 : i32
    %172 = tpu.dynamic_rotate %162 by %c1_i32_101 dim 0 : vector<8x64xf32>, i32 -> vector<8x64xf32>
    %173 = vector.broadcast %43 : vector<8x1xf32> to vector<8x64xf32>
    %174 = arith.mulf %172, %173 : vector<8x64xf32>
    %c7_i32_102 = arith.constant 7 : i32
    %175 = tpu.dynamic_rotate %162 by %c7_i32_102 dim 0 : vector<8x64xf32>, i32 -> vector<8x64xf32>
    %176 = vector.broadcast %44 : vector<8x1xf32> to vector<8x64xf32>
    %177 = arith.mulf %175, %176 : vector<8x64xf32>
    %178 = tpu.concatenate %174, %162, %177 in 1 : vector<8x64xf32>, vector<8x64xf32>, vector<8x64xf32> -> vector<8x192xf32>
    %cst_103 = arith.constant dense<0.000000e+00> : vector<8x64xf32>
    %179 = tpu.matmul %178, %165, %cst_103 {dimension_numbers = #tpu.dot_dimension_numbers<[1], [0], [0], [1], [0, 0, 1, 1], [], []>} : vector<8x192xf32>, vector<192x64xf32>, vector<8x64xf32> -> vector<8x64xf32>
    %180 = vector.broadcast %168 : vector<1x64xf32> to vector<8x64xf32>
    %181 = arith.addf %179, %180 : vector<8x64xf32>
    %cst_104 = arith.constant 0.000000e+00 : f32
    %182 = vector.broadcast %cst_104 : f32 to vector<8x64xf32>
    %183 = arith.cmpf oge, %181, %182 : vector<8x64xf32>
    %184 = vector.broadcast %171 : vector<1x64xf32> to vector<8x64xf32>
    %185 = arith.mulf %181, %184 : vector<8x64xf32>
    %186 = arith.select %183, %181, %185 : vector<8x64xi1>, vector<8x64xf32>
    %c2_i32_105 = arith.constant 2 : i32
    %187 = arith.index_cast %c2_i32_105 : i32 to index
    %c0_106 = arith.constant 0 : index
    %c0_107 = arith.constant 0 : index
    %188 = vector.load %arg16[%187, %c0_106, %c0_107] : memref<5x192x64xf32, #tpu.memory_space<vmem>>, vector<1x192x64xf32>
    %189 = vector.shape_cast %188 : vector<1x192x64xf32> to vector<192x64xf32>
    %190 = arith.index_cast %c2_i32_105 : i32 to index
    %c0_108 = arith.constant 0 : index
    %c0_109 = arith.constant 0 : index
    %191 = vector.load %arg17[%190, %c0_108, %c0_109] : memref<5x1x64xf32, #tpu.memory_space<vmem>>, vector<1x1x64xf32>
    %192 = vector.shape_cast %191 : vector<1x1x64xf32> to vector<1x64xf32>
    %193 = arith.index_cast %c2_i32_105 : i32 to index
    %c0_110 = arith.constant 0 : index
    %c0_111 = arith.constant 0 : index
    %194 = vector.load %arg18[%193, %c0_110, %c0_111] : memref<5x1x64xf32, #tpu.memory_space<vmem>>, vector<1x1x64xf32>
    %195 = vector.shape_cast %194 : vector<1x1x64xf32> to vector<1x64xf32>
    %c1_i32_112 = arith.constant 1 : i32
    %196 = tpu.dynamic_rotate %186 by %c1_i32_112 dim 0 : vector<8x64xf32>, i32 -> vector<8x64xf32>
    %197 = vector.broadcast %43 : vector<8x1xf32> to vector<8x64xf32>
    %198 = arith.mulf %196, %197 : vector<8x64xf32>
    %c7_i32_113 = arith.constant 7 : i32
    %199 = tpu.dynamic_rotate %186 by %c7_i32_113 dim 0 : vector<8x64xf32>, i32 -> vector<8x64xf32>
    %200 = vector.broadcast %44 : vector<8x1xf32> to vector<8x64xf32>
    %201 = arith.mulf %199, %200 : vector<8x64xf32>
    %202 = tpu.concatenate %198, %186, %201 in 1 : vector<8x64xf32>, vector<8x64xf32>, vector<8x64xf32> -> vector<8x192xf32>
    %cst_114 = arith.constant dense<0.000000e+00> : vector<8x64xf32>
    %203 = tpu.matmul %202, %189, %cst_114 {dimension_numbers = #tpu.dot_dimension_numbers<[1], [0], [0], [1], [0, 0, 1, 1], [], []>} : vector<8x192xf32>, vector<192x64xf32>, vector<8x64xf32> -> vector<8x64xf32>
    %204 = vector.broadcast %192 : vector<1x64xf32> to vector<8x64xf32>
    %205 = arith.addf %203, %204 : vector<8x64xf32>
    %cst_115 = arith.constant 0.000000e+00 : f32
    %206 = vector.broadcast %cst_115 : f32 to vector<8x64xf32>
    %207 = arith.cmpf oge, %205, %206 : vector<8x64xf32>
    %208 = vector.broadcast %195 : vector<1x64xf32> to vector<8x64xf32>
    %209 = arith.mulf %205, %208 : vector<8x64xf32>
    %210 = arith.select %207, %205, %209 : vector<8x64xi1>, vector<8x64xf32>
    %c3_i32_116 = arith.constant 3 : i32
    %211 = arith.index_cast %c3_i32_116 : i32 to index
    %c0_117 = arith.constant 0 : index
    %c0_118 = arith.constant 0 : index
    %212 = vector.load %arg16[%211, %c0_117, %c0_118] : memref<5x192x64xf32, #tpu.memory_space<vmem>>, vector<1x192x64xf32>
    %213 = vector.shape_cast %212 : vector<1x192x64xf32> to vector<192x64xf32>
    %214 = arith.index_cast %c3_i32_116 : i32 to index
    %c0_119 = arith.constant 0 : index
    %c0_120 = arith.constant 0 : index
    %215 = vector.load %arg17[%214, %c0_119, %c0_120] : memref<5x1x64xf32, #tpu.memory_space<vmem>>, vector<1x1x64xf32>
    %216 = vector.shape_cast %215 : vector<1x1x64xf32> to vector<1x64xf32>
    %217 = arith.index_cast %c3_i32_116 : i32 to index
    %c0_121 = arith.constant 0 : index
    %c0_122 = arith.constant 0 : index
    %218 = vector.load %arg18[%217, %c0_121, %c0_122] : memref<5x1x64xf32, #tpu.memory_space<vmem>>, vector<1x1x64xf32>
    %219 = vector.shape_cast %218 : vector<1x1x64xf32> to vector<1x64xf32>
    %c1_i32_123 = arith.constant 1 : i32
    %220 = tpu.dynamic_rotate %210 by %c1_i32_123 dim 0 : vector<8x64xf32>, i32 -> vector<8x64xf32>
    %221 = vector.broadcast %43 : vector<8x1xf32> to vector<8x64xf32>
    %222 = arith.mulf %220, %221 : vector<8x64xf32>
    %c7_i32_124 = arith.constant 7 : i32
    %223 = tpu.dynamic_rotate %210 by %c7_i32_124 dim 0 : vector<8x64xf32>, i32 -> vector<8x64xf32>
    %224 = vector.broadcast %44 : vector<8x1xf32> to vector<8x64xf32>
    %225 = arith.mulf %223, %224 : vector<8x64xf32>
    %226 = tpu.concatenate %222, %210, %225 in 1 : vector<8x64xf32>, vector<8x64xf32>, vector<8x64xf32> -> vector<8x192xf32>
    %cst_125 = arith.constant dense<0.000000e+00> : vector<8x64xf32>
    %227 = tpu.matmul %226, %213, %cst_125 {dimension_numbers = #tpu.dot_dimension_numbers<[1], [0], [0], [1], [0, 0, 1, 1], [], []>} : vector<8x192xf32>, vector<192x64xf32>, vector<8x64xf32> -> vector<8x64xf32>
    %228 = vector.broadcast %216 : vector<1x64xf32> to vector<8x64xf32>
    %229 = arith.addf %227, %228 : vector<8x64xf32>
    %cst_126 = arith.constant 0.000000e+00 : f32
    %230 = vector.broadcast %cst_126 : f32 to vector<8x64xf32>
    %231 = arith.cmpf oge, %229, %230 : vector<8x64xf32>
    %232 = vector.broadcast %219 : vector<1x64xf32> to vector<8x64xf32>
    %233 = arith.mulf %229, %232 : vector<8x64xf32>
    %234 = arith.select %231, %229, %233 : vector<8x64xi1>, vector<8x64xf32>
    %c4_i32 = arith.constant 4 : i32
    %235 = arith.index_cast %c4_i32 : i32 to index
    %c0_127 = arith.constant 0 : index
    %c0_128 = arith.constant 0 : index
    %236 = vector.load %arg16[%235, %c0_127, %c0_128] : memref<5x192x64xf32, #tpu.memory_space<vmem>>, vector<1x192x64xf32>
    %237 = vector.shape_cast %236 : vector<1x192x64xf32> to vector<192x64xf32>
    %238 = arith.index_cast %c4_i32 : i32 to index
    %c0_129 = arith.constant 0 : index
    %c0_130 = arith.constant 0 : index
    %239 = vector.load %arg17[%238, %c0_129, %c0_130] : memref<5x1x64xf32, #tpu.memory_space<vmem>>, vector<1x1x64xf32>
    %240 = vector.shape_cast %239 : vector<1x1x64xf32> to vector<1x64xf32>
    %241 = arith.index_cast %c4_i32 : i32 to index
    %c0_131 = arith.constant 0 : index
    %c0_132 = arith.constant 0 : index
    %242 = vector.load %arg18[%241, %c0_131, %c0_132] : memref<5x1x64xf32, #tpu.memory_space<vmem>>, vector<1x1x64xf32>
    %243 = vector.shape_cast %242 : vector<1x1x64xf32> to vector<1x64xf32>
    %c1_i32_133 = arith.constant 1 : i32
    %244 = tpu.dynamic_rotate %234 by %c1_i32_133 dim 0 : vector<8x64xf32>, i32 -> vector<8x64xf32>
    %245 = vector.broadcast %43 : vector<8x1xf32> to vector<8x64xf32>
    %246 = arith.mulf %244, %245 : vector<8x64xf32>
    %c7_i32_134 = arith.constant 7 : i32
    %247 = tpu.dynamic_rotate %234 by %c7_i32_134 dim 0 : vector<8x64xf32>, i32 -> vector<8x64xf32>
    %248 = vector.broadcast %44 : vector<8x1xf32> to vector<8x64xf32>
    %249 = arith.mulf %247, %248 : vector<8x64xf32>
    %250 = tpu.concatenate %246, %234, %249 in 1 : vector<8x64xf32>, vector<8x64xf32>, vector<8x64xf32> -> vector<8x192xf32>
    %cst_135 = arith.constant dense<0.000000e+00> : vector<8x64xf32>
    %251 = tpu.matmul %250, %237, %cst_135 {dimension_numbers = #tpu.dot_dimension_numbers<[1], [0], [0], [1], [0, 0, 1, 1], [], []>} : vector<8x192xf32>, vector<192x64xf32>, vector<8x64xf32> -> vector<8x64xf32>
    %252 = vector.broadcast %240 : vector<1x64xf32> to vector<8x64xf32>
    %253 = arith.addf %251, %252 : vector<8x64xf32>
    %cst_136 = arith.constant 0.000000e+00 : f32
    %254 = vector.broadcast %cst_136 : f32 to vector<8x64xf32>
    %255 = arith.cmpf oge, %253, %254 : vector<8x64xf32>
    %256 = vector.broadcast %243 : vector<1x64xf32> to vector<8x64xf32>
    %257 = arith.mulf %253, %256 : vector<8x64xf32>
    %258 = arith.select %255, %253, %257 : vector<8x64xi1>, vector<8x64xf32>
    %c5_i32 = arith.constant 5 : i32
    %c0_137 = arith.constant 0 : index
    %c0_138 = arith.constant 0 : index
    %259 = vector.load %arg24[%c0_137, %c0_138] : memref<8x64xf32, #tpu.memory_space<vmem>>, vector<8x64xf32>
    %260 = arith.addf %258, %259 : vector<8x64xf32>
    %c1_i32_139 = arith.constant 1 : i32
    %261 = tpu.dynamic_rotate %260 by %c1_i32_139 dim 0 : vector<8x64xf32>, i32 -> vector<8x64xf32>
    %262 = vector.broadcast %43 : vector<8x1xf32> to vector<8x64xf32>
    %263 = arith.mulf %261, %262 : vector<8x64xf32>
    %c7_i32_140 = arith.constant 7 : i32
    %264 = tpu.dynamic_rotate %260 by %c7_i32_140 dim 0 : vector<8x64xf32>, i32 -> vector<8x64xf32>
    %265 = vector.broadcast %44 : vector<8x1xf32> to vector<8x64xf32>
    %266 = arith.mulf %264, %265 : vector<8x64xf32>
    %267 = tpu.concatenate %263, %260, %266 in 1 : vector<8x64xf32>, vector<8x64xf32>, vector<8x64xf32> -> vector<8x192xf32>
    %c0_141 = arith.constant 0 : index
    %c0_142 = arith.constant 0 : index
    %268 = vector.load %arg19[%c0_141, %c0_142] : memref<192x256xf32, #tpu.memory_space<vmem>>, vector<192x256xf32>
    %cst_143 = arith.constant dense<0.000000e+00> : vector<8x256xf32>
    %269 = tpu.matmul %267, %268, %cst_143 {dimension_numbers = #tpu.dot_dimension_numbers<[1], [0], [0], [1], [0, 0, 1, 1], [], []>} : vector<8x192xf32>, vector<192x256xf32>, vector<8x256xf32> -> vector<8x256xf32>
    %c0_144 = arith.constant 0 : index
    %c0_145 = arith.constant 0 : index
    %270 = vector.load %arg20[%c0_144, %c0_145] : memref<1x256xf32, #tpu.memory_space<vmem>>, vector<1x256xf32>
    %271 = vector.broadcast %270 : vector<1x256xf32> to vector<8x256xf32>
    %272 = arith.addf %269, %271 : vector<8x256xf32>
    %c0_146 = arith.constant 0 : index
    %c0_147 = arith.constant 0 : index
    %273 = vector.load %arg23[%c0_146, %c0_147] : memref<8x256xf32, #tpu.memory_space<vmem>>, vector<8x256xf32>
    tpu.vector_store %arg23[%c0_146, %c0_147], %272 {strides = array<i32>} : memref<8x256xf32, #tpu.memory_space<vmem>>, vector<8x256xf32>,
    return
  }
  func.func @transform_0(%arg0: i32) -> (i32, i32) {
    %c0_i32 = arith.constant 0 : i32
    %c0_i32_0 = arith.constant 0 : i32
    return %arg0, %c0_i32 : i32, i32
  }
  func.func @transform_1(%arg0: i32) -> (i32, i32, i32) {
    %c0_i32 = arith.constant 0 : i32
    %c0_i32_0 = arith.constant 0 : i32
    %c0_i32_1 = arith.constant 0 : i32
    %c0_i32_2 = arith.constant 0 : i32
    return %c0_i32, %c0_i32_0, %c0_i32_1 : i32, i32, i32
  }
  func.func @transform_2(%arg0: i32) -> (i32, i32) {
    %c0_i32 = arith.constant 0 : i32
    %c0_i32_0 = arith.constant 0 : i32
    %c0_i32_1 = arith.constant 0 : i32
    return %c0_i32, %c0_i32_0 : i32, i32
  }
  func.func @transform_3(%arg0: i32) -> (i32, i32) {
    %c0_i32 = arith.constant 0 : i32
    %c0_i32_0 = arith.constant 0 : i32
    %c0_i32_1 = arith.constant 0 : i32
    return %c0_i32, %c0_i32_0 : i32, i32
  }
  func.func @transform_4(%arg0: i32) -> (i32, i32) {
    %c0_i32 = arith.constant 0 : i32
    %c0_i32_0 = arith.constant 0 : i32
    %c0_i32_1 = arith.constant 0 : i32
    return %c0_i32, %c0_i32_0 : i32, i32
  }
  func.func @transform_5(%arg0: i32) -> (i32, i32, i32) {
    %c0_i32 = arith.constant 0 : i32
    %c0_i32_0 = arith.constant 0 : i32
    %c0_i32_1 = arith.constant 0 : i32
    %c0_i32_2 = arith.constant 0 : i32
    return %c0_i32, %c0_i32_0, %c0_i32_1 : i32, i32, i32
  }
  func.func @transform_6(%arg0: i32) -> (i32, i32) {
    %c0_i32 = arith.constant 0 : i32
    %c0_i32_0 = arith.constant 0 : i32
    %c0_i32_1 = arith.constant 0 : i32
    return %c0_i32, %c0_i32_0 : i32, i32
  }
  func.func @transform_7(%arg0: i32) -> (i32, i32) {
    %c0_i32 = arith.constant 0 : i32
    %c0_i32_0 = arith.constant 0 : i32
    %c0_i32_1 = arith.constant 0 : i32
    return %c0_i32, %c0_i32_0 : i32, i32
  }
  func.func @transform_8(%arg0: i32) -> (i32, i32) {
    %c0_i32 = arith.constant 0 : i32
    %c0_i32_0 = arith.constant 0 : i32
    %c0_i32_1 = arith.constant 0 : i32
    return %c0_i32, %c0_i32_0 : i32, i32
  }
  func.func @transform_9(%arg0: i32) -> (i32, i32, i32) {
    %c0_i32 = arith.constant 0 : i32
    %c0_i32_0 = arith.constant 0 : i32
    %c0_i32_1 = arith.constant 0 : i32
    %c0_i32_2 = arith.constant 0 : i32
    return %c0_i32, %c0_i32_0, %c0_i32_1 : i32, i32, i32
  }
  func.func @transform_10(%arg0: i32) -> (i32, i32, i32) {
    %c0_i32 = arith.constant 0 : i32
    %c0_i32_0 = arith.constant 0 : i32
    %c0_i32_1 = arith.constant 0 : i32
    %c0_i32_2 = arith.constant 0 : i32
    return %c0_i32, %c0_i32_0, %c0_i32_1 : i32, i32, i32
  }
  func.func @transform_11(%arg0: i32) -> (i32, i32, i32) {
    %c0_i32 = arith.constant 0 : i32
    %c0_i32_0 = arith.constant 0 : i32
    %c0_i32_1 = arith.constant 0 : i32
    %c0_i32_2 = arith.constant 0 : i32
    return %c0_i32, %c0_i32_0, %c0_i32_1 : i32, i32, i32
  }
  func.func @transform_12(%arg0: i32) -> (i32, i32) {
    %c0_i32 = arith.constant 0 : i32
    %c0_i32_0 = arith.constant 0 : i32
    %c0_i32_1 = arith.constant 0 : i32
    return %c0_i32, %c0_i32_0 : i32, i32
  }
  func.func @transform_13(%arg0: i32) -> (i32, i32) {
    %c0_i32 = arith.constant 0 : i32
    %c0_i32_0 = arith.constant 0 : i32
    %c0_i32_1 = arith.constant 0 : i32
    return %c0_i32, %c0_i32_0 : i32, i32
  }
  func.func @transform_14(%arg0: i32) -> (i32, i32) {
    %c0_i32 = arith.constant 0 : i32
    %c0_i32_0 = arith.constant 0 : i32
    %c0_i32_1 = arith.constant 0 : i32
    return %c0_i32, %c0_i32_0 : i32, i32
  }
  func.func @transform_15(%arg0: i32) -> (i32, i32, i32) {
    %c0_i32 = arith.constant 0 : i32
    %c0_i32_0 = arith.constant 0 : i32
    %c0_i32_1 = arith.constant 0 : i32
    %c0_i32_2 = arith.constant 0 : i32
    return %c0_i32, %c0_i32_0, %c0_i32_1 : i32, i32, i32
  }
  func.func @transform_16(%arg0: i32) -> (i32, i32, i32) {
    %c0_i32 = arith.constant 0 : i32
    %c0_i32_0 = arith.constant 0 : i32
    %c0_i32_1 = arith.constant 0 : i32
    %c0_i32_2 = arith.constant 0 : i32
    return %c0_i32, %c0_i32_0, %c0_i32_1 : i32, i32, i32
  }
  func.func @transform_17(%arg0: i32) -> (i32, i32, i32) {
    %c0_i32 = arith.constant 0 : i32
    %c0_i32_0 = arith.constant 0 : i32
    %c0_i32_1 = arith.constant 0 : i32
    %c0_i32_2 = arith.constant 0 : i32
    return %c0_i32, %c0_i32_0, %c0_i32_1 : i32, i32, i32
  }
  func.func @transform_18(%arg0: i32) -> (i32, i32) {
    %c0_i32 = arith.constant 0 : i32
    %c0_i32_0 = arith.constant 0 : i32
    %c0_i32_1 = arith.constant 0 : i32
    return %c0_i32, %c0_i32_0 : i32, i32
  }
  func.func @transform_19(%arg0: i32) -> (i32, i32) {
    %c0_i32 = arith.constant 0 : i32
    %c0_i32_0 = arith.constant 0 : i32
    %c0_i32_1 = arith.constant 0 : i32
    return %c0_i32, %c0_i32_0 : i32, i32
  }
  func.func @transform_20(%arg0: i32) -> (i32, i32) {
    %c0_i32 = arith.constant 0 : i32
    %c0_i32_0 = arith.constant 0 : i32
    %c0_i32_1 = arith.constant 0 : i32
    return %c0_i32, %c0_i32_0 : i32, i32
  }
  func.func @transform_21(%arg0: i32) -> (i32, i32) {
    %c0_i32 = arith.constant 0 : i32
    %c0_i32_0 = arith.constant 0 : i32
    %c0_i32_1 = arith.constant 0 : i32
    return %c0_i32, %c0_i32_0 : i32, i32
  }
  func.func @transform_22(%arg0: i32) -> (i32, i32) {
    %c0_i32 = arith.constant 0 : i32
    %c0_i32_0 = arith.constant 0 : i32
    return %arg0, %c0_i32 : i32, i32
  }
}

</mosaic_0001>

<bundles_post_ra>
// kernel: tpu_custom_call.1
= control target key start
LH: loop header
LB: loop body
LE: loop exit
PB: predicated region body
PF: predicated region fallthrough
CT: control target
= control target key end

     0   :  { %s5701_s0 = inlined_call_operand.vmem [shape: f32[32,192], index: 0, kind: input, shape index: {}]   ;;  %s5702_s1 = inlined_call_operand.vmem [shape: f32[3,16,32], index: 1, kind: input, shape index: {}]   ;;  %s5703_s2 = inlined_call_operand.vmem [shape: f32[576,192], index: 2, kind: input, shape index: {}]   ;;  %s5704_s3 = inlined_call_operand.vmem [shape: f32[1,192], index: 3, kind: input, shape index: {}]   ;;  %s5705_s4 = inlined_call_operand.vmem [shape: f32[1,192], index: 4, kind: input, shape index: {}]   ;;  %s5706_s5 = inlined_call_operand.vmem [shape: f32[3,8,16], index: 5, kind: input, shape index: {}]   ;;  %s5707_s6 = inlined_call_operand.vmem [shape: f32[576,96], index: 6, kind: input, shape index: {}]   ;;  %s5708_s7 = inlined_call_operand.vmem [shape: f32[1,96], index: 7, kind: input, shape index: {}]   ;;  %s5709_s8 = inlined_call_operand.vmem [shape: f32[1,96], index: 8, kind: input, shape index: {}]   ;;  %s5710_s9 = inlined_call_operand.vmem [shape: f32[3,192,64], index: 9, kind: input, shape index: {}]   ;;  %s5711_s10 = inlined_call_operand.vmem [shape: f32[3,1,64], index: 10, kind: input, shape index: {}]   ;;  %s5712_s11 = inlined_call_operand.vmem [shape: f32[3,1,64], index: 11, kind: input, shape index: {}]   ;;  %s5713_s12 = inlined_call_operand.vmem [shape: f32[288,64], index: 12, kind: input, shape index: {}]   ;;  %s5714_s13 = inlined_call_operand.vmem [shape: f32[1,64], index: 13, kind: input, shape index: {}]   ;;  %s5715_s14 = inlined_call_operand.vmem [shape: f32[1,64], index: 14, kind: input, shape index: {}]   ;;  %s5716_s15 = inlined_call_operand.vmem [shape: f32[5,192,64], index: 15, kind: input, shape index: {}]   ;;  %s5717_s16 = inlined_call_operand.vmem [shape: f32[5,1,64], index: 16, kind: input, shape index: {}]   ;;  %s5718_s17 = inlined_call_operand.vmem [shape: f32[5,1,64], index: 17, kind: input, shape index: {}]   ;;  %s5719_s18 = inlined_call_operand.vmem [shape: f32[192,256], index: 18, kind: input, shape index: {}]   ;;  %s5720_s19 = inlined_call_operand.vmem [shape: f32[1,256], index: 19, kind: input, shape index: {}]   ;;  %s5721_s20 = inlined_call_operand.vmem [shape: f32[8,1], index: 20, kind: input, shape index: {}]   ;;  %s5722_s21 = inlined_call_operand.vmem [shape: f32[8,1], index: 21, kind: input, shape index: {}]   ;;  %s5723_s22 = inlined_call_operand.hbm [shape: f32[8,256], index: 22, kind: output, shape index: {}]  }
   0x1   :  { %5729 = sst [smem:[#allocation6_spill]] %s5701_s0 }
   0x2   :  { %5730 = sst [smem:[#allocation7_spill]] %s5702_s1 }
   0x3   :  { %5731 = sst [smem:[#allocation8_spill]] %s5703_s2 }
   0x4   :  { %5732 = sst [smem:[#allocation9_spill]] %s5704_s3 }
   0x5   :  { %5733 = sst [smem:[#allocation10_spill]] %s5705_s4 }
   0x6   :  { %5734 = sst [smem:[#allocation11_spill]] %s5706_s5 }
   0x7   :  { %5735 = sst [smem:[#allocation12_spill]] %s5707_s6 }
   0x8   :  { %s5736_s29 = sld [smem:[#allocation6_spill]]  ;;  %v3731_v7 = vmov 0.0  }
   0x9   :  { %155 = vmatprep.mubr.f32.mxu0 %v3731_v7 }
   0xe   :  { %v73_v0 = vld [vmem:[%s5736_s29 + $0x8] sm:$0xff]  ;;  %v75_v1 = vld [vmem:[%s5736_s29 + $0x18] sm:$0xff]  ;;  %v72_v2 = vld [vmem:[%s5736_s29] sm:$0xff] }
   0xf   :  { %v3056_v3 = vpack.c.bf16 %v75_v1, %v73_v0  ;;  %v74_v4 = vld [vmem:[%s5736_s29 + $0x10] sm:$0xff]  ;;  %v77_v5 = vld [vmem:[%s5736_s29 + $0x28] sm:$0xff]  ;;  %v79_v6 = vld [vmem:[%s5736_s29 + $0x38] sm:$0xff] }
  0x10   :  { %v3058_v8 = vpack.c.bf16 %v74_v4, %v72_v2  ;;  %v3060_v9 = vpack.c.bf16 %v79_v6, %v77_v5  ;;  %v76_v10 = vld [vmem:[%s5736_s29 + $0x20] sm:$0xff]  ;;  %v78_v11 = vld [vmem:[%s5736_s29 + $0x30] sm:$0xff] }
  0x11   :  { %3057 = vmatprep.subr.bf16.mxu0 %v3056_v3  ;;  %v3062_v12 = vpack.c.bf16 %v78_v11, %v76_v10 }
  0x12   :  { %3059 = vmatpush1.bf16.msra.mxu0 %v3058_v8 }
  0x13   :  { %27 = vsyncpa [#allocation4], 0  ;;  %3061 = vmatprep.subr.bf16.mxu0 %v3060_v9  ;;  %s5737_s0 = sld [smem:[#allocation7_spill]]  ;;  %vm84_vm0 = vcmask 261120   ;;  %s5738_s30 = sld [smem:[#allocation8_spill]]  ;;  %vm352_vm1 = vcmask 523264  }
  0x14   :  { %s3732_s5 = smov 64   ;;  %s5739_s6 = sld [smem:[#allocation9_spill]]  ;;  %vm779_vm6 = vcmask 130048   ;;  %vm3735_vm7 = vmmov 0   ;;  %vm1754_vm12 = vcmask 785408  }
  0x15   :  { %s5740_s26 = sld [smem:[#allocation10_spill]]  ;;  %s5741_s3 = sld [smem:[#allocation11_spill]] }
  0x16   :  { %3063 = vmatpush1.bf16.msra.mxu0 %v3062_v12 }
  0x17   :  { %3065 = vmatprep.subr.bf16.mxu0 %v3056_v3 }
  0x19   :  { %v82_v13 = vld [vmem:[%s5737_s0] sm:$0xff]  ;;  %v83_v14 = vld [vmem:[%s5737_s0 + $0x8] sm:$0xff]  ;;  %v2705_v15 = vld [vmem:[%s5737_s0 + $0x10] sm:$0xff] }
  0x1a   :  { %2703 = vmatmul.mubr.msk.f32.vlgmr.msra.gmra.mrb[0].mxu0 %vm84_vm0, %v82_v13  ;;  %v2706_v16 = vld [vmem:[%s5737_s0 + $0x18] sm:$0xff]  ;;  %v2709_v17 = vld [vmem:[%s5737_s0 + $0x20] sm:$0xff]  ;;  %v2710_v18 = vld [vmem:[%s5737_s0 + $0x28] sm:$0xff]  ;;  %s5742_s0 = sld [smem:[#allocation12_spill]] }
  0x1b   :  { %3067 = vmatpush1.bf16.msra.mxu0 %v3058_v8  ;;  %161 = vmatprep.mubr.f32.mxu0 %v3731_v7  ;;  %v362_v19 = vld [vmem:[%s5738_s30 + $0x8] sm:$0xff]  ;;  %v364_v20 = vld [vmem:[%s5738_s30 + $0x18] sm:$0xff]  ;;  %v361_v21 = vld [vmem:[%s5738_s30] sm:$0xff] }
  0x1c   :  { %3069 = vmatprep.subr.bf16.mxu0 %v3060_v9  ;;  %v3080_v22 = vpack.c.bf16 %v364_v20, %v362_v19  ;;  %v363_v23 = vld [vmem:[%s5738_s30 + $0x10] sm:$0xff]  ;;  %v366_v24 = vld [vmem:[%s5738_s30 + $0x28] sm:$0xff]  ;;  %v368_v25 = vld [vmem:[%s5738_s30 + $0x38] sm:$0xff] }
  0x1d   :  { %v3082_v26 = vpack.c.bf16 %v363_v23, %v361_v21  ;;  %v3084_v27 = vpack.c.bf16 %v368_v25, %v366_v24  ;;  %v365_v28 = vld [vmem:[%s5738_s30 + $0x20] sm:$0xff]  ;;  %v367_v29 = vld [vmem:[%s5738_s30 + $0x30] sm:$0xff]  ;;  %v370_v30 = vld [vmem:[%s5738_s30 + $0x48] sm:$0xff] }
  0x1e   :  { %2704 = vmatmul.mubr.msk.f32.gmra.mrb[2].mxu0 %vm84_vm0, %v83_v14  ;;  %3081 = vmatprep.subr.bf16.mxu1 %v3080_v22  ;;  %v372_v31 = vld [vmem:[%s5738_s30 + $0x58] sm:$0xff]  ;;  %v3086_v32 = vpack.c.bf16 %v367_v29, %v365_v28  ;;  %v369_v34 = vld [vmem:[%s5738_s30 + $0x40] sm:$0xff]  ;;  %v371_v35 = vld [vmem:[%s5738_s30 + $0x50] sm:$0xff] }
  0x1f   :  { %3071 = vmatpush1.bf16.msra.mxu0 %v3062_v12  ;;  %241 = vmatprep.mubr.f32.mxu0 %v3731_v7  ;;  %v3088_v33 = vpack.c.bf16 %v372_v31, %v370_v30  ;;  %v374_v36 = vld [vmem:[%s5738_s30 + $0x68] sm:$0xff]  ;;  %v376_v37 = vld [vmem:[%s5738_s30 + $0x78] sm:$0xff]  ;;  %v3090_v38 = vpack.c.bf16 %v371_v35, %v369_v34  ;;  %v373_v40 = vld [vmem:[%s5738_s30 + $0x60] sm:$0xff] }
  0x20   :  { %3073 = vmatprep.subr.bf16.mxu0 %v3056_v3  ;;  %3083 = vmatpush1.bf16.msra.mxu1 %v3082_v26  ;;  %v3092_v39 = vpack.c.bf16 %v376_v37, %v374_v36  ;;  %v375_v41 = vld [vmem:[%s5738_s30 + $0x70] sm:$0xff]  ;;  %v378_v42 = vld [vmem:[%s5738_s30 + $0x88] sm:$0xff]  ;;  %v380_v43 = vld [vmem:[%s5738_s30 + $0x98] sm:$0xff] }
  0x21   :  { %3085 = vmatprep.subr.bf16.mxu1 %v3084_v27  ;;  %v3094_v44 = vpack.c.bf16 %v375_v41, %v373_v40  ;;  %v3096_v45 = vpack.c.bf16 %v380_v43, %v378_v42  ;;  %v377_v46 = vld [vmem:[%s5738_s30 + $0x80] sm:$0xff]  ;;  %v379_v47 = vld [vmem:[%s5738_s30 + $0x90] sm:$0xff]  ;;  %v382_v48 = vld [vmem:[%s5738_s30 + $0xa8] sm:$0xff] }
  0x22   :  { %2707 = vmatmul.mubr.msk.f32.vlgmr.msra.gmra.mrb[4].mxu0 %vm84_vm0, %v2705_v15  ;;  %v384_v49 = vld [vmem:[%s5738_s30 + $0xb8] sm:$0xff]  ;;  %v3098_v50 = vpack.c.bf16 %v379_v47, %v377_v46  ;;  %v381_v52 = vld [vmem:[%s5738_s30 + $0xa0] sm:$0xff]  ;;  %v383_v53 = vld [vmem:[%s5738_s30 + $0xb0] sm:$0xff] }
  0x23   :  { %247 = vmatprep.mubr.f32.mxu0 %v3731_v7  ;;  %3075 = vmatpush1.bf16.msra.mxu0 %v3058_v8  ;;  %v3100_v51 = vpack.c.bf16 %v384_v49, %v382_v48  ;;  %v386_v54 = vld [vmem:[%s5738_s30 + $0xc8] sm:$0xff]  ;;  %v388_v55 = vld [vmem:[%s5738_s30 + $0xd8] sm:$0xff]  ;;  %v3102_v56 = vpack.c.bf16 %v383_v53, %v381_v52  ;;  %v385_v58 = vld [vmem:[%s5738_s30 + $0xc0] sm:$0xff] }
  0x24   :  { %3077 = vmatprep.subr.bf16.mxu0 %v3060_v9  ;;  %3087 = vmatpush1.bf16.msra.mxu1 %v3086_v32  ;;  %v3104_v57 = vpack.c.bf16 %v388_v55, %v386_v54  ;;  %v387_v59 = vld [vmem:[%s5738_s30 + $0xd0] sm:$0xff]  ;;  %v390_v60 = vld [vmem:[%s5738_s30 + $0xe8] sm:$0xff]  ;;  %v392_v61 = vld [vmem:[%s5738_s30 + $0xf8] sm:$0xff] }
  0x25   :  { %3089 = vmatprep.subr.bf16.mxu1 %v3088_v33  ;;  %v3106_v62 = vpack.c.bf16 %v387_v59, %v385_v58  ;;  %v3108_v63 = vpack.c.bf16 %v392_v61, %v390_v60  ;;  %v389_v0 = vld [vmem:[%s5738_s30 + $0xe0] sm:$0xff]  ;;  %v391_v1 = vld [vmem:[%s5738_s30 + $0xf0] sm:$0xff]  ;;  %v394_v2 = vld [vmem:[%s5738_s30 + $0x108] sm:$0xff] }
  0x26   :  { %2708 = vmatmul.mubr.msk.f32.gmra.mrb[6].mxu0 %vm84_vm0, %v2706_v16  ;;  %v396_v3 = vld [vmem:[%s5738_s30 + $0x118] sm:$0xff]  ;;  %v3110_v4 = vpack.c.bf16 %v391_v1, %v389_v0  ;;  %v393_v6 = vld [vmem:[%s5738_s30 + $0x100] sm:$0xff]  ;;  %v395_v8 = vld [vmem:[%s5738_s30 + $0x110] sm:$0xff] }
  0x27   :  { %3079 = vmatpush1.bf16.msra.mxu0 %v3062_v12  ;;  %327 = vmatprep.mubr.f32.mxu0 %v3731_v7  ;;  %v3112_v5 = vpack.c.bf16 %v396_v3, %v394_v2  ;;  %v398_v9 = vld [vmem:[%s5738_s30 + $0x128] sm:$0xff]  ;;  %v400_v10 = vld [vmem:[%s5738_s30 + $0x138] sm:$0xff]  ;;  %v3114_v11 = vpack.c.bf16 %v395_v8, %v393_v6  ;;  %v397_v13 = vld [vmem:[%s5738_s30 + $0x120] sm:$0xff] }
  0x28   :  { %3091 = vmatpush1.bf16.msra.mxu1 %v3090_v38  ;;  %v3116_v12 = vpack.c.bf16 %v400_v10, %v398_v9  ;;  %v399_v14 = vld [vmem:[%s5738_s30 + $0x130] sm:$0xff]  ;;  %v402_v15 = vld [vmem:[%s5738_s30 + $0x148] sm:$0xff]  ;;  %v404_v16 = vld [vmem:[%s5738_s30 + $0x158] sm:$0xff] }
  0x29   :  { %3093 = vmatprep.subr.bf16.mxu1 %v3092_v39  ;;  %v401_v19 = vld [vmem:[%s5738_s30 + $0x140] sm:$0xff]  ;;  %v403_v20 = vld [vmem:[%s5738_s30 + $0x150] sm:$0xff]  ;;  %v406_v21 = vld [vmem:[%s5738_s30 + $0x168] sm:$0xff] }
  0x2a   :  { %2711 = vmatmul.mubr.msk.f32.vlgmr.msra.gmra.mrb[8].mxu0 %vm84_vm0, %v2709_v17  ;;  %v3118_v17 = vpack.c.bf16 %v399_v14, %v397_v13  ;;  %v408_v22 = vld [vmem:[%s5738_s30 + $0x178] sm:$0xff]  ;;  %v3122_v23 = vpack.c.bf16 %v403_v20, %v401_v19  ;;  %v405_v25 = vld [vmem:[%s5738_s30 + $0x160] sm:$0xff]  ;;  %v407_v26 = vld [vmem:[%s5738_s30 + $0x170] sm:$0xff] }
  0x2b   :  { %333 = vmatprep.mubr.f32.mxu0 %v3731_v7  ;;  %v3124_v24 = vpack.c.bf16 %v408_v22, %v406_v21  ;;  %v410_v27 = vld [vmem:[%s5738_s30 + $0x188] sm:$0xff]  ;;  %v412_v28 = vld [vmem:[%s5738_s30 + $0x198] sm:$0xff]  ;;  %v3126_v29 = vpack.c.bf16 %v407_v26, %v405_v25  ;;  %v409_v31 = vld [vmem:[%s5738_s30 + $0x180] sm:$0xff] }
  0x2c   :  { %3095 = vmatpush1.bf16.msra.mxu1 %v3094_v44  ;;  %v3128_v30 = vpack.c.bf16 %v412_v28, %v410_v27  ;;  %v411_v32 = vld [vmem:[%s5738_s30 + $0x190] sm:$0xff]  ;;  %v414_v33 = vld [vmem:[%s5738_s30 + $0x1a8] sm:$0xff]  ;;  %v416_v34 = vld [vmem:[%s5738_s30 + $0x1b8] sm:$0xff] }
  0x2d   :  { %3097 = vmatprep.subr.bf16.mxu1 %v3096_v45  ;;  %v3130_v35 = vpack.c.bf16 %v411_v32, %v409_v31  ;;  %v3132_v36 = vpack.c.bf16 %v416_v34, %v414_v33  ;;  %v413_v37 = vld [vmem:[%s5738_s30 + $0x1a0] sm:$0xff]  ;;  %v415_v38 = vld [vmem:[%s5738_s30 + $0x1b0] sm:$0xff]  ;;  %v418_v39 = vld [vmem:[%s5738_s30 + $0x1c8] sm:$0xff] }
  0x2e   :  { %2712 = vmatmul.mubr.msk.f32.gmra.mrb[10].mxu0 %vm84_vm0, %v2710_v18  ;;  %v3120_v18 = vpack.c.bf16 %v404_v16, %v402_v15  ;;  %v420_v40 = vld [vmem:[%s5738_s30 + $0x1d8] sm:$0xff]  ;;  %v3134_v41 = vpack.c.bf16 %v415_v38, %v413_v37  ;;  %v417_v43 = vld [vmem:[%s5738_s30 + $0x1c0] sm:$0xff]  ;;  %v419_v44 = vld [vmem:[%s5738_s30 + $0x1d0] sm:$0xff] }
  0x2f   :  { %847 = vmatprep.mubr.f32.mxu0 %v3731_v7  ;;  %v3136_v42 = vpack.c.bf16 %v420_v40, %v418_v39  ;;  %v422_v45 = vld [vmem:[%s5738_s30 + $0x1e8] sm:$0xff]  ;;  %v424_v46 = vld [vmem:[%s5738_s30 + $0x1f8] sm:$0xff]  ;;  %v3138_v47 = vpack.c.bf16 %v419_v44, %v417_v43  ;;  %v421_v49 = vld [vmem:[%s5738_s30 + $0x1e0] sm:$0xff] }
  0x30   :  { %3099 = vmatpush1.bf16.msra.mxu1 %v3098_v50  ;;  %v3140_v48 = vpack.c.bf16 %v424_v46, %v422_v45  ;;  %v423_v50 = vld [vmem:[%s5738_s30 + $0x1f0] sm:$0xff]  ;;  %v426_v52 = vld [vmem:[%s5738_s30 + $0x208] sm:$0xff]  ;;  %v428_v53 = vld [vmem:[%s5738_s30 + $0x218] sm:$0xff] }
  0x31   :  { %3101 = vmatprep.subr.bf16.mxu1 %v3100_v51  ;;  %v3142_v51 = vpack.c.bf16 %v423_v50, %v421_v49  ;;  %v3144_v54 = vpack.c.bf16 %v428_v53, %v426_v52  ;;  %v425_v3 = vld [vmem:[%s5738_s30 + $0x200] sm:$0xff]  ;;  %v432_v6 = vld [vmem:[%s5738_s30 + $0x238] sm:$0xff]  ;;  %v431_v13 = vld [vmem:[%s5738_s30 + $0x230] sm:$0xff] }
  0x32   :  { %v434_v14 = vld [vmem:[%s5738_s30 + $0x248] sm:$0xff]  ;;  %v436_v15 = vld [vmem:[%s5738_s30 + $0x258] sm:$0xff]  ;;  %v433_v20 = vld [vmem:[%s5738_s30 + $0x240] sm:$0xff] }
  0x33   :  { %v3152_v19 = vpack.c.bf16 %v436_v15, %v434_v14  ;;  %v435_v21 = vld [vmem:[%s5738_s30 + $0x250] sm:$0xff]  ;;  %v438_v22 = vld [vmem:[%s5738_s30 + $0x268] sm:$0xff]  ;;  %v437_v26 = vld [vmem:[%s5738_s30 + $0x260] sm:$0xff] }
  0x34   :  { %3103 = vmatpush1.bf16.msra.mxu1 %v3102_v56  ;;  %v439_v27 = vld [vmem:[%s5738_s30 + $0x270] sm:$0xff]  ;;  %v442_v28 = vld [vmem:[%s5738_s30 + $0x288] sm:$0xff]  ;;  %v441_v32 = vld [vmem:[%s5738_s30 + $0x280] sm:$0xff] }
  0x35   :  { %3105 = vmatprep.subr.bf16.mxu1 %v3104_v57  ;;  %v443_v33 = vld [vmem:[%s5738_s30 + $0x290] sm:$0xff]  ;;  %v446_v34 = vld [vmem:[%s5738_s30 + $0x2a8] sm:$0xff]  ;;  %v445_v38 = vld [vmem:[%s5738_s30 + $0x2a0] sm:$0xff] }
  0x36   :  { %v447_v39 = vld [vmem:[%s5738_s30 + $0x2b0] sm:$0xff]  ;;  %v450_v40 = vld [vmem:[%s5738_s30 + $0x2c8] sm:$0xff]  ;;  %v449_v44 = vld [vmem:[%s5738_s30 + $0x2c0] sm:$0xff] }
  0x37   :  { %v451_v45 = vld [vmem:[%s5738_s30 + $0x2d0] sm:$0xff]  ;;  %v454_v46 = vld [vmem:[%s5738_s30 + $0x2e8] sm:$0xff]  ;;  %v453_v50 = vld [vmem:[%s5738_s30 + $0x2e0] sm:$0xff] }
  0x38   :  { %3107 = vmatpush1.bf16.msra.mxu1 %v3106_v62  ;;  %v458_v52 = vld [vmem:[%s5738_s30 + $0x308] sm:$0xff]  ;;  %v460_v53 = vld [vmem:[%s5738_s30 + $0x318] sm:$0xff]  ;;  %v469_v15 = vld [vmem:[%s5738_s30 + $0x360] sm:$0xff] }
  0x39   :  { %3109 = vmatprep.subr.bf16.mxu1 %v3108_v63 }
  0x3c   :  { %3111 = vmatpush1.bf16.msra.mxu1 %v3110_v4  ;;  %v427_v4 = vld [vmem:[%s5738_s30 + $0x210] sm:$0xff] }
  0x3d   :  { %3113 = vmatprep.subr.bf16.mxu1 %v3112_v5  ;;  %v430_v5 = vld [vmem:[%s5738_s30 + $0x228] sm:$0xff]  ;;  %v3146_v9 = vpack.c.bf16 %v427_v4, %v425_v3  ;;  %v468_v4 = vld [vmem:[%s5738_s30 + $0x358] sm:$0xff] }
  0x3e   :  { %v466_v3 = vld [vmem:[%s5738_s30 + $0x348] sm:$0xff] }
  0x40   :  { %3115 = vmatpush1.bf16.msra.mxu1 %v3114_v11  ;;  %v3148_v11 = vpack.c.bf16 %v432_v6, %v430_v5  ;;  %v3184_v6 = vpack.c.bf16 %v468_v4, %v466_v3 }
  0x41   :  { %3117 = vmatprep.subr.bf16.mxu1 %v3116_v12  ;;  %v429_v12 = vld [vmem:[%s5738_s30 + $0x220] sm:$0xff] }
  0x44   :  { %3119 = vmatpush1.bf16.msra.mxu1 %v3118_v17  ;;  %v3150_v17 = vpack.c.bf16 %v431_v13, %v429_v12  ;;  %v472_v12 = vld [vmem:[%s5738_s30 + $0x378] sm:$0xff] }
  0x45   :  { %3121 = vmatprep.subr.bf16.mxu1 %v3120_v18 }
  0x48   :  { %3123 = vmatpush1.bf16.msra.mxu1 %v3122_v23  ;;  %v440_v23 = vld [vmem:[%s5738_s30 + $0x278] sm:$0xff] }
  0x49   :  { %3125 = vmatprep.subr.bf16.mxu1 %v3124_v24  ;;  %v3154_v24 = vpack.c.bf16 %v435_v21, %v433_v20  ;;  %v3156_v25 = vpack.c.bf16 %v440_v23, %v438_v22  ;;  %v473_v22 = vld [vmem:[%s5738_s30 + $0x380] sm:$0xff]  ;;  %v475_v23 = vld [vmem:[%s5738_s30 + $0x390] sm:$0xff] }
  0x4c   :  { %3127 = vmatpush1.bf16.msra.mxu1 %v3126_v29  ;;  %v444_v29 = vld [vmem:[%s5738_s30 + $0x298] sm:$0xff] }
  0x4d   :  { %3129 = vmatprep.subr.bf16.mxu1 %v3128_v30  ;;  %v3158_v30 = vpack.c.bf16 %v439_v27, %v437_v26  ;;  %v3160_v31 = vpack.c.bf16 %v444_v29, %v442_v28  ;;  %v3194_v26 = vpack.c.bf16 %v475_v23, %v473_v22  ;;  %v477_v28 = vld [vmem:[%s5738_s30 + $0x3a0] sm:$0xff]  ;;  %v479_v29 = vld [vmem:[%s5738_s30 + $0x3b0] sm:$0xff] }
  0x50   :  { %3131 = vmatpush1.bf16.msra.mxu1 %v3130_v35  ;;  %v448_v35 = vld [vmem:[%s5738_s30 + $0x2b8] sm:$0xff] }
  0x51   :  { %3133 = vmatprep.subr.bf16.mxu1 %v3132_v36  ;;  %v3162_v36 = vpack.c.bf16 %v443_v33, %v441_v32  ;;  %v3164_v37 = vpack.c.bf16 %v448_v35, %v446_v34  ;;  %v3198_v32 = vpack.c.bf16 %v479_v29, %v477_v28  ;;  %v481_v34 = vld [vmem:[%s5738_s30 + $0x3c0] sm:$0xff]  ;;  %v483_v35 = vld [vmem:[%s5738_s30 + $0x3d0] sm:$0xff] }
  0x54   :  { %3135 = vmatpush1.bf16.msra.mxu1 %v3134_v41  ;;  %v452_v41 = vld [vmem:[%s5738_s30 + $0x2d8] sm:$0xff] }
  0x55   :  { %3137 = vmatprep.subr.bf16.mxu1 %v3136_v42  ;;  %v3166_v42 = vpack.c.bf16 %v447_v39, %v445_v38  ;;  %v3168_v43 = vpack.c.bf16 %v452_v41, %v450_v40  ;;  %v3202_v38 = vpack.c.bf16 %v483_v35, %v481_v34  ;;  %v485_v40 = vld [vmem:[%s5738_s30 + $0x3e0] sm:$0xff]  ;;  %v487_v41 = vld [vmem:[%s5738_s30 + $0x3f0] sm:$0xff] }
  0x58   :  { %3139 = vmatpush1.bf16.msra.mxu1 %v3138_v47  ;;  %v456_v47 = vld [vmem:[%s5738_s30 + $0x2f8] sm:$0xff] }
  0x59   :  { %3141 = vmatprep.subr.bf16.mxu1 %v3140_v48  ;;  %v3170_v48 = vpack.c.bf16 %v451_v45, %v449_v44  ;;  %v3172_v49 = vpack.c.bf16 %v456_v47, %v454_v46  ;;  %v3206_v44 = vpack.c.bf16 %v487_v41, %v485_v40  ;;  %v489_v46 = vld [vmem:[%s5738_s30 + $0x400] sm:$0xff]  ;;  %v491_v47 = vld [vmem:[%s5738_s30 + $0x410] sm:$0xff]  ;;  %v1033_v40 = vld [vmem:[%s5742_s0 + $0x88] sm:$0xff] }
  0x5a   :  { %v1016_v41 = vld [vmem:[%s5742_s0] sm:$0xff] }
  0x5c   :  { %3143 = vmatpush1.bf16.msra.mxu1 %v3142_v51  ;;  %v455_v51 = vld [vmem:[%s5738_s30 + $0x2f0] sm:$0xff] }
  0x5d   :  { %3145 = vmatprep.subr.bf16.mxu1 %v3144_v54  ;;  %v3174_v54 = vpack.c.bf16 %v455_v51, %v453_v50  ;;  %v3210_v51 = vpack.c.bf16 %v491_v47, %v489_v46 }
  0xed   :  { %v157_v55 = vpop.f32.mrb[0].mxu0 }
  0xee   :  { %v159_v56 = vpop.f32.mrb[1].mxu0 }
  0xf1   :  { %v163_v57 = vpop.f32.mrb[2].mxu0 }
  0xf2   :  { %v165_v58 = vpop.f32.mrb[3].mxu0 }
  0xf5   :  { %v243_v59 = vpop.f32.mrb[4].mxu0 }
  0xf6   :  { %344 = vrot.lane.b32.xlu0 %v243_v59, %s3732_s5  ;;  %v245_v60 = vpop.f32.mrb[5].mxu0  ;;  %v464_v59 = vld [vmem:[%s5738_s30 + $0x338] sm:$0xff] }
  0xf7   :  { %346 = vrot.lane.b32.xlu1 %v245_v60, %s3732_s5 }
  0xf9   :  { %v249_v61 = vpop.f32.mrb[6].mxu0 }
  0xfa   :  { %348 = vrot.lane.b32.xlu0 %v249_v61, %s3732_s5  ;;  %v251_v62 = vpop.f32.mrb[7].mxu0 }
  0xfb   :  { %350 = vrot.lane.b32.xlu1 %v251_v62, %s3732_s5  ;;  %v461_v62 = vld [vmem:[%s5738_s30 + $0x320] sm:$0xff] }
  0xfd   :  { %v329_v63 = vpop.f32.mrb[8].mxu0 }
  0xfe   :  { %v4110_v0 = vpop.f32.mrb[9].mxu0 }
 0x101   :  { %v4112_v1 = vpop.f32.mrb[10].mxu0 }
 0x102   :  { %v4114_v2 = vpop.f32.mrb[11].mxu0 }
 0x168   :  { %v4128_v8 = vpop.permute.xlu0 %344 }
 0x169   :  { %v359_v10 = vsel %vm352_vm1, %v159_v56, %v4128_v8  ;;  %v457_v56 = vld [vmem:[%s5738_s30 + $0x300] sm:$0xff]  ;;  %v347_v50 = vpop.permute.xlu1 %346 }
 0x16a   :  { %586 = vmatprep.mubr.f32.mxu1 %v359_v10  ;;  %v467_v10 = vld [vmem:[%s5738_s30 + $0x350] sm:$0xff] }
 0x16b   :  { %587 = vmatmul.mubr.f32.vlgmr.msra.gmra.mrb[0].mxu1 %v157_v55  ;;  %v3176_v55 = vpack.c.bf16 %v460_v53, %v458_v52  ;;  %v493_v53 = vld [vmem:[%s5738_s30 + $0x420] sm:$0xff] }
 0x16c   :  { %3147 = vmatpush1.bf16.msra.mxu1 %v3146_v9  ;;  %v4144_v16 = vpop.permute.xlu0 %348  ;;  %v465_v9 = vld [vmem:[%s5738_s30 + $0x340] sm:$0xff] }
 0x16d   :  { %v360_v18 = vsel %vm352_vm1, %v165_v58, %v4144_v16  ;;  %3149 = vmatprep.subr.bf16.mxu1 %v3148_v11  ;;  %v462_v58 = vld [vmem:[%s5738_s30 + $0x328] sm:$0xff]  ;;  %v3186_v13 = vpack.c.bf16 %v467_v10, %v465_v9  ;;  %v506_v9 = vlaneseq }
 0x16e   :  { %592 = vmatprep.mubr.f32.mxu1 %v360_v18  ;;  %v3180_v61 = vpack.c.bf16 %v464_v59, %v462_v58  ;;  %v470_v11 = vld [vmem:[%s5738_s30 + $0x368] sm:$0xff]  ;;  %v351_v58 = vpop.permute.xlu1 %350 }
 0x16f   :  { %593 = vmatmul.mubr.f32.gmra.mrb[2].mxu1 %v163_v57  ;;  %v459_v57 = vld [vmem:[%s5738_s30 + $0x310] sm:$0xff]  ;;  %v3188_v14 = vpack.c.bf16 %v472_v12, %v470_v11  ;;  %v474_v18 = vld [vmem:[%s5738_s30 + $0x388] sm:$0xff]  ;;  %v507_v10 = vshrl.u32 %v506_v9, 7  ;;  %v80_v12 = vld [vmem:[%s5739_s6] sm:$0x3] }
 0x170   :  { %3151 = vmatpush1.bf16.msra.mxu1 %v3150_v17  ;;  %663 = vmatprep.mubr.f32.mxu1 %v329_v63  ;;  %v3178_v60 = vpack.c.bf16 %v459_v57, %v457_v56  ;;  %v463_v63 = vld [vmem:[%s5738_s30 + $0x330] sm:$0xff]  ;;  %v498_v56 = vld [vmem:[%s5738_s30 + $0x448] sm:$0xff]  ;;  %v500_v57 = vld [vmem:[%s5738_s30 + $0x458] sm:$0xff] }
 0x171   :  { %3153 = vmatprep.subr.bf16.mxu1 %v3152_v19  ;;  %v3182_v5 = vpack.c.bf16 %v463_v63, %v461_v62  ;;  %v471_v17 = vld [vmem:[%s5738_s30 + $0x370] sm:$0xff]  ;;  %v476_v19 = vld [vmem:[%s5738_s30 + $0x398] sm:$0xff]  ;;  %v354_v62 = vsel %vm352_vm1, %v4144_v16, %v351_v58  ;;  %v502_v63 = vld [vmem:[%s5738_s30 + $0x468] sm:$0xff]  ;;  %v4369_v11 = vsub.s32 0, %v507_v10 }
 0x172   :  { %v3190_v20 = vpack.c.bf16 %v471_v17, %v469_v15  ;;  %v3192_v21 = vpack.c.bf16 %v476_v19, %v474_v18  ;;  %v503_v16 = vld [vmem:[%s5738_s30 + $0x470] sm:$0xff] }
 0x174   :  { %3155 = vmatpush1.bf16.msra.mxu1 %v3154_v24  ;;  %v478_v24 = vld [vmem:[%s5738_s30 + $0x3a8] sm:$0xff] }
 0x175   :  { %3157 = vmatprep.subr.bf16.mxu1 %v3156_v25  ;;  %v480_v25 = vld [vmem:[%s5738_s30 + $0x3b8] sm:$0xff] }
 0x176   :  { %v3196_v27 = vpack.c.bf16 %v480_v25, %v478_v24 }
 0x178   :  { %3159 = vmatpush1.bf16.msra.mxu1 %v3158_v30  ;;  %v482_v30 = vld [vmem:[%s5738_s30 + $0x3c8] sm:$0xff] }
 0x179   :  { %3161 = vmatprep.subr.bf16.mxu1 %v3160_v31  ;;  %v484_v31 = vld [vmem:[%s5738_s30 + $0x3d8] sm:$0xff] }
 0x17a   :  { %v3200_v33 = vpack.c.bf16 %v484_v31, %v482_v30 }
 0x17c   :  { %3163 = vmatpush1.bf16.msra.mxu1 %v3162_v36  ;;  %v486_v36 = vld [vmem:[%s5738_s30 + $0x3e8] sm:$0xff] }
 0x17d   :  { %3165 = vmatprep.subr.bf16.mxu1 %v3164_v37  ;;  %v488_v37 = vld [vmem:[%s5738_s30 + $0x3f8] sm:$0xff] }
 0x17e   :  { %v3204_v39 = vpack.c.bf16 %v488_v37, %v486_v36  ;;  %v778_v36 = vld [vmem:[%s5741_s3] sm:$0xff]  ;;  %v2716_v37 = vld [vmem:[%s5741_s3 + $0x8] sm:$0xff] }
 0x180   :  { %3167 = vmatpush1.bf16.msra.mxu1 %v3166_v42  ;;  %v490_v42 = vld [vmem:[%s5738_s30 + $0x408] sm:$0xff] }
 0x181   :  { %3169 = vmatprep.subr.bf16.mxu1 %v3168_v43  ;;  %v492_v43 = vld [vmem:[%s5738_s30 + $0x418] sm:$0xff] }
 0x182   :  { %v3208_v45 = vpack.c.bf16 %v492_v43, %v490_v42  ;;  %v1017_v43 = vld [vmem:[%s5742_s0 + $0x8] sm:$0xff] }
 0x183   :  { %v3238_v46 = vpack.c.bf16 %v1017_v43, %v1016_v41  ;;  %v1066_v41 = vld [vmem:[%s5742_s0 + $0x190] sm:$0xff] }
 0x184   :  { %3171 = vmatpush1.bf16.msra.mxu1 %v3170_v48  ;;  %v494_v48 = vld [vmem:[%s5738_s30 + $0x428] sm:$0xff] }
 0x185   :  { %3173 = vmatprep.subr.bf16.mxu1 %v3172_v49  ;;  %v496_v49 = vld [vmem:[%s5738_s30 + $0x438] sm:$0xff] }
 0x186   :  { %v3212_v52 = vpack.c.bf16 %v496_v49, %v494_v48  ;;  %v1018_v48 = vld [vmem:[%s5742_s0 + $0x10] sm:$0xff]  ;;  %v1019_v49 = vld [vmem:[%s5742_s0 + $0x18] sm:$0xff] }
 0x188   :  { %3175 = vmatpush1.bf16.msra.mxu1 %v3174_v54  ;;  %v495_v54 = vld [vmem:[%s5738_s30 + $0x430] sm:$0xff] }
 0x189   :  { %3177 = vmatprep.subr.bf16.mxu1 %v3176_v55  ;;  %v353_v55 = vsel %vm352_vm1, %v4128_v8, %v347_v50  ;;  %v3214_v59 = vpack.c.bf16 %v495_v54, %v493_v53  ;;  %v497_v8 = vld [vmem:[%s5738_s30 + $0x440] sm:$0xff] }
 0x18a   :  { %v1036_v50 = vld [vmem:[%s5742_s0 + $0xa0] sm:$0xff] }
 0x18b   :  { %v1020_v54 = vld [vmem:[%s5742_s0 + $0x20] sm:$0xff] }
 0x18c   :  { %3179 = vmatpush1.bf16.msra.mxu1 %v3178_v60  ;;  %v3216_v60 = vpack.c.bf16 %v500_v57, %v498_v56  ;;  %v1038_v56 = vld [vmem:[%s5742_s0 + $0xb0] sm:$0xff]  ;;  %v1039_v57 = vld [vmem:[%s5742_s0 + $0xb8] sm:$0xff] }
 0x18d   :  { %3181 = vmatprep.subr.bf16.mxu1 %v3180_v61  ;;  %v499_v61 = vld [vmem:[%s5738_s30 + $0x450] sm:$0xff] }
 0x18e   :  { %v3218_v3 = vpack.c.bf16 %v499_v61, %v497_v8  ;;  %v1023_v8 = vld [vmem:[%s5742_s0 + $0x38] sm:$0xff]  ;;  %v1040_v61 = vld [vmem:[%s5742_s0 + $0xc0] sm:$0xff] }
 0x190   :  { %3183 = vmatpush1.bf16.msra.mxu1 %v3182_v5  ;;  %v501_v5 = vld [vmem:[%s5738_s30 + $0x460] sm:$0xff] }
 0x191   :  { %3185 = vmatprep.subr.bf16.mxu1 %v3184_v6  ;;  %v3222_v6 = vpack.c.bf16 %v503_v16, %v501_v5  ;;  %v1042_v5 = vld [vmem:[%s5742_s0 + $0xd0] sm:$0xff]  ;;  %v1043_v16 = vld [vmem:[%s5742_s0 + $0xd8] sm:$0xff] }
 0x192   :  { %v3256_v9 = vpack.c.bf16 %v1043_v16, %v1042_v5  ;;  %v1075_v5 = vld [vmem:[%s5742_s0 + $0x1d8] sm:$0xff] }
 0x194   :  { %3187 = vmatpush1.bf16.msra.mxu1 %v3186_v13  ;;  %v4374_v13 = vsub.s32 1, %v507_v10  ;;  %v1026_v10 = vld [vmem:[%s5742_s0 + $0x50] sm:$0xff] }
 0x195   :  { %3189 = vmatprep.subr.bf16.mxu1 %v3188_v14  ;;  %v509_v14 = vrot.slane %v80_v12, %v4369_v11 }
 0x196   :  { %v513_v15 = vrot.slane %v80_v12, %v4374_v13  ;;  %v1027_v12 = vld [vmem:[%s5742_s0 + $0x58] sm:$0xff] }
 0x198   :  { %3191 = vmatpush1.bf16.msra.mxu1 %v3190_v20 }
 0x199   :  { %3193 = vmatprep.subr.bf16.mxu1 %v3192_v21 }
 0x19c   :  { %3195 = vmatpush1.bf16.msra.mxu1 %v3194_v26 }
 0x19d   :  { %3197 = vmatprep.subr.bf16.mxu1 %v3196_v27 }
 0x1a0   :  { %3199 = vmatpush1.bf16.msra.mxu1 %v3198_v32 }
 0x1a1   :  { %3201 = vmatprep.subr.bf16.mxu1 %v3200_v33 }
 0x1a4   :  { %3203 = vmatpush1.bf16.msra.mxu1 %v3202_v38  ;;  %v2718_v38 = vld [vmem:[%s5741_s3 + $0x10] sm:$0xff] }
 0x1a5   :  { %3205 = vmatprep.subr.bf16.mxu1 %v3204_v39  ;;  %v1032_v39 = vld [vmem:[%s5742_s0 + $0x80] sm:$0xff] }
 0x1a6   :  { %v3236_v42 = vpack.c.bf16 %v1033_v40, %v1032_v39  ;;  %v1048_v39 = vld [vmem:[%s5742_s0 + $0x100] sm:$0xff]  ;;  %v1049_v40 = vld [vmem:[%s5742_s0 + $0x108] sm:$0xff] }
 0x1a8   :  { %3207 = vmatpush1.bf16.msra.mxu1 %v3206_v44  ;;  %v1034_v44 = vld [vmem:[%s5742_s0 + $0x90] sm:$0xff] }
 0x1a9   :  { %3209 = vmatprep.subr.bf16.mxu1 %v3208_v45  ;;  %v1035_v45 = vld [vmem:[%s5742_s0 + $0x98] sm:$0xff] }
 0x1aa   :  { %v3240_v47 = vpack.c.bf16 %v1035_v45, %v1034_v44  ;;  %v3270_v44 = vpack.c.bf16 %v1049_v40, %v1048_v39  ;;  %v1087_v39 = vld [vmem:[%s5742_s0 + $0x238] sm:$0xff] }
 0x1ab   :  { %664 = vmatmul.mubr.f32.vlgmr.msra.gmra.mrb[0].mxu1 %v353_v55  ;;  %v1021_v55 = vld [vmem:[%s5742_s0 + $0x28] sm:$0xff] }
 0x1ac   :  { %3211 = vmatpush1.bf16.msra.mxu1 %v3210_v51  ;;  %669 = vmatprep.mubr.f32.mxu1 %v4112_v1  ;;  %v504_v1 = vld [vmem:[%s5738_s30 + $0x478] sm:$0xff]  ;;  %v1037_v51 = vld [vmem:[%s5742_s0 + $0xa8] sm:$0xff]  ;;  %v3246_v58 = vpack.c.bf16 %v1021_v55, %v1020_v54  ;;  %v1070_v55 = vld [vmem:[%s5742_s0 + $0x1b0] sm:$0xff] }
 0x1ad   :  { %3213 = vmatprep.subr.bf16.mxu1 %v3212_v52  ;;  %v3220_v4 = vpack.c.bf16 %v504_v1, %v502_v63  ;;  %v3242_v52 = vpack.c.bf16 %v1019_v49, %v1018_v48  ;;  %v3244_v53 = vpack.c.bf16 %v1037_v51, %v1036_v50  ;;  %v1051_v48 = vld [vmem:[%s5742_s0 + $0x118] sm:$0xff]  ;;  %v1068_v49 = vld [vmem:[%s5742_s0 + $0x1a0] sm:$0xff]  ;;  %v1069_v50 = vld [vmem:[%s5742_s0 + $0x1a8] sm:$0xff] }
 0x1ae   :  { %v1053_v54 = vld [vmem:[%s5742_s0 + $0x128] sm:$0xff] }
 0x1af   :  { %670 = vmatmul.mubr.f32.gmra.mrb[2].mxu1 %v354_v62  ;;  %v1041_v62 = vld [vmem:[%s5742_s0 + $0xc8] sm:$0xff] }
 0x1b0   :  { %3215 = vmatpush1.bf16.msra.mxu1 %v3214_v59  ;;  %740 = vmatprep.mubr.f32.mxu1 %v3731_v7  ;;  %v3248_v59 = vpack.c.bf16 %v1039_v57, %v1038_v56  ;;  %v3252_v1 = vpack.c.bf16 %v1041_v62, %v1040_v61  ;;  %v1071_v56 = vld [vmem:[%s5742_s0 + $0x1b8] sm:$0xff]  ;;  %v1073_v61 = vld [vmem:[%s5742_s0 + $0x1c8] sm:$0xff] }
 0x1b1   :  { %3217 = vmatprep.subr.bf16.mxu1 %v3216_v60  ;;  %v1022_v60 = vld [vmem:[%s5742_s0 + $0x30] sm:$0xff] }
 0x1b2   :  { %v3250_v63 = vpack.c.bf16 %v1023_v8, %v1022_v60  ;;  %v1055_v60 = vld [vmem:[%s5742_s0 + $0x138] sm:$0xff]  ;;  %v1072_v8 = vld [vmem:[%s5742_s0 + $0x1c0] sm:$0xff] }
 0x1b4   :  { %3219 = vmatpush1.bf16.msra.mxu1 %v3218_v3  ;;  %v1024_v3 = vld [vmem:[%s5742_s0 + $0x40] sm:$0xff] }
 0x1b5   :  { %3221 = vmatprep.subr.bf16.mxu1 %v3220_v4  ;;  %v1025_v4 = vld [vmem:[%s5742_s0 + $0x48] sm:$0xff] }
 0x1b8   :  { %3223 = vmatpush1.bf16.msra.mxu1 %v3222_v6  ;;  %v3254_v6 = vpack.c.bf16 %v1025_v4, %v1024_v3  ;;  %v1057_v3 = vld [vmem:[%s5742_s0 + $0x148] sm:$0xff]  ;;  %v1074_v4 = vld [vmem:[%s5742_s0 + $0x1d0] sm:$0xff] }
 0x1bb   :  { %2713 = vmatmul.mubr.msk.f32.vlgmr.msra.gmra.mrb[0].mxu1 %vm352_vm1, %v4110_v0  ;;  %v81_v0 = vld [vmem:[%s5740_s26] sm:$0x3] }
 0x1bc   :  { %746 = vmatprep.mubr.f32.mxu1 %v3731_v7  ;;  %v761_v18 = vrot.slane %v81_v0, %v4369_v11  ;;  %v765_v21 = vrot.slane %v81_v0, %v4374_v13  ;;  %v1045_v0 = vld [vmem:[%s5742_s0 + $0xe8] sm:$0xff] }
 0x1bf   :  { %2714 = vmatmul.mubr.msk.f32.gmra.mrb[2].mxu1 %vm352_vm1, %v4114_v2 }
 0x28e   :  { %v742_v17 = vpop.f32.mrb[0].mxu1 }
 0x28f   :  { %v3686_v2 = vadd.f32 %v742_v17, %v509_v14  ;;  %v744_v19 = vpop.f32.mrb[1].mxu1 }
 0x290   :  { %v3687_v20 = vadd.f32 %v744_v19, %v513_v15  ;;  %v1046_v19 = vld [vmem:[%s5742_s0 + $0xf0] sm:$0xff] }
 0x291   :  { %v768_v23 = vmul.f32 %v3686_v2, %v761_v18  ;;  %vm753_vm2 = vcmp.ge.f32.partialorder %v3686_v2, 0.0 }
 0x292   :  { %v748_v22 = vpop.f32.mrb[2].mxu1  ;;  %v769_v26 = vmul.f32 %v3687_v20, %v765_v21  ;;  %vm754_vm3 = vcmp.ge.f32.partialorder %v3687_v20, 0.0 }
 0x293   :  { %v3688_v24 = vadd.f32 %v748_v22, %v509_v14  ;;  %v750_v25 = vpop.f32.mrb[3].mxu1  ;;  %v772_v30 = vsel %vm753_vm2, %v3686_v2, %v768_v23  ;;  %v1044_v14 = vld [vmem:[%s5742_s0 + $0xe0] sm:$0xff]  ;;  %v1030_v23 = vld [vmem:[%s5742_s0 + $0x70] sm:$0xff] }
 0x294   :  { %v3689_v27 = vadd.f32 %v750_v25, %v513_v15  ;;  %v773_v33 = vsel %vm754_vm3, %v3687_v20, %v769_v26  ;;  %v3258_v15 = vpack.c.bf16 %v1027_v12, %v1026_v10  ;;  %v3260_v17 = vpack.c.bf16 %v1045_v0, %v1044_v14  ;;  %v1028_v2 = vld [vmem:[%s5742_s0 + $0x60] sm:$0xff]  ;;  %v1047_v20 = vld [vmem:[%s5742_s0 + $0xf8] sm:$0xff]  ;;  %v1077_v14 = vld [vmem:[%s5742_s0 + $0x1e8] sm:$0xff] }
 0x295   :  { %vm755_vm4 = vcmp.ge.f32.partialorder %v3688_v24, 0.0  ;;  %v770_v28 = vmul.f32 %v3688_v24, %v761_v18  ;;  %v1029_v18 = vld [vmem:[%s5742_s0 + $0x68] sm:$0xff]  ;;  %v3264_v22 = vpack.c.bf16 %v1047_v20, %v1046_v19  ;;  %v1064_v26 = vld [vmem:[%s5742_s0 + $0x180] sm:$0xff]  ;;  %v1059_v10 = vld [vmem:[%s5742_s0 + $0x158] sm:$0xff] }
 0x296   :  { %vm756_vm5 = vcmp.ge.f32.partialorder %v3689_v27, 0.0  ;;  %v771_v29 = vmul.f32 %v3689_v27, %v765_v21  ;;  %v3262_v21 = vpack.c.bf16 %v1029_v18, %v1028_v2  ;;  %v1076_v12 = vld [vmem:[%s5742_s0 + $0x1e0] sm:$0xff]  ;;  %v1061_v2 = vld [vmem:[%s5742_s0 + $0x168] sm:$0xff]  ;;  %v1078_v18 = vld [vmem:[%s5742_s0 + $0x1f0] sm:$0xff] }
 0x297   :  { %v774_v31 = vsel %vm755_vm4, %v3688_v24, %v770_v28  ;;  %v1031_v24 = vld [vmem:[%s5742_s0 + $0x78] sm:$0xff] }
 0x298   :  { %v3226_v32 = vpack.c.bf16 %v774_v31, %v772_v30  ;;  %v775_v34 = vsel %vm756_vm5, %v3689_v27, %v771_v29  ;;  %v3266_v25 = vpack.c.bf16 %v1031_v24, %v1030_v23  ;;  %v1065_v27 = vld [vmem:[%s5742_s0 + $0x188] sm:$0xff]  ;;  %v1079_v19 = vld [vmem:[%s5742_s0 + $0x1f8] sm:$0xff] }
 0x299   :  { %v3224_v35 = vpack.c.bf16 %v775_v34, %v773_v33  ;;  %v3268_v28 = vpack.c.bf16 %v1065_v27, %v1064_v26  ;;  %v1063_v23 = vld [vmem:[%s5742_s0 + $0x178] sm:$0xff]  ;;  %v1081_v26 = vld [vmem:[%s5742_s0 + $0x208] sm:$0xff] }
 0x29b   :  { %3225 = vmatprep.subr.bf16.mxu0 %v3224_v35 }
 0x29c   :  { %3227 = vmatpush1.bf16.msra.mxu0 %v3226_v32 }
 0x29d   :  { %3229 = vmatprep.subr.bf16.mxu0 %v3224_v35 }
 0x29f   :  { %2715 = vmatmul.mubr.msk.f32.vlgmr.msra.gmra.mrb[12].mxu0 %vm779_vm6, %v778_v36  ;;  %v1316_v36 = vld [vmem:[%s5721_s20] sm:$0xff] }
 0x2a0   :  { %3231 = vmatpush1.bf16.msra.mxu0 %v3226_v32  ;;  %923 = vmatprep.mubr.f32.mxu0 %v3731_v7 }
 0x2a1   :  { %3233 = vmatprep.subr.bf16.mxu0 %v3224_v35  ;;  %v3733_v35 = vmov 0.0|0.0  }
 0x2a2   :  { %3348 = vmatprep.subr.bf16.mxu1 %v3733_v35 }
 0x2a3   :  { %2717 = vmatmul.mubr.msk.f32.vlgmr.msra.gmra.mrb[14].mxu0 %vm779_vm6, %v2716_v37  ;;  %v1317_v37 = vld [vmem:[%s5722_s21] sm:$0xff] }
 0x2a4   :  { %3235 = vmatpush1.bf16.msra.mxu0 %v3226_v32  ;;  %999 = vmatprep.mubr.f32.mxu0 %v3731_v7 }
 0x2a5   :  { %3237 = vmatprep.subr.bf16.mxu0 %v3236_v42  ;;  %v1067_v42 = vld [vmem:[%s5742_s0 + $0x198] sm:$0xff] }
 0x2a7   :  { %2719 = vmatmul.mubr.msk.f32.vlgmr.msra.gmra.mrb[16].mxu0 %vm779_vm6, %v2718_v38  ;;  %v3734_v38 = vmov 0  }
 0x2a8   :  { %3239 = vmatpush3.bf16.msra.mxu0 %v3238_v46  ;;  %3706 = vset.pattern.permute.xlu1 %v3734_v38  ;;  %v3272_v46 = vpack.c.bf16 %v1067_v42, %v1066_v41  ;;  %v1318_v41 = vld [vmem:[%s5710_s9] sm:$0xff]  ;;  %v1319_v42 = vld [vmem:[%s5710_s9 + $0x8] sm:$0xff] }
 0x2a9   :  { %3241 = vmatprep.subr.bf16.mxu0 %v3240_v47  ;;  %3705 = vset.pattern.permute.xlu0 %v3734_v38  ;;  %v1050_v47 = vld [vmem:[%s5742_s0 + $0x110] sm:$0xff] }
 0x2aa   :  { %v3274_v51 = vpack.c.bf16 %v1051_v48, %v1050_v47  ;;  %v1086_v38 = vld [vmem:[%s5742_s0 + $0x230] sm:$0xff]  ;;  %v1323_v47 = vld [vmem:[%s5710_s9 + $0x28] sm:$0xff] }
 0x2ab   :  { %v3310_v40 = vpack.c.bf16 %v1087_v39, %v1086_v38 }
 0x2ac   :  { %3243 = vmatpush3.bf16.msra.mxu0 %v3242_v52  ;;  %v3276_v52 = vpack.c.bf16 %v1069_v50, %v1068_v49  ;;  %v1324_v49 = vld [vmem:[%s5710_s9 + $0x30] sm:$0xff]  ;;  %v1325_v50 = vld [vmem:[%s5710_s9 + $0x38] sm:$0xff] }
 0x2ad   :  { %3245 = vmatprep.subr.bf16.mxu0 %v3244_v53  ;;  %v1052_v53 = vld [vmem:[%s5742_s0 + $0x120] sm:$0xff] }
 0x2ae   :  { %v3278_v57 = vpack.c.bf16 %v1053_v54, %v1052_v53  ;;  %v1327_v53 = vld [vmem:[%s5710_s9 + $0x48] sm:$0xff] }
 0x2b0   :  { %3247 = vmatpush3.bf16.msra.mxu0 %v3246_v58  ;;  %v3280_v58 = vpack.c.bf16 %v1071_v56, %v1070_v55  ;;  %v1328_v55 = vld [vmem:[%s5710_s9 + $0x50] sm:$0xff]  ;;  %v1329_v56 = vld [vmem:[%s5710_s9 + $0x58] sm:$0xff] }
 0x2b1   :  { %3249 = vmatprep.subr.bf16.mxu0 %v3248_v59  ;;  %v1054_v59 = vld [vmem:[%s5742_s0 + $0x130] sm:$0xff] }
 0x2b2   :  { %v3282_v62 = vpack.c.bf16 %v1055_v60, %v1054_v59  ;;  %v1331_v59 = vld [vmem:[%s5710_s9 + $0x68] sm:$0xff] }
 0x2b4   :  { %3251 = vmatpush3.bf16.msra.mxu0 %v3250_v63  ;;  %v3284_v63 = vpack.c.bf16 %v1073_v61, %v1072_v8  ;;  %v1332_v8 = vld [vmem:[%s5710_s9 + $0x70] sm:$0xff]  ;;  %v1333_v61 = vld [vmem:[%s5710_s9 + $0x78] sm:$0xff] }
 0x2b5   :  { %3253 = vmatprep.subr.bf16.mxu0 %v3252_v1  ;;  %v1056_v1 = vld [vmem:[%s5742_s0 + $0x140] sm:$0xff] }
 0x2b6   :  { %v3286_v16 = vpack.c.bf16 %v1057_v3, %v1056_v1  ;;  %v1335_v1 = vld [vmem:[%s5710_s9 + $0x88] sm:$0xff] }
 0x2b8   :  { %3255 = vmatpush3.bf16.msra.mxu0 %v3254_v6  ;;  %v3288_v6 = vpack.c.bf16 %v1075_v5, %v1074_v4  ;;  %v1336_v4 = vld [vmem:[%s5710_s9 + $0x90] sm:$0xff]  ;;  %v1337_v5 = vld [vmem:[%s5710_s9 + $0x98] sm:$0xff] }
 0x2b9   :  { %3257 = vmatprep.subr.bf16.mxu0 %v3256_v9  ;;  %v1058_v9 = vld [vmem:[%s5742_s0 + $0x150] sm:$0xff] }
 0x2ba   :  { %v3290_v0 = vpack.c.bf16 %v1059_v10, %v1058_v9  ;;  %v1339_v9 = vld [vmem:[%s5710_s9 + $0xa8] sm:$0xff] }
 0x2bc   :  { %3259 = vmatpush3.bf16.msra.mxu0 %v3258_v15  ;;  %v3292_v15 = vpack.c.bf16 %v1077_v14, %v1076_v12  ;;  %v1340_v12 = vld [vmem:[%s5710_s9 + $0xb0] sm:$0xff]  ;;  %v1341_v14 = vld [vmem:[%s5710_s9 + $0xb8] sm:$0xff] }
 0x2bd   :  { %3261 = vmatprep.subr.bf16.mxu0 %v3260_v17  ;;  %v1060_v17 = vld [vmem:[%s5742_s0 + $0x160] sm:$0xff] }
 0x2be   :  { %v3294_v20 = vpack.c.bf16 %v1061_v2, %v1060_v17 }
 0x2c0   :  { %3263 = vmatpush3.bf16.msra.mxu0 %v3262_v21  ;;  %v3296_v21 = vpack.c.bf16 %v1079_v19, %v1078_v18  ;;  %v2720_v18 = vld [vmem:[%s5708_s7] ss:$0 sm:$0xff] }
 0x2c1   :  { %3265 = vmatprep.subr.bf16.mxu0 %v3264_v22  ;;  %v1062_v22 = vld [vmem:[%s5742_s0 + $0x170] sm:$0xff] }
 0x2c2   :  { %v3298_v24 = vpack.c.bf16 %v1063_v23, %v1062_v22 }
 0x2c4   :  { %3267 = vmatpush3.bf16.msra.mxu0 %v3266_v25  ;;  %v1080_v25 = vld [vmem:[%s5742_s0 + $0x200] sm:$0xff] }
 0x2c5   :  { %3269 = vmatprep.subr.bf16.mxu0 %v3268_v28  ;;  %v3301_v28 = vpack.c.bf16 %v1081_v26, %v1080_v25 }
 0x372   :  { %v849_v29 = vpop.f32.mrb[12].mxu0 }
 0x373   :  { %v851_v30 = vpop.f32.mrb[13].mxu0 }
 0x376   :  { %v925_v31 = vpop.f32.mrb[14].mxu0 }
 0x377   :  { %1008 = vrot.lane.b32.xlu0 %v925_v31, %s3732_s5  ;;  %v927_v32 = vpop.f32.mrb[15].mxu0 }
 0x378   :  { %1010 = vrot.lane.b32.xlu1 %v927_v32, %s3732_s5 }
 0x37a   :  { %v1001_v33 = vpop.f32.mrb[16].mxu0 }
 0x37b   :  { %v4498_v34 = vpop.f32.mrb[17].mxu0  ;;  %1347 = vperm.xlu0 %3705, %v1316_v36   ;;  %v1085_v36 = vld [vmem:[%s5742_s0 + $0x228] sm:$0xff] }
 0x37c   :  { %1354 = vperm.xlu1 %3706, %v1317_v37  }
 0x3e9   :  { %v4519_v43 = vpop.permute.xlu0 %1008 }
 0x3ea   :  { %v1015_v45 = vsel %vm352_vm1, %v851_v30, %v4519_v43  ;;  %v1011_v27 = vpop.permute.xlu1 %1010  ;;  %v1083_v30 = vld [vmem:[%s5742_s0 + $0x218] sm:$0xff] }
 0x3eb   :  { %1161 = vmatprep.mubr.f32.mxu0 %v1015_v45  ;;  %v1012_v31 = vsel %vm352_vm1, %v4519_v43, %v1011_v27  ;;  %v1320_v43 = vld [vmem:[%s5710_s9 + $0x10] sm:$0xff]  ;;  %v1321_v45 = vld [vmem:[%s5710_s9 + $0x18] sm:$0xff] }
 0x3ec   :  { %1162 = vmatmul.mubr.f32.vlgmr.msra.gmra.mrb[18].mxu0 %v849_v29  ;;  %v1082_v29 = vld [vmem:[%s5742_s0 + $0x210] sm:$0xff] }
 0x3ed   :  { %3271 = vmatpush3.bf16.msra.mxu0 %v3270_v44  ;;  %1231 = vmatprep.mubr.f32.mxu0 %v1001_v33  ;;  %v3304_v32 = vpack.c.bf16 %v1083_v30, %v1082_v29  ;;  %v1084_v33 = vld [vmem:[%s5742_s0 + $0x220] sm:$0xff]  ;;  %v3313_v44 = vpack.c.bf16 %v1319_v42, %v1318_v41  ;;  %v2727_v41 = vld [vmem:[%s5710_s9 + $0xc8] sm:$0xff]  ;;  %v2728_v42 = vld [vmem:[%s5710_s9 + $0xd0] sm:$0xff] }
 0x3ee   :  { %3273 = vmatprep.subr.bf16.mxu0 %v3272_v46  ;;  %v3307_v37 = vpack.c.bf16 %v1085_v36, %v1084_v33  ;;  %v3316_v46 = vpack.c.bf16 %v1321_v45, %v1320_v43 }
 0x3f1   :  { %3275 = vmatpush3.bf16.msra.mxu0 %v3274_v51  ;;  %v3322_v51 = vpack.c.bf16 %v1325_v50, %v1324_v49  ;;  %v2733_v49 = vld [vmem:[%s5710_s9 + $0xf8] sm:$0xff] }
 0x3f2   :  { %3277 = vmatprep.subr.bf16.mxu0 %v3276_v52  ;;  %v1326_v52 = vld [vmem:[%s5710_s9 + $0x40] sm:$0xff] }
 0x3f3   :  { %v3325_v54 = vpack.c.bf16 %v1327_v53, %v1326_v52  ;;  %v2735_v52 = vld [vmem:[%s5710_s9 + $0x108] sm:$0xff] }
 0x3f5   :  { %3279 = vmatpush3.bf16.msra.mxu0 %v3278_v57  ;;  %v3328_v57 = vpack.c.bf16 %v1329_v56, %v1328_v55  ;;  %v2737_v55 = vld [vmem:[%s5710_s9 + $0x118] sm:$0xff] }
 0x3f6   :  { %3281 = vmatprep.subr.bf16.mxu0 %v3280_v58  ;;  %v1330_v58 = vld [vmem:[%s5710_s9 + $0x60] sm:$0xff] }
 0x3f7   :  { %v3331_v60 = vpack.c.bf16 %v1331_v59, %v1330_v58  ;;  %v2739_v58 = vld [vmem:[%s5710_s9 + $0x128] sm:$0xff] }
 0x3f9   :  { %3283 = vmatpush3.bf16.msra.mxu0 %v3282_v62  ;;  %v3334_v62 = vpack.c.bf16 %v1333_v61, %v1332_v8  ;;  %v2741_v8 = vld [vmem:[%s5710_s9 + $0x138] sm:$0xff] }
 0x3fa   :  { %3285 = vmatprep.subr.bf16.mxu0 %v3284_v63  ;;  %v1334_v63 = vld [vmem:[%s5710_s9 + $0x80] sm:$0xff]  ;;  %v4736_v36 = vpop.permute.xlu0 %1347 }
 0x3fb   :  { %v3337_v3 = vpack.c.bf16 %v1335_v1, %v1334_v63  ;;  %v4728_v30 = vpop.permute.xlu1 %1354  ;;  %v2743_v63 = vld [vmem:[%s5710_s9 + $0x148] sm:$0xff] }
 0x3fd   :  { %3287 = vmatpush3.bf16.msra.mxu0 %v3286_v16  ;;  %v3340_v16 = vpack.c.bf16 %v1337_v5, %v1336_v4  ;;  %v2745_v4 = vld [vmem:[%s5710_s9 + $0x158] sm:$0xff] }
 0x3fe   :  { %3289 = vmatprep.subr.bf16.mxu0 %v3288_v6  ;;  %v1338_v6 = vld [vmem:[%s5710_s9 + $0xa0] sm:$0xff] }
 0x3ff   :  { %v3343_v10 = vpack.c.bf16 %v1339_v9, %v1338_v6  ;;  %v2747_v6 = vld [vmem:[%s5710_s9 + $0x168] sm:$0xff] }
 0x401   :  { %3291 = vmatpush3.bf16.msra.mxu0 %v3290_v0  ;;  %v3346_v0 = vpack.c.bf16 %v1341_v14, %v1340_v12  ;;  %v2749_v12 = vld [vmem:[%s5710_s9 + $0x178] sm:$0xff] }
 0x402   :  { %3293 = vmatprep.subr.bf16.mxu0 %v3292_v15 }
 0x405   :  { %3295 = vmatpush3.bf16.msra.mxu0 %v3294_v20 }
 0x406   :  { %3297 = vmatprep.subr.bf16.mxu0 %v3296_v21 }
 0x409   :  { %3299 = vmatpush3.bf16.msra.mxu0 %v3298_v24  ;;  %v2722_v24 = vld [vmem:[%s5709_s8] ss:$0 sm:$0xff] }
 0x40a   :  { %3300 = vmatprep.subr.bf16.mxu0 %v3733_v35 }
 0x40c   :  { %1232 = vmatmul.mubr.f32.vlgmr.msra.gmra.mrb[20].mxu0 %v1012_v31 }
 0x40d   :  { %3302 = vmatpush3.bf16.msra.mxu0 %v3301_v28  ;;  %3042 = vmatprep.mubr.msk.f32.mxu0 %vm3735_vm7, %v3731_v7 }
 0x40e   :  { %3303 = vmatprep.subr.bf16.mxu0 %v3733_v35 }
 0x411   :  { %3305 = vmatpush3.bf16.msra.mxu0 %v3304_v32 }
 0x412   :  { %3306 = vmatprep.subr.bf16.mxu0 %v3733_v35 }
 0x415   :  { %3308 = vmatpush3.bf16.msra.mxu0 %v3307_v37 }
 0x416   :  { %3309 = vmatprep.subr.bf16.mxu0 %v3733_v35 }
 0x419   :  { %3311 = vmatpush3.bf16.msra.mxu0 %v3310_v40  ;;  %v2726_v40 = vld [vmem:[%s5710_s9 + $0xc0] sm:$0xff] }
 0x41a   :  { %3312 = vmatprep.subr.bf16.mxu0 %v3733_v35  ;;  %v3349_v43 = vpack.c.bf16 %v2727_v41, %v2726_v40  ;;  %v2761_v41 = vld [vmem:[%s5710_s9 + $0x1b0] sm:$0xff] }
 0x41c   :  { %3043 = vmatmul.mubr.msk.f32.vlgmr.msra.gmra.mrb[22].mxu0 %vm352_vm1, %v4498_v34  ;;  %v1322_v34 = vld [vmem:[%s5710_s9 + $0x20] sm:$0xff]  ;;  %3350 = vmatpush1.bf16.msra.mxu1 %v3349_v43 }
 0x41d   :  { %3314 = vmatpush1.bf16.msra.mxu0 %v3313_v44  ;;  %v3319_v48 = vpack.c.bf16 %v1323_v47, %v1322_v34  ;;  %v2729_v44 = vld [vmem:[%s5710_s9 + $0xd8] sm:$0xff]  ;;  %3351 = vmatprep.subr.bf16.mxu1 %v3733_v35  ;;  %v2731_v34 = vld [vmem:[%s5710_s9 + $0xe8] sm:$0xff] }
 0x41e   :  { %3315 = vmatprep.subr.bf16.mxu0 %v3733_v35  ;;  %v3352_v45 = vpack.c.bf16 %v2729_v44, %v2728_v42  ;;  %v2762_v42 = vld [vmem:[%s5710_s9 + $0x1b8] sm:$0xff]  ;;  %v2763_v44 = vld [vmem:[%s5710_s9 + $0x1c0] sm:$0xff] }
 0x41f   :  { %v3394_v43 = vpack.c.bf16 %v2762_v42, %v2761_v41  ;;  %v1727_v41 = vld [vmem:[%s5713_s12 + $0xb8] sm:$0xff] }
 0x420   :  { %3353 = vmatpush1.bf16.msra.mxu1 %v3352_v45  ;;  %v2764_v45 = vld [vmem:[%s5710_s9 + $0x1c8] sm:$0xff] }
 0x421   :  { %3317 = vmatpush1.bf16.msra.mxu0 %v3316_v46  ;;  %v2730_v46 = vld [vmem:[%s5710_s9 + $0xe0] sm:$0xff]  ;;  %3354 = vmatprep.subr.bf16.mxu1 %v3733_v35 }
 0x422   :  { %3318 = vmatprep.subr.bf16.mxu0 %v3733_v35  ;;  %v3355_v47 = vpack.c.bf16 %v2731_v34, %v2730_v46  ;;  %v3397_v46 = vpack.c.bf16 %v2764_v45, %v2763_v44  ;;  %v2765_v34 = vld [vmem:[%s5710_s9 + $0x1d0] sm:$0xff]  ;;  %v1737_v44 = vld [vmem:[%s5713_s12 + $0x108] sm:$0xff] }
 0x424   :  { %3356 = vmatpush1.bf16.msra.mxu1 %v3355_v47  ;;  %v2766_v47 = vld [vmem:[%s5710_s9 + $0x1d8] sm:$0xff] }
 0x425   :  { %3320 = vmatpush1.bf16.msra.mxu0 %v3319_v48  ;;  %v2732_v48 = vld [vmem:[%s5710_s9 + $0xf0] sm:$0xff]  ;;  %3357 = vmatprep.subr.bf16.mxu1 %v3733_v35 }
 0x426   :  { %3321 = vmatprep.subr.bf16.mxu0 %v3733_v35  ;;  %v3358_v50 = vpack.c.bf16 %v2733_v49, %v2732_v48  ;;  %v3400_v48 = vpack.c.bf16 %v2766_v47, %v2765_v34  ;;  %v2767_v49 = vld [vmem:[%s5710_s9 + $0x1e0] sm:$0xff]  ;;  %v1711_v34 = vld [vmem:[%s5713_s12 + $0x38] sm:$0xff] }
 0x428   :  { %3359 = vmatpush1.bf16.msra.mxu1 %v3358_v50  ;;  %v2768_v50 = vld [vmem:[%s5710_s9 + $0x1e8] sm:$0xff] }
 0x429   :  { %3323 = vmatpush1.bf16.msra.mxu0 %v3322_v51  ;;  %v2734_v51 = vld [vmem:[%s5710_s9 + $0x100] sm:$0xff]  ;;  %3360 = vmatprep.subr.bf16.mxu1 %v3733_v35 }
 0x42a   :  { %3324 = vmatprep.subr.bf16.mxu0 %v3733_v35  ;;  %v3361_v53 = vpack.c.bf16 %v2735_v52, %v2734_v51  ;;  %v3403_v51 = vpack.c.bf16 %v2768_v50, %v2767_v49  ;;  %v2769_v52 = vld [vmem:[%s5710_s9 + $0x1f0] sm:$0xff]  ;;  %v1729_v49 = vld [vmem:[%s5713_s12 + $0xc8] sm:$0xff] }
 0x42c   :  { %3362 = vmatpush1.bf16.msra.mxu1 %v3361_v53  ;;  %v2770_v53 = vld [vmem:[%s5710_s9 + $0x1f8] sm:$0xff] }
 0x42d   :  { %3326 = vmatpush1.bf16.msra.mxu0 %v3325_v54  ;;  %v2736_v54 = vld [vmem:[%s5710_s9 + $0x110] sm:$0xff]  ;;  %3363 = vmatprep.subr.bf16.mxu1 %v3733_v35 }
 0x42e   :  { %3327 = vmatprep.subr.bf16.mxu0 %v3733_v35  ;;  %v3364_v56 = vpack.c.bf16 %v2737_v55, %v2736_v54  ;;  %v3406_v54 = vpack.c.bf16 %v2770_v53, %v2769_v52  ;;  %v2771_v55 = vld [vmem:[%s5710_s9 + $0x200] sm:$0xff]  ;;  %v1713_v53 = vld [vmem:[%s5713_s12 + $0x48] sm:$0xff] }
 0x42f   :  { %v1712_v52 = vld [vmem:[%s5713_s12 + $0x40] sm:$0xff] }
 0x430   :  { %3365 = vmatpush1.bf16.msra.mxu1 %v3364_v56  ;;  %v2772_v56 = vld [vmem:[%s5710_s9 + $0x208] sm:$0xff] }
 0x431   :  { %3329 = vmatpush1.bf16.msra.mxu0 %v3328_v57  ;;  %v2738_v57 = vld [vmem:[%s5710_s9 + $0x120] sm:$0xff]  ;;  %3366 = vmatprep.subr.bf16.mxu1 %v3733_v35 }
 0x432   :  { %3330 = vmatprep.subr.bf16.mxu0 %v3733_v35  ;;  %v3367_v59 = vpack.c.bf16 %v2739_v58, %v2738_v57  ;;  %v3409_v57 = vpack.c.bf16 %v2772_v56, %v2771_v55  ;;  %v2773_v58 = vld [vmem:[%s5710_s9 + $0x210] sm:$0xff]  ;;  %v1731_v55 = vld [vmem:[%s5713_s12 + $0xd8] sm:$0xff]  ;;  %v3438_v56 = vpack.c.bf16 %v1713_v53, %v1712_v52  ;;  %v1928_v52 = vld [vmem:[%s5716_s15 + $0x68] sm:$0xff] }
 0x434   :  { %3368 = vmatpush1.bf16.msra.mxu1 %v3367_v59  ;;  %v2774_v59 = vld [vmem:[%s5710_s9 + $0x218] sm:$0xff] }
 0x435   :  { %3332 = vmatpush1.bf16.msra.mxu0 %v3331_v60  ;;  %v2740_v60 = vld [vmem:[%s5710_s9 + $0x130] sm:$0xff]  ;;  %3369 = vmatprep.subr.bf16.mxu1 %v3733_v35 }
 0x436   :  { %3333 = vmatprep.subr.bf16.mxu0 %v3733_v35  ;;  %v3370_v61 = vpack.c.bf16 %v2741_v8, %v2740_v60  ;;  %v3412_v60 = vpack.c.bf16 %v2774_v59, %v2773_v58  ;;  %v2775_v8 = vld [vmem:[%s5710_s9 + $0x220] sm:$0xff]  ;;  %v1714_v58 = vld [vmem:[%s5713_s12 + $0x50] sm:$0xff]  ;;  %v1715_v59 = vld [vmem:[%s5713_s12 + $0x58] sm:$0xff] }
 0x438   :  { %3371 = vmatpush1.bf16.msra.mxu1 %v3370_v61  ;;  %v2776_v61 = vld [vmem:[%s5710_s9 + $0x228] sm:$0xff] }
 0x439   :  { %3335 = vmatpush1.bf16.msra.mxu0 %v3334_v62  ;;  %v2742_v62 = vld [vmem:[%s5710_s9 + $0x140] sm:$0xff]  ;;  %3372 = vmatprep.subr.bf16.mxu1 %v3733_v35 }
 0x43a   :  { %3336 = vmatprep.subr.bf16.mxu0 %v3733_v35  ;;  %v3373_v1 = vpack.c.bf16 %v2743_v63, %v2742_v62  ;;  %v3415_v62 = vpack.c.bf16 %v2776_v61, %v2775_v8  ;;  %v2777_v63 = vld [vmem:[%s5710_s9 + $0x230] sm:$0xff]  ;;  %v1733_v8 = vld [vmem:[%s5713_s12 + $0xe8] sm:$0xff]  ;;  %v3442_v61 = vpack.c.bf16 %v1715_v59, %v1714_v58 }
 0x43b   :  { %v1932_v58 = vld [vmem:[%s5716_s15 + $0x88] sm:$0xff] }
 0x43c   :  { %3374 = vmatpush1.bf16.msra.mxu1 %v3373_v1  ;;  %v2778_v1 = vld [vmem:[%s5710_s9 + $0x238] sm:$0xff] }
 0x43d   :  { %3338 = vmatpush1.bf16.msra.mxu0 %v3337_v3  ;;  %v2744_v3 = vld [vmem:[%s5710_s9 + $0x150] sm:$0xff]  ;;  %3375 = vmatprep.subr.bf16.mxu1 %v3733_v35 }
 0x43e   :  { %3339 = vmatprep.subr.bf16.mxu0 %v3733_v35  ;;  %v3376_v5 = vpack.c.bf16 %v2745_v4, %v2744_v3  ;;  %v3418_v3 = vpack.c.bf16 %v2778_v1, %v2777_v63  ;;  %v2752_v4 = vld [vmem:[%s5711_s10 + $0x1] ss:$0 sm:$0xff]  ;;  %v1717_v1 = vld [vmem:[%s5713_s12 + $0x68] sm:$0xff] }
 0x43f   :  { %v1716_v63 = vld [vmem:[%s5713_s12 + $0x60] sm:$0xff] }
 0x440   :  { %3377 = vmatpush1.bf16.msra.mxu1 %v3376_v5  ;;  %v2754_v5 = vld [vmem:[%s5712_s11 + $0x1] ss:$0 sm:$0xff] }
 0x441   :  { %3341 = vmatpush1.bf16.msra.mxu0 %v3340_v16  ;;  %v2746_v16 = vld [vmem:[%s5710_s9 + $0x160] sm:$0xff]  ;;  %3378 = vmatprep.subr.bf16.mxu1 %v3733_v35 }
 0x442   :  { %3342 = vmatprep.subr.bf16.mxu0 %v3733_v35  ;;  %v3379_v9 = vpack.c.bf16 %v2747_v6, %v2746_v16 }
 0x444   :  { %3380 = vmatpush1.bf16.msra.mxu1 %v3379_v9 }
 0x445   :  { %3344 = vmatpush1.bf16.msra.mxu0 %v3343_v10  ;;  %v2748_v10 = vld [vmem:[%s5710_s9 + $0x170] sm:$0xff]  ;;  %3381 = vmatprep.subr.bf16.mxu1 %v3733_v35 }
 0x446   :  { %3345 = vmatprep.subr.bf16.mxu0 %v3733_v35  ;;  %v3382_v14 = vpack.c.bf16 %v2749_v12, %v2748_v10 }
 0x448   :  { %3383 = vmatpush1.bf16.msra.mxu1 %v3382_v14 }
 0x449   :  { %3347 = vmatpush1.bf16.msra.mxu0 %v3346_v0  ;;  %v2723_v0 = vld [vmem:[%s5711_s10] ss:$0 sm:$0xff] }
 0x44a   :  { %3384 = vmatprep.subr.bf16.mxu0 %v3733_v35 }
 0x4bf   :  { %v2939_v15 = vpop.f32.mrb[18].mxu0 }
 0x4c0   :  { %v2940_v17 = vpop.f32.mrb[19].mxu0 }
 0x4c1   :  { %v2941_v2 = vadd.f32 %v2940_v17, %v2939_v15  ;;  %v2725_v15 = vld [vmem:[%s5712_s11] ss:$0 sm:$0xff] }
 0x4c3   :  { %v1164_v21 = vadd.f32 %v2941_v2, %v2720_v18 }
 0x4df   :  { %v2974_v19 = vpop.f32.mrb[20].mxu0 }
 0x4e0   :  { %v2975_v20 = vpop.f32.mrb[21].mxu0 }
 0x4e1   :  { %v2976_v22 = vadd.f32 %v2975_v20, %v2974_v19 }
 0x4e3   :  { %v1234_v23 = vadd.f32 %v2976_v22, %v1164_v21 }
 0x4ef   :  { %v1303_v25 = vpop.f32.mrb[22].mxu0 }
 0x4f0   :  { %v1304_v26 = vadd.f32 %v1303_v25, %v1234_v23  ;;  %v3044_v27 = vpop.f32.mrb[23].mxu0 }
 0x4f1   :  { %v2755_v27 = vld [vmem:[%s5710_s9 + $0x180] sm:$0xff] }
 0x4f2   :  { %vm1307_vm8 = vcmp.ge.f32.partialorder %v1304_v26, 0.0  ;;  %v1314_v28 = vmul.f32 %v2722_v24, %v1304_v26 }
 0x4f4   :  { %v4726_v29 = vsel %vm1307_vm8, %v1304_v26, %v1314_v28  ;;  %v2756_v28 = vld [vmem:[%s5710_s9 + $0x188] sm:$0xff] }
 0x4f5   :  { %1359 = vrot.lane.b32.xlu1 %v4726_v29, %s3732_s5  ;;  %v1351_v31 = vrot.slane %v4726_v29, 1  ;;  %v1344_v33 = vrot.slane %v4726_v29, 7 }
 0x4f7   :  { %v1357_v32 = vmul.f32 %v4728_v30, %v1351_v31  ;;  %v1350_v37 = vmul.f32 %v4736_v36, %v1344_v33  ;;  %v2757_v31 = vld [vmem:[%s5710_s9 + $0x190] sm:$0xff]  ;;  %v2758_v33 = vld [vmem:[%s5710_s9 + $0x198] sm:$0xff] }
 0x4f9   :  { %2724 = vmatprep.mubr.msk.f32.mxu0 %vm352_vm1, %v1357_v32  ;;  %v3385_v32 = vpack.c.bf16 %v2756_v28, %v2755_v27  ;;  %v1706_v27 = vld [vmem:[%s5713_s12 + $0x10] sm:$0xff]  ;;  %v1707_v28 = vld [vmem:[%s5713_s12 + $0x18] sm:$0xff] }
 0x567   :  { %v1360_v38 = vpop.permute.xlu1 %1359 }
 0x568   :  { %v1362_v39 = vsel %vm352_vm1, %v1350_v37, %v1360_v38  ;;  %v3388_v37 = vpack.c.bf16 %v2758_v33, %v2757_v31  ;;  %v2759_v38 = vld [vmem:[%s5710_s9 + $0x1a0] sm:$0xff]  ;;  %v3426_v33 = vpack.c.bf16 %v1707_v28, %v1706_v27 }
 0x569   :  { %1437 = vmatmul.mubr.f32.vlgmr.msra.gmra.mrb[24].mxu0 %v1362_v39  ;;  %v2760_v39 = vld [vmem:[%s5710_s9 + $0x1a8] sm:$0xff]  ;;  %v1724_v31 = vld [vmem:[%s5713_s12 + $0xa0] sm:$0xff] }
 0x56a   :  { %3386 = vmatpush1.bf16.msra.mxu0 %v3385_v32  ;;  %v3391_v40 = vpack.c.bf16 %v2760_v39, %v2759_v38  ;;  %v1725_v32 = vld [vmem:[%s5713_s12 + $0xa8] sm:$0xff]  ;;  %v1708_v38 = vld [vmem:[%s5713_s12 + $0x20] sm:$0xff] }
 0x56b   :  { %3387 = vmatprep.subr.bf16.mxu0 %v3733_v35  ;;  %v1709_v39 = vld [vmem:[%s5713_s12 + $0x28] sm:$0xff] }
 0x56c   :  { %v3430_v42 = vpack.c.bf16 %v1709_v39, %v1708_v38  ;;  %v1918_v38 = vld [vmem:[%s5716_s15 + $0x18] sm:$0xff] }
 0x56e   :  { %3389 = vmatpush1.bf16.msra.mxu0 %v3388_v37  ;;  %v3428_v37 = vpack.c.bf16 %v1725_v32, %v1724_v31  ;;  %v1916_v32 = vld [vmem:[%s5716_s15 + $0x8] sm:$0xff] }
 0x56f   :  { %3390 = vmatprep.subr.bf16.mxu0 %v3733_v35 }
 0x572   :  { %3392 = vmatpush1.bf16.msra.mxu0 %v3391_v40  ;;  %v1726_v40 = vld [vmem:[%s5713_s12 + $0xb0] sm:$0xff] }
 0x573   :  { %3393 = vmatprep.subr.bf16.mxu0 %v3733_v35  ;;  %v3432_v45 = vpack.c.bf16 %v1727_v41, %v1726_v40  ;;  %v1919_v40 = vld [vmem:[%s5716_s15 + $0x20] sm:$0xff]  ;;  %v1920_v41 = vld [vmem:[%s5716_s15 + $0x28] sm:$0xff] }
 0x576   :  { %3395 = vmatpush1.bf16.msra.mxu0 %v3394_v43  ;;  %v1736_v43 = vld [vmem:[%s5713_s12 + $0x100] sm:$0xff] }
 0x577   :  { %3396 = vmatprep.subr.bf16.mxu0 %v3733_v35  ;;  %v3453_v47 = vpack.c.bf16 %v1737_v44, %v1736_v43  ;;  %v1921_v43 = vld [vmem:[%s5716_s15 + $0x30] sm:$0xff]  ;;  %v1922_v44 = vld [vmem:[%s5716_s15 + $0x38] sm:$0xff] }
 0x57a   :  { %3398 = vmatpush1.bf16.msra.mxu0 %v3397_v46  ;;  %v1710_v46 = vld [vmem:[%s5713_s12 + $0x30] sm:$0xff] }
 0x57b   :  { %3399 = vmatprep.subr.bf16.mxu0 %v3733_v35  ;;  %v3434_v50 = vpack.c.bf16 %v1711_v34, %v1710_v46  ;;  %v1923_v46 = vld [vmem:[%s5716_s15 + $0x40] sm:$0xff]  ;;  %v1924_v34 = vld [vmem:[%s5716_s15 + $0x48] sm:$0xff] }
 0x57e   :  { %3401 = vmatpush1.bf16.msra.mxu0 %v3400_v48  ;;  %v1728_v48 = vld [vmem:[%s5713_s12 + $0xc0] sm:$0xff] }
 0x57f   :  { %3402 = vmatprep.subr.bf16.mxu0 %v3733_v35 }
 0x582   :  { %3404 = vmatpush1.bf16.msra.mxu0 %v3403_v51  ;;  %v3436_v51 = vpack.c.bf16 %v1729_v49, %v1728_v48  ;;  %v1925_v48 = vld [vmem:[%s5716_s15 + $0x50] sm:$0xff]  ;;  %v1926_v49 = vld [vmem:[%s5716_s15 + $0x58] sm:$0xff] }
 0x583   :  { %3405 = vmatprep.subr.bf16.mxu0 %v3733_v35 }
 0x586   :  { %3407 = vmatpush1.bf16.msra.mxu0 %v3406_v54  ;;  %v1730_v54 = vld [vmem:[%s5713_s12 + $0xd0] sm:$0xff] }
 0x587   :  { %3408 = vmatprep.subr.bf16.mxu0 %v3733_v35 }
 0x58a   :  { %3410 = vmatpush1.bf16.msra.mxu0 %v3409_v57  ;;  %v3440_v57 = vpack.c.bf16 %v1731_v55, %v1730_v54  ;;  %v1929_v54 = vld [vmem:[%s5716_s15 + $0x70] sm:$0xff]  ;;  %v1930_v55 = vld [vmem:[%s5716_s15 + $0x78] sm:$0xff] }
 0x58b   :  { %3411 = vmatprep.subr.bf16.mxu0 %v3733_v35 }
 0x58e   :  { %3413 = vmatpush1.bf16.msra.mxu0 %v3412_v60  ;;  %v1732_v60 = vld [vmem:[%s5713_s12 + $0xe0] sm:$0xff] }
 0x58f   :  { %3414 = vmatprep.subr.bf16.mxu0 %v3733_v35 }
 0x592   :  { %3416 = vmatpush1.bf16.msra.mxu0 %v3415_v62  ;;  %v3444_v62 = vpack.c.bf16 %v1733_v8, %v1732_v60  ;;  %v1933_v60 = vld [vmem:[%s5716_s15 + $0x90] sm:$0xff]  ;;  %v1934_v8 = vld [vmem:[%s5716_s15 + $0x98] sm:$0xff] }
 0x593   :  { %3417 = vmatprep.subr.bf16.mxu0 %v3733_v35 }
 0x596   :  { %3419 = vmatpush1.bf16.msra.mxu0 %v3418_v3  ;;  %v3446_v3 = vpack.c.bf16 %v1717_v1, %v1716_v63  ;;  %v1936_v63 = vld [vmem:[%s5716_s15 + $0xa8] sm:$0xff] }
 0x597   :  { %3452 = vmatprep.subr.bf16.mxu0 %v3733_v35 }
 0x63c   :  { %v1438_v17 = vpop.f32.mrb[24].mxu0 }
 0x63d   :  { %v1439_v2 = vadd.f32 %v2723_v0, %v1438_v17  ;;  %v1440_v18 = vpop.f32.mrb[25].mxu0 }
 0x63f   :  { %v1449_v19 = vmul.f32 %v2725_v15, %v1439_v2  ;;  %vm1442_vm9 = vcmp.ge.f32.partialorder %v1439_v2, 0.0 }
 0x641   :  { %v1450_v20 = vsel %vm1442_vm9, %v1439_v2, %v1449_v19  ;;  %v1720_v19 = vld [vmem:[%s5713_s12 + $0x80] sm:$0xff] }
 0x642   :  { %1485 = vrot.lane.b32.xlu0 %v1450_v20, %s3732_s5  ;;  %v1482_v21 = vrot.slane %v1450_v20, 1  ;;  %v1480_v23 = vrot.slane %v1450_v20, 7  ;;  %v1721_v20 = vld [vmem:[%s5713_s12 + $0x88] sm:$0xff] }
 0x644   :  { %v1483_v22 = vmul.f32 %v1482_v21, %v4728_v30  ;;  %v1481_v24 = vmul.f32 %v1480_v23, %v4736_v36  ;;  %v1704_v21 = vld [vmem:[%s5713_s12] sm:$0xff]  ;;  %v1705_v23 = vld [vmem:[%s5713_s12 + $0x8] sm:$0xff] }
 0x646   :  { %2753 = vmatprep.mubr.msk.f32.mxu1 %vm352_vm1, %v1483_v22  ;;  %v3420_v22 = vpack.c.bf16 %v1721_v20, %v1720_v19 }
 0x648   :  { %3421 = vmatprep.subr.bf16.mxu1 %v3420_v22 }
 0x6b4   :  { %v1486_v25 = vpop.permute.xlu0 %1485 }
 0x6b5   :  { %v1488_v26 = vsel %vm352_vm1, %v1481_v24, %v1486_v25  ;;  %v1723_v24 = vld [vmem:[%s5713_s12 + $0x98] sm:$0xff]  ;;  %v3422_v25 = vpack.c.bf16 %v1705_v23, %v1704_v21 }
 0x6b6   :  { %1563 = vmatmul.mubr.f32.vlgmr.msra.gmra.mrb[4].mxu1 %v1488_v26 }
 0x6b7   :  { %3423 = vmatpush3.bf16.msra.mxu1 %v3422_v25 }
 0x789   :  { %v1564_v16 = vpop.f32.mrb[4].mxu1 }
 0x78a   :  { %v1565_v6 = vadd.f32 %v2752_v4, %v1564_v16  ;;  %v1566_v9 = vpop.f32.mrb[5].mxu1  ;;  %v1738_v4 = vld [vmem:[%s5713_s12 + $0x110] sm:$0xff] }
 0x78b   :  { %v1735_v9 = vld [vmem:[%s5713_s12 + $0xf8] sm:$0xff] }
 0x78c   :  { %v1575_v10 = vmul.f32 %v2754_v5, %v1565_v6  ;;  %vm1568_vm10 = vcmp.ge.f32.partialorder %v1565_v6, 0.0  ;;  %v1739_v5 = vld [vmem:[%s5713_s12 + $0x118] sm:$0xff] }
 0x78d   :  { %v3456_v16 = vpack.c.bf16 %v1739_v5, %v1738_v4  ;;  %v1938_v4 = vld [vmem:[%s5716_s15 + $0xb8] sm:$0xff] }
 0x78e   :  { %v1576_v12 = vsel %vm1568_vm10, %v1565_v6, %v1575_v10  ;;  %v1734_v6 = vld [vmem:[%s5713_s12 + $0xf0] sm:$0xff] }
 0x78f   :  { %1611 = vrot.lane.b32.xlu1 %v1576_v12, %s3732_s5  ;;  %v1608_v14 = vrot.slane %v1576_v12, 1  ;;  %v1606_v15 = vrot.slane %v1576_v12, 7  ;;  %v3448_v10 = vpack.c.bf16 %v1735_v9, %v1734_v6  ;;  %v1718_v12 = vld [vmem:[%s5713_s12 + $0x70] sm:$0xff] }
 0x791   :  { %v1609_v0 = vmul.f32 %v1608_v14, %v4728_v30  ;;  %v1607_v17 = vmul.f32 %v1606_v15, %v4736_v36  ;;  %v1719_v14 = vld [vmem:[%s5713_s12 + $0x78] sm:$0xff]  ;;  %v2781_v15 = vld [vmem:[%s5711_s10 + $0x2] ss:$0 sm:$0xff] }
 0x793   :  { %2782 = vmatprep.mubr.msk.f32.mxu0 %vm352_vm1, %v1609_v0  ;;  %v3450_v0 = vpack.c.bf16 %v1719_v14, %v1718_v12 }
 0x801   :  { %v1612_v2 = vpop.permute.xlu1 %1611 }
 0x802   :  { %v1614_v18 = vsel %vm352_vm1, %v1607_v17, %v1612_v2  ;;  %v2783_v17 = vld [vmem:[%s5712_s11 + $0x2] ss:$0 sm:$0xff] }
 0x803   :  { %1689 = vmatmul.mubr.f32.vlgmr.msra.gmra.mrb[26].mxu0 %v1614_v18 }
 0x804   :  { %3053 = vmatprep.mubr.msk.f32.mxu0 %vm3735_vm7, %v3731_v7  ;;  %v1722_v7 = vld [vmem:[%s5713_s12 + $0x90] sm:$0xff]  ;;  %3454 = vmatpush3.bf16.msra.mxu0 %v3453_v47  ;;  %s3736_s12 = smov 96   ;;  %v3471_v47 = vpack.c.bf16 %v1924_v34, %v1923_v46  ;;  %v2802_v46 = vld [vmem:[%s5716_s15 + $0x120] sm:$0xff]  ;;  %v2803_v34 = vld [vmem:[%s5716_s15 + $0x128] sm:$0xff] }
 0x805   :  { %v3424_v26 = vpack.c.bf16 %v1723_v24, %v1722_v7  ;;  %3455 = vmatprep.subr.bf16.mxu0 %v3733_v35 }
 0x807   :  { %3425 = vmatprep.subr.bf16.mxu1 %v3424_v26 }
 0x808   :  { %3427 = vmatpush3.bf16.msra.mxu1 %v3426_v33  ;;  %3457 = vmatpush3.bf16.msra.mxu0 %v3456_v16  ;;  %v1917_v33 = vld [vmem:[%s5716_s15 + $0x10] sm:$0xff] }
 0x809   :  { %3429 = vmatprep.subr.bf16.mxu1 %v3428_v37  ;;  %3458 = vmatprep.subr.bf16.mxu0 %v3733_v35  ;;  %v3462_v39 = vpack.c.bf16 %v1918_v38, %v1917_v33  ;;  %v2797_v38 = vld [vmem:[%s5716_s15 + $0xf8] sm:$0xff] }
 0x80c   :  { %3431 = vmatpush3.bf16.msra.mxu1 %v3430_v42  ;;  %v3465_v42 = vpack.c.bf16 %v1920_v41, %v1919_v40  ;;  %v2798_v40 = vld [vmem:[%s5716_s15 + $0x100] sm:$0xff]  ;;  %v2799_v41 = vld [vmem:[%s5716_s15 + $0x108] sm:$0xff] }
 0x80d   :  { %3433 = vmatprep.subr.bf16.mxu1 %v3432_v45  ;;  %v3468_v45 = vpack.c.bf16 %v1922_v44, %v1921_v43  ;;  %v2800_v43 = vld [vmem:[%s5716_s15 + $0x110] sm:$0xff]  ;;  %v2801_v44 = vld [vmem:[%s5716_s15 + $0x118] sm:$0xff] }
 0x810   :  { %3435 = vmatpush3.bf16.msra.mxu1 %v3434_v50  ;;  %v3474_v50 = vpack.c.bf16 %v1926_v49, %v1925_v48  ;;  %v2804_v48 = vld [vmem:[%s5716_s15 + $0x130] sm:$0xff]  ;;  %v2805_v49 = vld [vmem:[%s5716_s15 + $0x138] sm:$0xff] }
 0x811   :  { %3437 = vmatprep.subr.bf16.mxu1 %v3436_v51  ;;  %v1927_v51 = vld [vmem:[%s5716_s15 + $0x60] sm:$0xff] }
 0x812   :  { %v3477_v53 = vpack.c.bf16 %v1928_v52, %v1927_v51  ;;  %v2806_v51 = vld [vmem:[%s5716_s15 + $0x140] sm:$0xff]  ;;  %v2807_v52 = vld [vmem:[%s5716_s15 + $0x148] sm:$0xff] }
 0x814   :  { %3439 = vmatpush3.bf16.msra.mxu1 %v3438_v56  ;;  %v3480_v56 = vpack.c.bf16 %v1930_v55, %v1929_v54  ;;  %v2808_v54 = vld [vmem:[%s5716_s15 + $0x150] sm:$0xff]  ;;  %v2809_v55 = vld [vmem:[%s5716_s15 + $0x158] sm:$0xff] }
 0x815   :  { %3441 = vmatprep.subr.bf16.mxu1 %v3440_v57  ;;  %v1931_v57 = vld [vmem:[%s5716_s15 + $0x80] sm:$0xff] }
 0x816   :  { %v3483_v59 = vpack.c.bf16 %v1932_v58, %v1931_v57  ;;  %v2810_v57 = vld [vmem:[%s5716_s15 + $0x160] sm:$0xff]  ;;  %v2811_v58 = vld [vmem:[%s5716_s15 + $0x168] sm:$0xff] }
 0x818   :  { %3443 = vmatpush3.bf16.msra.mxu1 %v3442_v61  ;;  %v3486_v61 = vpack.c.bf16 %v1934_v8, %v1933_v60  ;;  %v2812_v60 = vld [vmem:[%s5716_s15 + $0x170] sm:$0xff]  ;;  %v2813_v8 = vld [vmem:[%s5716_s15 + $0x178] sm:$0xff] }
 0x819   :  { %3445 = vmatprep.subr.bf16.mxu1 %v3444_v62  ;;  %v1935_v62 = vld [vmem:[%s5716_s15 + $0xa0] sm:$0xff] }
 0x81a   :  { %v3489_v1 = vpack.c.bf16 %v1936_v63, %v1935_v62  ;;  %v2787_v62 = vld [vmem:[%s5717_s16] ss:$0 sm:$0xff] }
 0x81b   :  { %v2789_v63 = vld [vmem:[%s5718_s17] ss:$0 sm:$0xff] }
 0x81c   :  { %3447 = vmatpush3.bf16.msra.mxu1 %v3446_v3  ;;  %v1937_v3 = vld [vmem:[%s5716_s15 + $0xb0] sm:$0xff] }
 0x81d   :  { %3449 = vmatprep.subr.bf16.mxu1 %v3448_v10  ;;  %v3492_v5 = vpack.c.bf16 %v1938_v4, %v1937_v3  ;;  %v2784_v10 = vld [vmem:[%s5714_s13] ss:$0 sm:$0xff] }
 0x820   :  { %3451 = vmatpush3.bf16.msra.mxu1 %v3450_v0 }
 0x821   :  { %3494 = vmatprep.subr.bf16.mxu1 %v3733_v35 }
 0x8d6   :  { %v1690_v2 = vpop.f32.mrb[26].mxu0 }
 0x8d7   :  { %v1691_v18 = vadd.f32 %v2781_v15, %v1690_v2  ;;  %v1692_v19 = vpop.f32.mrb[27].mxu0  ;;  %v2786_v15 = vld [vmem:[%s5715_s14] ss:$0 sm:$0xff] }
 0x8d9   :  { %vm1694_vm11 = vcmp.ge.f32.partialorder %v1691_v18, 0.0  ;;  %v1701_v20 = vmul.f32 %v2783_v17, %v1691_v18 }
 0x8db   :  { %v1702_v21 = vsel %vm1694_vm11, %v1691_v18, %v1701_v20 }
 0x8dc   :  { %v1703_v22 = vsel %vm352_vm1, %v1702_v21, %v4726_v29  ;;  %v1915_v29 = vld [vmem:[%s5716_s15] sm:$0xff] }
 0x8dd   :  { %1747 = vrot.lane.b32.xlu0 %v1703_v22, %s3736_s12  ;;  %v1744_v23 = vrot.slane %v1703_v22, 1  ;;  %v1742_v24 = vrot.slane %v1703_v22, 7  ;;  %v3459_v37 = vpack.c.bf16 %v1916_v32, %v1915_v29  ;;  %v2794_v29 = vld [vmem:[%s5716_s15 + $0xe0] sm:$0xff]  ;;  %v2795_v32 = vld [vmem:[%s5716_s15 + $0xe8] sm:$0xff] }
 0x8de   :  { %v3501_v33 = vpack.c.bf16 %v2795_v32, %v2794_v29  ;;  %v2830_v29 = vld [vmem:[%s5716_s15 + $0x1d8] sm:$0xff] }
 0x8df   :  { %v1745_v7 = vmul.f32 %v1744_v23, %v4728_v30  ;;  %v1743_v26 = vmul.f32 %v1742_v24, %v4736_v36  ;;  %v2790_v24 = vld [vmem:[%s5716_s15 + $0xc0] sm:$0xff] }
 0x8e1   :  { %1751 = vrot.lane.b32.xlu1 %v1745_v7, %s3732_s5 }
 0x94f   :  { %v1748_v25 = vpop.permute.xlu0 %1747 }
 0x950   :  { %v1755_v31 = vsel %vm1754_vm12, %v1743_v26, %v1748_v25  ;;  %v2792_v26 = vld [vmem:[%s5716_s15 + $0xd0] sm:$0xff] }
 0x953   :  { %v1752_v27 = vpop.permute.xlu1 %1751 }
 0x954   :  { %3054 = vmatmul.mubr.msk.f32.vlgmr.msra.gmra.mrb[28].mxu0 %vm84_vm0, %v1752_v27  ;;  %v1756_v28 = vsel %vm352_vm1, %v1748_v25, %v1752_v27  ;;  %v2791_v25 = vld [vmem:[%s5716_s15 + $0xc8] sm:$0xff] }
 0x955   :  { %1829 = vmatprep.mubr.f32.mxu1 %v1756_v28  ;;  %3460 = vmatpush1.bf16.msra.mxu0 %v3459_v37  ;;  %v3495_v27 = vpack.c.bf16 %v2791_v25, %v2790_v24  ;;  %v2793_v28 = vld [vmem:[%s5716_s15 + $0xd8] sm:$0xff]  ;;  %v2796_v37 = vld [vmem:[%s5716_s15 + $0xf0] sm:$0xff] }
 0x956   :  { %1830 = vmatmul.mubr.f32.vlgmr.msra.gmra.mrb[6].mxu1 %v1755_v31  ;;  %3461 = vmatprep.subr.bf16.mxu0 %v3733_v35  ;;  %v3498_v31 = vpack.c.bf16 %v2793_v28, %v2792_v26  ;;  %v2826_v24 = vld [vmem:[%s5716_s15 + $0x1b8] sm:$0xff]  ;;  %v2827_v26 = vld [vmem:[%s5716_s15 + $0x1c0] sm:$0xff] }
 0x957   :  { %3496 = vmatpush1.bf16.msra.mxu1 %v3495_v27  ;;  %v2828_v27 = vld [vmem:[%s5716_s15 + $0x1c8] sm:$0xff] }
 0x958   :  { %3497 = vmatprep.subr.bf16.mxu1 %v3733_v35  ;;  %v3543_v28 = vpack.c.bf16 %v2828_v27, %v2827_v26  ;;  %v2863_v26 = vld [vmem:[%s5716_s15 + $0x2b8] sm:$0xff] }
 0x959   :  { %3463 = vmatpush1.bf16.msra.mxu0 %v3462_v39  ;;  %v3504_v39 = vpack.c.bf16 %v2797_v38, %v2796_v37  ;;  %v2832_v37 = vld [vmem:[%s5716_s15 + $0x1e8] sm:$0xff] }
 0x95a   :  { %3464 = vmatprep.subr.bf16.mxu0 %v3733_v35 }
 0x95b   :  { %3499 = vmatpush1.bf16.msra.mxu1 %v3498_v31  ;;  %v2829_v31 = vld [vmem:[%s5716_s15 + $0x1d0] sm:$0xff] }
 0x95c   :  { %3500 = vmatprep.subr.bf16.mxu1 %v3733_v35  ;;  %v3546_v32 = vpack.c.bf16 %v2830_v29, %v2829_v31  ;;  %v2865_v31 = vld [vmem:[%s5716_s15 + $0x2c8] sm:$0xff] }
 0x95d   :  { %3466 = vmatpush1.bf16.msra.mxu0 %v3465_v42  ;;  %v3507_v42 = vpack.c.bf16 %v2799_v41, %v2798_v40  ;;  %v2834_v40 = vld [vmem:[%s5716_s15 + $0x1f8] sm:$0xff] }
 0x95e   :  { %3467 = vmatprep.subr.bf16.mxu0 %v3733_v35 }
 0x95f   :  { %3502 = vmatpush1.bf16.msra.mxu1 %v3501_v33  ;;  %v2831_v33 = vld [vmem:[%s5716_s15 + $0x1e0] sm:$0xff] }
 0x960   :  { %3503 = vmatprep.subr.bf16.mxu1 %v3733_v35  ;;  %v3549_v38 = vpack.c.bf16 %v2832_v37, %v2831_v33  ;;  %v2867_v33 = vld [vmem:[%s5716_s15 + $0x2d8] sm:$0xff] }
 0x961   :  { %3469 = vmatpush1.bf16.msra.mxu0 %v3468_v45  ;;  %v3510_v45 = vpack.c.bf16 %v2801_v44, %v2800_v43  ;;  %v2836_v43 = vld [vmem:[%s5716_s15 + $0x208] sm:$0xff] }
 0x962   :  { %3470 = vmatprep.subr.bf16.mxu0 %v3733_v35 }
 0x963   :  { %3505 = vmatpush1.bf16.msra.mxu1 %v3504_v39  ;;  %v2833_v39 = vld [vmem:[%s5716_s15 + $0x1f0] sm:$0xff] }
 0x964   :  { %3506 = vmatprep.subr.bf16.mxu1 %v3733_v35  ;;  %v3552_v41 = vpack.c.bf16 %v2834_v40, %v2833_v39  ;;  %v2869_v39 = vld [vmem:[%s5716_s15 + $0x2e8] sm:$0xff] }
 0x965   :  { %3472 = vmatpush1.bf16.msra.mxu0 %v3471_v47  ;;  %v3513_v47 = vpack.c.bf16 %v2803_v34, %v2802_v46  ;;  %v2838_v46 = vld [vmem:[%s5716_s15 + $0x218] sm:$0xff] }
 0x966   :  { %3473 = vmatprep.subr.bf16.mxu0 %v3733_v35 }
 0x967   :  { %3508 = vmatpush1.bf16.msra.mxu1 %v3507_v42  ;;  %v2835_v42 = vld [vmem:[%s5716_s15 + $0x200] sm:$0xff] }
 0x968   :  { %3509 = vmatprep.subr.bf16.mxu1 %v3733_v35  ;;  %v3555_v44 = vpack.c.bf16 %v2836_v43, %v2835_v42  ;;  %v2871_v42 = vld [vmem:[%s5716_s15 + $0x2f8] sm:$0xff] }
 0x969   :  { %3475 = vmatpush1.bf16.msra.mxu0 %v3474_v50  ;;  %v3516_v50 = vpack.c.bf16 %v2805_v49, %v2804_v48  ;;  %v2840_v48 = vld [vmem:[%s5716_s15 + $0x228] sm:$0xff] }
 0x96a   :  { %3476 = vmatprep.subr.bf16.mxu0 %v3733_v35 }
 0x96b   :  { %3511 = vmatpush1.bf16.msra.mxu1 %v3510_v45  ;;  %v2837_v45 = vld [vmem:[%s5716_s15 + $0x210] sm:$0xff] }
 0x96c   :  { %3512 = vmatprep.subr.bf16.mxu1 %v3733_v35  ;;  %v3558_v34 = vpack.c.bf16 %v2838_v46, %v2837_v45  ;;  %v2847_v45 = vld [vmem:[%s5718_s17 + $0x2] ss:$0 sm:$0xff] }
 0x96d   :  { %3478 = vmatpush1.bf16.msra.mxu0 %v3477_v53  ;;  %v3519_v53 = vpack.c.bf16 %v2807_v52, %v2806_v51  ;;  %v2842_v51 = vld [vmem:[%s5716_s15 + $0x238] sm:$0xff] }
 0x96e   :  { %3479 = vmatprep.subr.bf16.mxu0 %v3733_v35 }
 0x96f   :  { %3514 = vmatpush1.bf16.msra.mxu1 %v3513_v47  ;;  %v2839_v47 = vld [vmem:[%s5716_s15 + $0x220] sm:$0xff] }
 0x970   :  { %3515 = vmatprep.subr.bf16.mxu1 %v3733_v35  ;;  %v3561_v49 = vpack.c.bf16 %v2840_v48, %v2839_v47 }
 0x971   :  { %3481 = vmatpush1.bf16.msra.mxu0 %v3480_v56  ;;  %v3522_v56 = vpack.c.bf16 %v2809_v55, %v2808_v54  ;;  %v2818_v54 = vld [vmem:[%s5718_s17 + $0x1] ss:$0 sm:$0xff] }
 0x972   :  { %3482 = vmatprep.subr.bf16.mxu0 %v3733_v35 }
 0x973   :  { %3517 = vmatpush1.bf16.msra.mxu1 %v3516_v50  ;;  %v2841_v50 = vld [vmem:[%s5716_s15 + $0x230] sm:$0xff] }
 0x974   :  { %3518 = vmatprep.subr.bf16.mxu1 %v3733_v35  ;;  %v3564_v52 = vpack.c.bf16 %v2842_v51, %v2841_v50 }
 0x975   :  { %3484 = vmatpush1.bf16.msra.mxu0 %v3483_v59  ;;  %v3525_v59 = vpack.c.bf16 %v2811_v58, %v2810_v57 }
 0x976   :  { %3485 = vmatprep.subr.bf16.mxu0 %v3733_v35 }
 0x977   :  { %3520 = vmatpush1.bf16.msra.mxu1 %v3519_v53  ;;  %v2816_v53 = vld [vmem:[%s5717_s16 + $0x1] ss:$0 sm:$0xff] }
 0x978   :  { %3521 = vmatprep.subr.bf16.mxu1 %v3733_v35 }
 0x979   :  { %3487 = vmatpush1.bf16.msra.mxu0 %v3486_v61  ;;  %v3528_v61 = vpack.c.bf16 %v2813_v8, %v2812_v60 }
 0x97a   :  { %3488 = vmatprep.subr.bf16.mxu0 %v3733_v35 }
 0x97b   :  { %3523 = vmatpush1.bf16.msra.mxu1 %v3522_v56 }
 0x97c   :  { %3524 = vmatprep.subr.bf16.mxu1 %v3733_v35 }
 0x97d   :  { %3490 = vmatpush1.bf16.msra.mxu0 %v3489_v1 }
 0x97e   :  { %3491 = vmatprep.subr.bf16.mxu0 %v3733_v35 }
 0x97f   :  { %3526 = vmatpush1.bf16.msra.mxu1 %v3525_v59 }
 0x980   :  { %3527 = vmatprep.subr.bf16.mxu1 %v3733_v35 }
 0x981   :  { %3493 = vmatpush1.bf16.msra.mxu0 %v3492_v5 }
 0x982   :  { %3530 = vmatprep.subr.bf16.mxu0 %v3733_v35 }
 0x983   :  { %3529 = vmatpush1.bf16.msra.mxu1 %v3528_v61 }
 0x984   :  { %3566 = vmatprep.subr.bf16.mxu1 %v3733_v35 }
 0xa27   :  { %v1901_v16 = vpop.f32.mrb[28].mxu0 }
 0xa28   :  { %v3055_v6 = vpop.f32.mrb[29].mxu0 }
 0xa29   :  { %v3018_v9 = vpop.f32.mrb[6].mxu1 }
 0xa2a   :  { %v3019_v12 = vpop.f32.mrb[7].mxu1 }
 0xa2b   :  { %v3020_v14 = vadd.f32 %v3019_v12, %v3018_v9 }
 0xa2d   :  { %v1832_v0 = vadd.f32 %v3020_v14, %v2784_v10 }
 0xa2f   :  { %v1902_v17 = vadd.f32 %v1901_v16, %v1832_v0 }
 0xa31   :  { %vm1905_vm13 = vcmp.ge.f32.partialorder %v1902_v17, 0.0  ;;  %v1912_v2 = vmul.f32 %v2786_v15, %v1902_v17  ;;  %v2819_v15 = vld [vmem:[%s5716_s15 + $0x180] sm:$0xff] }
 0xa33   :  { %v1913_v18 = vsel %vm1905_vm13, %v1902_v17, %v1912_v2  ;;  %v2820_v17 = vld [vmem:[%s5716_s15 + $0x188] sm:$0xff]  ;;  %v2821_v2 = vld [vmem:[%s5716_s15 + $0x190] sm:$0xff] }
 0xa34   :  { %1946 = vrot.lane.b32.xlu0 %v1913_v18, %s3732_s5  ;;  %1914 = vst.msk [vmem:[#allocation2] sm:$0xff] %vm352_vm1, %v1913_v18  ;;  %v1943_v19 = vrot.slane %v1913_v18, 1  ;;  %v1941_v21 = vrot.slane %v1913_v18, 7  ;;  %v3531_v18 = vpack.c.bf16 %v2820_v17, %v2819_v15  ;;  %v2855_v15 = vld [vmem:[%s5716_s15 + $0x278] sm:$0xff] }
 0xa36   :  { %v1944_v20 = vmul.f32 %v1943_v19, %v4728_v30  ;;  %v1942_v22 = vmul.f32 %v1941_v21, %v4736_v36  ;;  %v2822_v19 = vld [vmem:[%s5716_s15 + $0x198] sm:$0xff]  ;;  %v2823_v21 = vld [vmem:[%s5716_s15 + $0x1a0] sm:$0xff] }
 0xa38   :  { %2788 = vmatprep.mubr.msk.f32.mxu0 %vm352_vm1, %v1944_v20  ;;  %v3534_v20 = vpack.c.bf16 %v2822_v19, %v2821_v2  ;;  %v2856_v2 = vld [vmem:[%s5716_s15 + $0x280] sm:$0xff] }
 0xaa6   :  { %v1947_v23 = vpop.permute.xlu0 %1946 }
 0xaa7   :  { %v1949_v7 = vsel %vm352_vm1, %v1942_v22, %v1947_v23  ;;  %v2824_v22 = vld [vmem:[%s5716_s15 + $0x1a8] sm:$0xff] }
 0xaa8   :  { %2024 = vmatmul.mubr.f32.vlgmr.msra.gmra.mrb[30].mxu0 %v1949_v7  ;;  %v3537_v23 = vpack.c.bf16 %v2824_v22, %v2823_v21  ;;  %v2825_v7 = vld [vmem:[%s5716_s15 + $0x1b0] sm:$0xff]  ;;  %v2859_v21 = vld [vmem:[%s5716_s15 + $0x298] sm:$0xff] }
 0xaa9   :  { %3532 = vmatpush1.bf16.msra.mxu0 %v3531_v18  ;;  %v3540_v25 = vpack.c.bf16 %v2826_v24, %v2825_v7  ;;  %v2857_v18 = vld [vmem:[%s5716_s15 + $0x288] sm:$0xff] }
 0xaaa   :  { %3533 = vmatprep.subr.bf16.mxu0 %v3733_v35  ;;  %v3579_v19 = vpack.c.bf16 %v2857_v18, %v2856_v2  ;;  %v2861_v7 = vld [vmem:[%s5716_s15 + $0x2a8] sm:$0xff]  ;;  %v2892_v2 = vld [vmem:[%s5716_s15 + $0x378] sm:$0xff] }
 0xaad   :  { %3535 = vmatpush1.bf16.msra.mxu0 %v3534_v20  ;;  %v2858_v20 = vld [vmem:[%s5716_s15 + $0x290] sm:$0xff] }
 0xaae   :  { %3536 = vmatprep.subr.bf16.mxu0 %v3733_v35  ;;  %v3582_v22 = vpack.c.bf16 %v2859_v21, %v2858_v20  ;;  %v2894_v20 = vld [vmem:[%s5716_s15 + $0x388] sm:$0xff] }
 0xab1   :  { %3538 = vmatpush1.bf16.msra.mxu0 %v3537_v23  ;;  %v2860_v23 = vld [vmem:[%s5716_s15 + $0x2a0] sm:$0xff] }
 0xab2   :  { %3539 = vmatprep.subr.bf16.mxu0 %v3733_v35  ;;  %v3585_v24 = vpack.c.bf16 %v2861_v7, %v2860_v23  ;;  %v2896_v23 = vld [vmem:[%s5716_s15 + $0x398] sm:$0xff] }
 0xab5   :  { %3541 = vmatpush1.bf16.msra.mxu0 %v3540_v25  ;;  %v2862_v25 = vld [vmem:[%s5716_s15 + $0x2b0] sm:$0xff] }
 0xab6   :  { %3542 = vmatprep.subr.bf16.mxu0 %v3733_v35  ;;  %v3588_v27 = vpack.c.bf16 %v2863_v26, %v2862_v25  ;;  %v2898_v25 = vld [vmem:[%s5716_s15 + $0x3a8] sm:$0xff] }
 0xab9   :  { %3544 = vmatpush1.bf16.msra.mxu0 %v3543_v28  ;;  %v2864_v28 = vld [vmem:[%s5716_s15 + $0x2c0] sm:$0xff] }
 0xaba   :  { %3545 = vmatprep.subr.bf16.mxu0 %v3733_v35  ;;  %v3591_v29 = vpack.c.bf16 %v2865_v31, %v2864_v28  ;;  %v2900_v28 = vld [vmem:[%s5716_s15 + $0x3b8] sm:$0xff] }
 0xabd   :  { %3547 = vmatpush1.bf16.msra.mxu0 %v3546_v32  ;;  %v2866_v32 = vld [vmem:[%s5716_s15 + $0x2d0] sm:$0xff] }
 0xabe   :  { %3548 = vmatprep.subr.bf16.mxu0 %v3733_v35  ;;  %v3594_v37 = vpack.c.bf16 %v2867_v33, %v2866_v32  ;;  %v2876_v32 = vld [vmem:[%s5718_s17 + $0x3] ss:$0 sm:$0xff] }
 0xac1   :  { %3550 = vmatpush1.bf16.msra.mxu0 %v3549_v38  ;;  %v2868_v38 = vld [vmem:[%s5716_s15 + $0x2e0] sm:$0xff] }
 0xac2   :  { %3551 = vmatprep.subr.bf16.mxu0 %v3733_v35  ;;  %v3597_v40 = vpack.c.bf16 %v2869_v39, %v2868_v38 }
 0xac5   :  { %3553 = vmatpush1.bf16.msra.mxu0 %v3552_v41  ;;  %v2870_v41 = vld [vmem:[%s5716_s15 + $0x2f0] sm:$0xff] }
 0xac6   :  { %3554 = vmatprep.subr.bf16.mxu0 %v3733_v35  ;;  %v3600_v43 = vpack.c.bf16 %v2871_v42, %v2870_v41 }
 0xac9   :  { %3556 = vmatpush1.bf16.msra.mxu0 %v3555_v44  ;;  %v2845_v44 = vld [vmem:[%s5717_s16 + $0x2] ss:$0 sm:$0xff] }
 0xaca   :  { %3557 = vmatprep.subr.bf16.mxu0 %v3733_v35 }
 0xacd   :  { %3559 = vmatpush1.bf16.msra.mxu0 %v3558_v34 }
 0xace   :  { %3560 = vmatprep.subr.bf16.mxu0 %v3733_v35 }
 0xad1   :  { %3562 = vmatpush1.bf16.msra.mxu0 %v3561_v49 }
 0xad2   :  { %3563 = vmatprep.subr.bf16.mxu0 %v3733_v35 }
 0xad5   :  { %3565 = vmatpush1.bf16.msra.mxu0 %v3564_v52 }
 0xad6   :  { %3602 = vmatprep.subr.bf16.mxu0 %v3733_v35 }
 0xb7b   :  { %v2025_v1 = vpop.f32.mrb[30].mxu0 }
 0xb7c   :  { %v2026_v3 = vadd.f32 %v2787_v62, %v2025_v1  ;;  %v2027_v4 = vpop.f32.mrb[31].mxu0 }
 0xb7d   :  { %v2849_v4 = vld [vmem:[%s5716_s15 + $0x248] sm:$0xff] }
 0xb7e   :  { %v2036_v5 = vmul.f32 %v2789_v63, %v2026_v3  ;;  %vm2029_vm14 = vcmp.ge.f32.partialorder %v2026_v3, 0.0 }
 0xb80   :  { %v2037_v16 = vsel %vm2029_vm14, %v2026_v3, %v2036_v5  ;;  %v2848_v3 = vld [vmem:[%s5716_s15 + $0x240] sm:$0xff]  ;;  %v2850_v5 = vld [vmem:[%s5716_s15 + $0x250] sm:$0xff] }
 0xb81   :  { %2072 = vrot.lane.b32.xlu1 %v2037_v16, %s3732_s5  ;;  %v2069_v6 = vrot.slane %v2037_v16, 1  ;;  %v2067_v10 = vrot.slane %v2037_v16, 7  ;;  %v3567_v16 = vpack.c.bf16 %v2849_v4, %v2848_v3  ;;  %v2884_v3 = vld [vmem:[%s5716_s15 + $0x338] sm:$0xff] }
 0xb83   :  { %v2070_v9 = vmul.f32 %v2069_v6, %v4728_v30  ;;  %v2068_v12 = vmul.f32 %v2067_v10, %v4736_v36  ;;  %v2851_v6 = vld [vmem:[%s5716_s15 + $0x258] sm:$0xff]  ;;  %v2852_v10 = vld [vmem:[%s5716_s15 + $0x260] sm:$0xff] }
 0xb85   :  { %2817 = vmatprep.mubr.msk.f32.mxu1 %vm352_vm1, %v2070_v9  ;;  %v3570_v9 = vpack.c.bf16 %v2851_v6, %v2850_v5  ;;  %v2885_v5 = vld [vmem:[%s5716_s15 + $0x340] sm:$0xff] }
 0xbf3   :  { %v2073_v14 = vpop.permute.xlu1 %2072 }
 0xbf4   :  { %v2075_v0 = vsel %vm352_vm1, %v2068_v12, %v2073_v14  ;;  %v2853_v12 = vld [vmem:[%s5716_s15 + $0x268] sm:$0xff] }
 0xbf5   :  { %2150 = vmatmul.mubr.f32.vlgmr.msra.gmra.mrb[8].mxu1 %v2075_v0  ;;  %v3573_v14 = vpack.c.bf16 %v2853_v12, %v2852_v10  ;;  %v2854_v0 = vld [vmem:[%s5716_s15 + $0x270] sm:$0xff]  ;;  %v2888_v10 = vld [vmem:[%s5716_s15 + $0x358] sm:$0xff] }
 0xbf6   :  { %3568 = vmatpush1.bf16.msra.mxu1 %v3567_v16  ;;  %v3576_v17 = vpack.c.bf16 %v2855_v15, %v2854_v0  ;;  %v2886_v16 = vld [vmem:[%s5716_s15 + $0x348] sm:$0xff] }
 0xbf7   :  { %3569 = vmatprep.subr.bf16.mxu1 %v3733_v35  ;;  %v3615_v6 = vpack.c.bf16 %v2886_v16, %v2885_v5  ;;  %v2890_v0 = vld [vmem:[%s5716_s15 + $0x368] sm:$0xff]  ;;  %v2572_v16 = vld [vmem:[%s5719_s18 + $0x98] sm:$0xff] }
 0xbf8   :  { %v2570_v5 = vld [vmem:[%s5719_s18 + $0x88] sm:$0xff] }
 0xbfa   :  { %3571 = vmatpush1.bf16.msra.mxu1 %v3570_v9  ;;  %v2887_v9 = vld [vmem:[%s5716_s15 + $0x350] sm:$0xff] }
 0xbfb   :  { %3572 = vmatprep.subr.bf16.mxu1 %v3733_v35  ;;  %v3618_v12 = vpack.c.bf16 %v2888_v10, %v2887_v9  ;;  %v3654_v9 = vpack.c.bf16 %v2572_v16, %v2570_v5  ;;  %v2569_v10 = vld [vmem:[%s5719_s18 + $0x80] sm:$0xff] }
 0xbfe   :  { %3574 = vmatpush1.bf16.msra.mxu1 %v3573_v14  ;;  %v2889_v14 = vld [vmem:[%s5716_s15 + $0x360] sm:$0xff] }
 0xbff   :  { %3575 = vmatprep.subr.bf16.mxu1 %v3733_v35  ;;  %v3621_v15 = vpack.c.bf16 %v2890_v0, %v2889_v14  ;;  %v2574_v14 = vld [vmem:[%s5719_s18 + $0xa8] sm:$0xff]  ;;  %v2576_v0 = vld [vmem:[%s5719_s18 + $0xb8] sm:$0xff] }
 0xc02   :  { %3577 = vmatpush1.bf16.msra.mxu1 %v3576_v17  ;;  %v2891_v17 = vld [vmem:[%s5716_s15 + $0x370] sm:$0xff] }
 0xc03   :  { %3578 = vmatprep.subr.bf16.mxu1 %v3733_v35  ;;  %v3624_v18 = vpack.c.bf16 %v2892_v2, %v2891_v17  ;;  %v3658_v17 = vpack.c.bf16 %v2576_v0, %v2574_v14  ;;  %v2573_v2 = vld [vmem:[%s5719_s18 + $0xa0] sm:$0xff] }
 0xc06   :  { %3580 = vmatpush1.bf16.msra.mxu1 %v3579_v19  ;;  %v2893_v19 = vld [vmem:[%s5716_s15 + $0x380] sm:$0xff] }
 0xc07   :  { %3581 = vmatprep.subr.bf16.mxu1 %v3733_v35  ;;  %v3627_v21 = vpack.c.bf16 %v2894_v20, %v2893_v19  ;;  %v2578_v19 = vld [vmem:[%s5719_s18 + $0xc8] sm:$0xff]  ;;  %v2580_v20 = vld [vmem:[%s5719_s18 + $0xd8] sm:$0xff] }
 0xc0a   :  { %3583 = vmatpush1.bf16.msra.mxu1 %v3582_v22  ;;  %v2895_v22 = vld [vmem:[%s5716_s15 + $0x390] sm:$0xff] }
 0xc0b   :  { %3584 = vmatprep.subr.bf16.mxu1 %v3733_v35  ;;  %v3630_v7 = vpack.c.bf16 %v2896_v23, %v2895_v22  ;;  %v3662_v22 = vpack.c.bf16 %v2580_v20, %v2578_v19  ;;  %v2577_v23 = vld [vmem:[%s5719_s18 + $0xc0] sm:$0xff] }
 0xc0e   :  { %3586 = vmatpush1.bf16.msra.mxu1 %v3585_v24  ;;  %v2897_v24 = vld [vmem:[%s5716_s15 + $0x3a0] sm:$0xff] }
 0xc0f   :  { %3587 = vmatprep.subr.bf16.mxu1 %v3733_v35  ;;  %v3633_v26 = vpack.c.bf16 %v2898_v25, %v2897_v24  ;;  %v2582_v24 = vld [vmem:[%s5719_s18 + $0xe8] sm:$0xff]  ;;  %v2584_v25 = vld [vmem:[%s5719_s18 + $0xf8] sm:$0xff] }
 0xc12   :  { %3589 = vmatpush1.bf16.msra.mxu1 %v3588_v27  ;;  %v2899_v27 = vld [vmem:[%s5716_s15 + $0x3b0] sm:$0xff] }
 0xc13   :  { %3590 = vmatprep.subr.bf16.mxu1 %v3733_v35  ;;  %v3636_v31 = vpack.c.bf16 %v2900_v28, %v2899_v27  ;;  %v3666_v27 = vpack.c.bf16 %v2584_v25, %v2582_v24  ;;  %v2581_v28 = vld [vmem:[%s5719_s18 + $0xe0] sm:$0xff] }
 0xc16   :  { %3592 = vmatpush1.bf16.msra.mxu1 %v3591_v29  ;;  %v2874_v29 = vld [vmem:[%s5717_s16 + $0x3] ss:$0 sm:$0xff] }
 0xc17   :  { %3593 = vmatprep.subr.bf16.mxu1 %v3733_v35 }
 0xc1a   :  { %3595 = vmatpush1.bf16.msra.mxu1 %v3594_v37 }
 0xc1b   :  { %3596 = vmatprep.subr.bf16.mxu1 %v3733_v35 }
 0xc1e   :  { %3598 = vmatpush1.bf16.msra.mxu1 %v3597_v40 }
 0xc1f   :  { %3599 = vmatprep.subr.bf16.mxu1 %v3733_v35 }
 0xc22   :  { %3601 = vmatpush1.bf16.msra.mxu1 %v3600_v43 }
 0xcc8   :  { %v2151_v55 = vpop.f32.mrb[8].mxu1 }
 0xcc9   :  { %v2152_v56 = vadd.f32 %v2816_v53, %v2151_v55  ;;  %v2153_v57 = vpop.f32.mrb[9].mxu1 }
 0xcca   :  { %v2878_v57 = vld [vmem:[%s5716_s15 + $0x308] sm:$0xff] }
 0xccb   :  { %v2162_v58 = vmul.f32 %v2818_v54, %v2152_v56  ;;  %vm2155_vm15 = vcmp.ge.f32.partialorder %v2152_v56, 0.0 }
 0xccd   :  { %v2163_v59 = vsel %vm2155_vm15, %v2152_v56, %v2162_v58  ;;  %v2877_v56 = vld [vmem:[%s5716_s15 + $0x300] sm:$0xff]  ;;  %v2879_v58 = vld [vmem:[%s5716_s15 + $0x310] sm:$0xff] }
 0xcce   :  { %2198 = vrot.lane.b32.xlu0 %v2163_v59, %s3732_s5  ;;  %v2195_v60 = vrot.slane %v2163_v59, 1  ;;  %v2193_v61 = vrot.slane %v2163_v59, 7  ;;  %v3603_v59 = vpack.c.bf16 %v2878_v57, %v2877_v56  ;;  %v2562_v56 = vld [vmem:[%s5719_s18 + $0x48] sm:$0xff]  ;;  %v2564_v57 = vld [vmem:[%s5719_s18 + $0x58] sm:$0xff] }
 0xcd0   :  { %v2196_v8 = vmul.f32 %v2195_v60, %v4728_v30  ;;  %v2194_v62 = vmul.f32 %v2193_v61, %v4736_v36  ;;  %v2880_v60 = vld [vmem:[%s5716_s15 + $0x318] sm:$0xff]  ;;  %v2881_v61 = vld [vmem:[%s5716_s15 + $0x320] sm:$0xff] }
 0xcd2   :  { %2846 = vmatprep.mubr.msk.f32.mxu0 %vm352_vm1, %v2196_v8  ;;  %v3606_v8 = vpack.c.bf16 %v2880_v60, %v2879_v58  ;;  %v2561_v60 = vld [vmem:[%s5719_s18 + $0x40] sm:$0xff] }
 0xd40   :  { %v2199_v63 = vpop.permute.xlu0 %2198 }
 0xd41   :  { %v2201_v1 = vsel %vm352_vm1, %v2194_v62, %v2199_v63  ;;  %v2882_v62 = vld [vmem:[%s5716_s15 + $0x328] sm:$0xff] }
 0xd42   :  { %2276 = vmatmul.mubr.f32.vlgmr.msra.gmra.mrb[32].mxu0 %v2201_v1  ;;  %v3609_v63 = vpack.c.bf16 %v2882_v62, %v2881_v61  ;;  %v2883_v1 = vld [vmem:[%s5716_s15 + $0x330] sm:$0xff]  ;;  %v2566_v61 = vld [vmem:[%s5719_s18 + $0x68] sm:$0xff]  ;;  %v2568_v62 = vld [vmem:[%s5719_s18 + $0x78] sm:$0xff] }
 0xd43   :  { %3604 = vmatpush1.bf16.msra.mxu0 %v3603_v59  ;;  %v3612_v4 = vpack.c.bf16 %v2884_v3, %v2883_v1  ;;  %v3646_v59 = vpack.c.bf16 %v2564_v57, %v2562_v56  ;;  %v3650_v1 = vpack.c.bf16 %v2568_v62, %v2566_v61  ;;  %v2565_v3 = vld [vmem:[%s5719_s18 + $0x60] sm:$0xff] }
 0xd44   :  { %3605 = vmatprep.subr.bf16.mxu0 %v3733_v35  ;;  %v2903_v57 = vld [vmem:[%s5717_s16 + $0x4] ss:$0 sm:$0xff] }
 0xd47   :  { %3607 = vmatpush1.bf16.msra.mxu0 %v3606_v8  ;;  %v2563_v8 = vld [vmem:[%s5719_s18 + $0x50] sm:$0xff] }
 0xd48   :  { %3608 = vmatprep.subr.bf16.mxu0 %v3733_v35 }
 0xd4b   :  { %3610 = vmatpush1.bf16.msra.mxu0 %v3609_v63  ;;  %v3648_v63 = vpack.c.bf16 %v2563_v8, %v2561_v60 }
 0xd4c   :  { %3611 = vmatprep.subr.bf16.mxu0 %v3733_v35 }
 0xd4f   :  { %3613 = vmatpush1.bf16.msra.mxu0 %v3612_v4  ;;  %v2567_v4 = vld [vmem:[%s5719_s18 + $0x70] sm:$0xff] }
 0xd50   :  { %3614 = vmatprep.subr.bf16.mxu0 %v3733_v35 }
 0xd53   :  { %3616 = vmatpush1.bf16.msra.mxu0 %v3615_v6  ;;  %v3652_v6 = vpack.c.bf16 %v2567_v4, %v2565_v3 }
 0xd54   :  { %3617 = vmatprep.subr.bf16.mxu0 %v3733_v35 }
 0xd57   :  { %3619 = vmatpush1.bf16.msra.mxu0 %v3618_v12  ;;  %v2571_v12 = vld [vmem:[%s5719_s18 + $0x90] sm:$0xff] }
 0xd58   :  { %3620 = vmatprep.subr.bf16.mxu0 %v3733_v35 }
 0xd5b   :  { %3622 = vmatpush1.bf16.msra.mxu0 %v3621_v15  ;;  %v3656_v15 = vpack.c.bf16 %v2571_v12, %v2569_v10  ;;  %v2601_v10 = vld [vmem:[%s5720_s19] sm:$0x3] }
 0xd5c   :  { %3623 = vmatprep.subr.bf16.mxu0 %v3733_v35  ;;  %v2606_v12 = vrot.slane %v2601_v10, %v4369_v11  ;;  %v2610_v14 = vrot.slane %v2601_v10, %v4374_v13 }
 0xd5f   :  { %3625 = vmatpush1.bf16.msra.mxu0 %v3624_v18  ;;  %v2575_v18 = vld [vmem:[%s5719_s18 + $0xb0] sm:$0xff] }
 0xd60   :  { %3626 = vmatprep.subr.bf16.mxu0 %v3733_v35 }
 0xd63   :  { %3628 = vmatpush1.bf16.msra.mxu0 %v3627_v21  ;;  %v3660_v21 = vpack.c.bf16 %v2575_v18, %v2573_v2 }
 0xd64   :  { %3629 = vmatprep.subr.bf16.mxu0 %v3733_v35 }
 0xd67   :  { %3631 = vmatpush1.bf16.msra.mxu0 %v3630_v7  ;;  %v2579_v7 = vld [vmem:[%s5719_s18 + $0xd0] sm:$0xff] }
 0xd68   :  { %3632 = vmatprep.subr.bf16.mxu0 %v3733_v35 }
 0xd6b   :  { %3634 = vmatpush1.bf16.msra.mxu0 %v3633_v26  ;;  %v3664_v26 = vpack.c.bf16 %v2579_v7, %v2577_v23 }
 0xd6c   :  { %3635 = vmatprep.subr.bf16.mxu0 %v3733_v35 }
 0xd6f   :  { %3637 = vmatpush1.bf16.msra.mxu0 %v3636_v31  ;;  %v2583_v31 = vld [vmem:[%s5719_s18 + $0xf0] sm:$0xff] }
 0xe15   :  { %v2277_v46 = vpop.f32.mrb[32].mxu0 }
 0xe16   :  { %v2278_v34 = vadd.f32 %v2845_v44, %v2277_v46  ;;  %v2279_v47 = vpop.f32.mrb[33].mxu0  ;;  %v2554_v46 = vld [vmem:[%s5719_s18 + $0x8] sm:$0xff] }
 0xe17   :  { %v2553_v47 = vld [vmem:[%s5719_s18] sm:$0xff] }
 0xe18   :  { %v2288_v48 = vmul.f32 %v2847_v45, %v2278_v34  ;;  %vm2281_vm0 = vcmp.ge.f32.partialorder %v2278_v34, 0.0 }
 0xe1a   :  { %v2289_v49 = vsel %vm2281_vm0, %v2278_v34, %v2288_v48  ;;  %v2556_v34 = vld [vmem:[%s5719_s18 + $0x18] sm:$0xff] }
 0xe1b   :  { %2324 = vrot.lane.b32.xlu1 %v2289_v49, %s3732_s5  ;;  %v2321_v50 = vrot.slane %v2289_v49, 1  ;;  %v2319_v52 = vrot.slane %v2289_v49, 7  ;;  %v3638_v48 = vpack.c.bf16 %v2556_v34, %v2554_v46  ;;  %v2555_v49 = vld [vmem:[%s5719_s18 + $0x10] sm:$0xff]  ;;  %v2596_v46 = vld [vmem:[%s5719_s18 + $0x158] sm:$0xff] }
 0xe1d   :  { %v2322_v51 = vmul.f32 %v2321_v50, %v4728_v30  ;;  %v2320_v53 = vmul.f32 %v2319_v52, %v4736_v36  ;;  %v2558_v50 = vld [vmem:[%s5719_s18 + $0x28] sm:$0xff]  ;;  %v3640_v52 = vpack.c.bf16 %v2555_v49, %v2553_v47  ;;  %3639 = vmatprep.subr.bf16.mxu1 %v3638_v48  ;;  %v2593_v48 = vld [vmem:[%s5719_s18 + $0x140] sm:$0xff]  ;;  %v2595_v49 = vld [vmem:[%s5719_s18 + $0x150] sm:$0xff] }
 0xe1f   :  { %2875 = vmatprep.mubr.msk.f32.mxu1 %vm352_vm1, %v2322_v51  ;;  %v2560_v51 = vld [vmem:[%s5719_s18 + $0x38] sm:$0xff] }
 0xe8d   :  { %v2325_v54 = vpop.permute.xlu1 %2324 }
 0xe8e   :  { %v2327_v55 = vsel %vm352_vm1, %v2320_v53, %v2325_v54  ;;  %v3642_v53 = vpack.c.bf16 %v2560_v51, %v2558_v50  ;;  %v2557_v54 = vld [vmem:[%s5719_s18 + $0x20] sm:$0xff]  ;;  %v2598_v50 = vld [vmem:[%s5719_s18 + $0x168] sm:$0xff]  ;;  %v2600_v51 = vld [vmem:[%s5719_s18 + $0x178] sm:$0xff] }
 0xe8f   :  { %2402 = vmatmul.mubr.f32.vlgmr.msra.gmra.mrb[10].mxu1 %v2327_v55  ;;  %v2559_v55 = vld [vmem:[%s5719_s18 + $0x30] sm:$0xff] }
 0xe90   :  { %3641 = vmatpush1.bf16.msra.mxu1 %v3640_v52  ;;  %v3644_v58 = vpack.c.bf16 %v2559_v55, %v2557_v54  ;;  %v3680_v52 = vpack.c.bf16 %v2595_v49, %v2593_v48  ;;  %v2597_v54 = vld [vmem:[%s5719_s18 + $0x160] sm:$0xff]  ;;  %v2599_v55 = vld [vmem:[%s5719_s18 + $0x170] sm:$0xff] }
 0xe91   :  { %3643 = vmatprep.subr.bf16.mxu1 %v3642_v53  ;;  %v3682_v53 = vpack.c.bf16 %v2600_v51, %v2598_v50  ;;  %v3684_v56 = vpack.c.bf16 %v2599_v55, %v2597_v54 }
 0xe94   :  { %3645 = vmatpush1.bf16.msra.mxu1 %v3644_v58  ;;  %v2905_v58 = vld [vmem:[%s5718_s17 + $0x4] ss:$0 sm:$0xff] }
 0xe95   :  { %3647 = vmatprep.subr.bf16.mxu1 %v3646_v59 }
 0xe98   :  { %3649 = vmatpush1.bf16.msra.mxu1 %v3648_v63  ;;  %v2542_v63 = vld [vmem:[#allocation2] sm:$0xff] }
 0xe99   :  { %3651 = vmatprep.subr.bf16.mxu1 %v3650_v1 }
 0xe9c   :  { %3653 = vmatpush1.bf16.msra.mxu1 %v3652_v6 }
 0xe9d   :  { %3655 = vmatprep.subr.bf16.mxu1 %v3654_v9 }
 0xea0   :  { %3657 = vmatpush1.bf16.msra.mxu1 %v3656_v15 }
 0xea1   :  { %3659 = vmatprep.subr.bf16.mxu1 %v3658_v17 }
 0xea4   :  { %3661 = vmatpush1.bf16.msra.mxu1 %v3660_v21 }
 0xea5   :  { %3663 = vmatprep.subr.bf16.mxu1 %v3662_v22 }
 0xea8   :  { %3665 = vmatpush1.bf16.msra.mxu1 %v3664_v26 }
 0xea9   :  { %3667 = vmatprep.subr.bf16.mxu1 %v3666_v27 }
 0xf62   :  { %v2403_v33 = vpop.f32.mrb[10].mxu1 }
 0xf63   :  { %v2404_v37 = vadd.f32 %v2874_v29, %v2403_v33  ;;  %v2405_v38 = vpop.f32.mrb[11].mxu1  ;;  %v2586_v29 = vld [vmem:[%s5719_s18 + $0x108] sm:$0xff]  ;;  %v3668_v33 = vpack.c.bf16 %v2583_v31, %v2581_v28 }
 0xf64   :  { %v2585_v38 = vld [vmem:[%s5719_s18 + $0x100] sm:$0xff] }
 0xf65   :  { %v2414_v39 = vmul.f32 %v2876_v32, %v2404_v37  ;;  %vm2407_vm2 = vcmp.ge.f32.partialorder %v2404_v37, 0.0  ;;  %v2588_v32 = vld [vmem:[%s5719_s18 + $0x118] sm:$0xff]  ;;  %3669 = vmatpush1.bf16.msra.mxu1 %v3668_v33 }
 0xf67   :  { %v2415_v40 = vsel %vm2407_vm2, %v2404_v37, %v2414_v39  ;;  %v3670_v37 = vpack.c.bf16 %v2588_v32, %v2586_v29  ;;  %v2587_v39 = vld [vmem:[%s5719_s18 + $0x110] sm:$0xff] }
 0xf68   :  { %2450 = vrot.lane.b32.xlu0 %v2415_v40, %s3732_s5  ;;  %v2447_v41 = vrot.slane %v2415_v40, 1  ;;  %v2445_v42 = vrot.slane %v2415_v40, 7  ;;  %v2590_v40 = vld [vmem:[%s5719_s18 + $0x128] sm:$0xff] }
 0xf69   :  { %3671 = vmatprep.subr.bf16.mxu1 %v3670_v37 }
 0xf6a   :  { %v2448_v35 = vmul.f32 %v2447_v41, %v4728_v30  ;;  %v2446_v43 = vmul.f32 %v2445_v42, %v4736_v36  ;;  %v2592_v41 = vld [vmem:[%s5719_s18 + $0x138] sm:$0xff] }
 0xf6b   :  { %v3674_v42 = vpack.c.bf16 %v2592_v41, %v2590_v40 }
 0xf6c   :  { %2904 = vmatprep.mubr.msk.f32.mxu0 %vm352_vm1, %v2448_v35  ;;  %v3672_v35 = vpack.c.bf16 %v2587_v39, %v2585_v38 }
 0xf6e   :  { %3673 = vmatpush1.bf16.msra.mxu1 %v3672_v35 }
 0xf6f   :  { %3675 = vmatprep.subr.bf16.mxu1 %v3674_v42 }
 0xfda   :  { %v2451_v44 = vpop.permute.xlu0 %2450 }
 0xfdb   :  { %v2453_v45 = vsel %vm352_vm1, %v2446_v43, %v2451_v44  ;;  %v2589_v43 = vld [vmem:[%s5719_s18 + $0x120] sm:$0xff]  ;;  %v2591_v44 = vld [vmem:[%s5719_s18 + $0x130] sm:$0xff] }
 0xfdc   :  { %2528 = vmatmul.mubr.f32.vlgmr.msra.gmra.mrb[34].mxu0 %v2453_v45  ;;  %v2594_v45 = vld [vmem:[%s5719_s18 + $0x148] sm:$0xff]  ;;  %v3676_v34 = vpack.c.bf16 %v2591_v44, %v2589_v43  ;;  %s3737_s18 = smov [#allocation3]  }
 0xfdd   :  { %v3678_v47 = vpack.c.bf16 %v2596_v46, %v2594_v45 }
 0xfde   :  { %3677 = vmatpush1.bf16.msra.mxu1 %v3676_v34 }
 0xfdf   :  { %3679 = vmatprep.subr.bf16.mxu1 %v3678_v47 }
 0xfe2   :  { %3681 = vmatpush1.bf16.msra.mxu1 %v3680_v52 }
 0xfe3   :  { %3683 = vmatprep.subr.bf16.mxu1 %v3682_v53 }
 0xfe6   :  { %3685 = vmatpush1.bf16.msra.mxu1 %v3684_v56 }
0x10af   :  { %v2529_v59 = vpop.f32.mrb[34].mxu0 }
0x10b0   :  { %v2530_v60 = vadd.f32 %v2903_v57, %v2529_v59  ;;  %v2531_v8 = vpop.f32.mrb[35].mxu0 }
0x10b2   :  { %vm2533_vm3 = vcmp.ge.f32.partialorder %v2530_v60, 0.0  ;;  %v2540_v61 = vmul.f32 %v2905_v58, %v2530_v60 }
0x10b4   :  { %v2541_v62 = vsel %vm2533_vm3, %v2530_v60, %v2540_v61 }
0x10b5   :  { %v2543_v1 = vadd.f32 %v2542_v63, %v2541_v62 }
0x10b7   :  { %2549 = vrot.lane.b32.xlu1 %v2543_v1, %s3732_s5  ;;  %v2546_v3 = vrot.slane %v2543_v1, 1  ;;  %v2544_v5 = vrot.slane %v2543_v1, 7  ;;  %s2695_s5 = sshll.u32 %s3737_s18, 4  ;;  %s2696_s5 = int_to_ptr.vmem [resolvable:$true] %s2695_s5 }
0x10b8   :  { %s3707_s15 = scalar_lea.vmem %s2696_s5, 256  ;;  %p3712_p1 = scmp.lt.s32.totalorder %s2696_s5, %s2696_s5 }
0x10b9   :  { %v2547_v4 = vmul.f32 %v2546_v3, %v4728_v30  ;;  %v2545_v16 = vmul.f32 %v2544_v5, %v4736_v36  ;;  %p3708_p0 = scmp.ne.s32.totalorder %s2696_s5, %s3707_s15  ;;  %p3713_p2 = scmp.lt.s32.totalorder %s3707_s15, %s3707_s15 }
0x10bb   :  { %2906 = vmatprep.mubr.msk.f32.mxu1 %vm352_vm1, %v2547_v4  ;;  %p3714_p3 = por %p3713_p2, %p3712_p1 }
0x10bd   :  { %p3715_p4 = pnand %p3714_p3, %p3708_p0 }
0x1129   :  { %v2550_v6 = vpop.permute.xlu1 %2549 }
0x112a   :  { %v2552_v9 = vsel %vm352_vm1, %v2545_v16, %v2550_v6 }
0x112b   :  { %2681 = vmatmul.mubr.f32.vlgmr.msra.gmra.mrb[12].mxu1 %v2552_v9 }
0x11fe   :  { %v2682_v30 = vpop.f32.mrb[12].mxu1 }
0x11ff   :  { %v2683_v0 = vadd.f32 %v2682_v30, %v2606_v12  ;;  %v2684_v15 = vpop.f32.mrb[13].mxu1 }
0x1200   :  { %v2685_v17 = vadd.f32 %v2684_v15, %v2610_v14 }
0x1201   :  { %2687 = vst [vmem:[#allocation3] sm:$0xff] %v2683_v0 }
0x1202   :  { %2688 = vst [vmem:[#allocation3 + $0x8] sm:$0xff] %v2685_v17 }
0x1203   :  { %3718 = shalt.err (!%p3715_p4)
}
0x1204   :  { %s3719_s11 = scalar_lea.hbm %s5723_s22, 256 }
0x1205   :  { %p3720_p5 = scmp.ne.s32.totalorder %s5723_s22, %s3719_s11  ;;  %p3723_p6 = scmp.lt.u32.totalorder %s3719_s11, %s5723_s22 }
0x1207   :  { %p3725_p7 = pnand %p3723_p6, %p3720_p5 }
0x1209   :  { %3728 = shalt.err (!%p3725_p7)
}
0x120a   :  { %2698 = dma.vmem_to_hbm [thread:$0]  %s2696_s5, 256, %s5723_s22, [#allocation4]  }
0x120b   :  { %3729 = dma.done.wait [#allocation4], 256  }
0x120c   :  { %3730 = vsyncadd [#allocation4], 4294967040 }
0x120d   :  { %2702 = vsyncpa [#allocation4], 1 }

</bundles_post_ra>
